<compile_context>
chip_gen: v7x
topology: tpu7x:2x2x1
jax: 0.10.0
libtpu: 0.0.40
codegen_flags: <defaults>
</compile_context>

<pallas_src>
import functools
import numpy as np

import jax
import jax.numpy as jnp
from jax.experimental import pallas as pl
from jax.experimental.pallas import tpu as pltpu

NEG_SLOPE = 0.01       # torch F.leaky_relu default
MAX_TILE_ROWS = 1024   # row-tile cap for the pointwise channel kernels
HEAD_MAX_ROWS = 256    # row-tile cap for the head (keeps (tile,256) f32 small)


# ----------------------------------------------------------------------------
# small host-side helpers
# ----------------------------------------------------------------------------
def _cdiv(a, b):
    return -(-a // b)


def _round_up(a, b):
    return _cdiv(a, b) * b


def _default_min_steps():
    """>=2 parallel grid steps only on 2-TensorCore chips (v7x); 1 elsewhere."""
    try:
        kind = jax.devices()[0].device_kind.lower()
    except Exception:
        return 2
    for tag in ("v2", "v3", "v4", "v5", "v6"):
        if tag in kind:
            return 1
    return 2


_MIN_STEPS = _default_min_steps()
_PAR1 = pltpu.CompilerParams(dimension_semantics=("parallel",))


def _row_tiling(n, max_rows=MAX_TILE_ROWS, min_steps=1):
    """Pick (tile, n_pad, steps): tile % 8 == 0, steps >= min_steps, tile*steps >= n."""
    n8 = _round_up(max(n, 8), 8)
    steps = max(min_steps, _cdiv(n8, max_rows))
    tile = _round_up(_cdiv(n8, steps), 8)
    return tile, tile * steps, steps


def _pad_rows(x2, n_pad):
    n = x2.shape[0]
    if n_pad == n:
        return x2
    return jnp.pad(x2, ((0, n_pad - n), (0, 0)))


def _lane_copies(c):
    """How many channel groups of width c fit in the 128-lane vreg (1 if none)."""
    return 128 // c if (0 < c <= 128 and 128 % c == 0) else 1


def _leaky(y):
    return jnp.where(y > 0, y, NEG_SLOPE * y)


def _blockdiag_channel(w, copies):
    """(c_in, c_out) dense weight -> (copies*c_in, copies*c_out) block-diagonal."""
    w = w.astype(jnp.float32)
    if copies == 1:
        return w
    eye = jnp.eye(copies, dtype=jnp.float32)
    bd = jnp.einsum("jk,io->jiko", eye, w)          # (copies, c_in, copies, c_out)
    c_in, c_out = w.shape
    return bd.reshape(copies * c_in, copies * c_out)


# ----------------------------------------------------------------------------
# Pallas kernels
# ----------------------------------------------------------------------------
def _lift_kernel(xin_ref, xeps_ref, wi_ref, bi_ref, we_ref, be_ref,
                 oin_ref, oeps_ref, op_ref):
    # fused fc_inc, fc_eps and the first x * x_eps product
    xin = jnp.dot(xin_ref[...], wi_ref[...],
                  preferred_element_type=jnp.float32) + bi_ref[...]
    xeps = jnp.dot(xeps_ref[...], we_ref[...],
                   preferred_element_type=jnp.float32) + be_ref[...]
    oin_ref[...] = xin.astype(oin_ref.dtype)
    oeps_ref[...] = xeps.astype(oeps_ref.dtype)
    op_ref[...] = (xin * xeps).astype(op_ref.dtype)


def _layer_kernel(xs_ref, inc_ref, eps_ref, w0_ref, b0_ref, w1_ref, b1_ref,
                  xc_ref, prod_ref):
    # lane-dense packed view: h = leaky(xs @ W0bd + b0); y = leaky(h @ W1bd + b1)
    # xc = y + incident ; prod = xc * x_eps   (input of the next layer's FFT)
    h = jnp.dot(xs_ref[...], w0_ref[...],
                preferred_element_type=jnp.float32) + b0_ref[...]
    h = _leaky(h)
    y = jnp.dot(h, w1_ref[...],
                preferred_element_type=jnp.float32) + b1_ref[...]
    y = _leaky(y)
    xc = y + inc_ref[...]
    xc_ref[...] = xc.astype(xc_ref.dtype)
    prod_ref[...] = (xc * eps_ref[...]).astype(prod_ref.dtype)


def _head_kernel(x_ref, w1_ref, b1_ref, w2_ref, b2_ref, o_ref):
    # fused fc1 + leaky + fc2, fc2 output padded to a lane-dense 128-wide store
    h = jnp.dot(x_ref[...], w1_ref[...],
                preferred_element_type=jnp.float32) + b1_ref[...]
    h = _leaky(h)
    y = jnp.dot(h, w2_ref[...],
                preferred_element_type=jnp.float32) + b2_ref[...]
    o_ref[...] = y.astype(o_ref.dtype)


def _spectral_kernel(xr_ref, xi_ref, wr_ref, wi_ref, or_ref, oi_ref):
    # One grid step handles `gt` frequency groups.  Per group: lane-dense
    # (B, 128) @ (128, 128) block-diagonal complex matmul (4-term product).
    gt = xr_ref.shape[0]
    for g in range(gt):                       # small static unroll
        ar = xr_ref[g]                        # (B, lane)
        ai = xi_ref[g]
        br = wr_ref[g]                        # (lane, lane) block-diagonal
        bi = wi_ref[g]
        rr = jnp.dot(ar, br, preferred_element_type=jnp.float32)
        ii = jnp.dot(ai, bi, preferred_element_type=jnp.float32)
        ri = jnp.dot(ar, bi, preferred_element_type=jnp.float32)
        ir = jnp.dot(ai, br, preferred_element_type=jnp.float32)
        or_ref[g] = (rr - ii).astype(or_ref.dtype)
        oi_ref[g] = (ri + ir).astype(oi_ref.dtype)


# ----------------------------------------------------------------------------
# Pallas wrappers
# ----------------------------------------------------------------------------
def pallas_lift(x_in4, x_eps3, params):
    """fc_inc(x_in4), fc_eps(x_eps3) and their product, fused. Channels-last."""
    spatial = x_in4.shape[:-1]
    n = int(np.prod(spatial))
    width = params["fc_inc_w"].shape[1]
    tile, n_pad, steps = _row_tiling(n, min_steps=_MIN_STEPS)

    xin2 = _pad_rows(x_in4.reshape(n, 4).astype(jnp.float32), n_pad)
    xeps2 = _pad_rows(x_eps3.reshape(n, 3).astype(jnp.float32), n_pad)
    bi = params["fc_inc_b"].reshape(1, width).astype(jnp.float32)
    be = params["fc_eps_b"].reshape(1, width).astype(jnp.float32)

    row4 = pl.BlockSpec((tile, 4), lambda i: (i, 0))
    row3 = pl.BlockSpec((tile, 3), lambda i: (i, 0))
    w4 = pl.BlockSpec((4, width), lambda i: (0, 0))
    w3 = pl.BlockSpec((3, width), lambda i: (0, 0))
    bsp = pl.BlockSpec((1, width), lambda i: (0, 0))
    osp = pl.BlockSpec((tile, width), lambda i: (i, 0))
    osh = jax.ShapeDtypeStruct((n_pad, width), jnp.float32)

    x_in, x_eps, prod = pl.pallas_call(
        _lift_kernel,
        grid=(steps,),
        in_specs=[row4, row3, w4, bsp, w3, bsp],
        out_specs=[osp, osp, osp],
        out_shape=[osh, osh, osh],
        compiler_params=_PAR1,
    )(xin2, xeps2, params["fc_inc_w"], bi, params["fc_eps_w"], be)

    out_sh = spatial + (width,)
    return (x_in[:n].reshape(out_sh),
            x_eps[:n].reshape(out_sh),
            prod[:n].reshape(out_sh))


def pallas_layer(xs_p, inc_p, eps_p, w0_bd, b0_t, w1_bd, b1_t,
                 tile, np_pad, steps, lane):
    """Fused w0/leaky/w1/leaky/+incident and next-layer product on packed
    (np_pad, lane) lane-dense activations with block-diagonal weights."""
    row = pl.BlockSpec((tile, lane), lambda i: (i, 0))
    wsp = pl.BlockSpec((lane, lane), lambda i: (0, 0))
    bsp = pl.BlockSpec((1, lane), lambda i: (0, 0))
    osh = jax.ShapeDtypeStruct((np_pad, lane), jnp.float32)

    cost = pl.CostEstimate(
        flops=int(4 * np_pad * lane * lane + 8 * np_pad * lane),
        transcendentals=0,
        bytes_accessed=int((5 * np_pad * lane + 2 * lane * lane + 2 * lane) * 4))

    xc_p, prod_p = pl.pallas_call(
        _layer_kernel,
        grid=(steps,),
        in_specs=[row, row, row, wsp, bsp, wsp, bsp],
        out_specs=[row, row],
        out_shape=[osh, osh],
        compiler_params=_PAR1,
        cost_estimate=cost,
    )(xs_p, inc_p, eps_p, w0_bd, b0_t, w1_bd, b1_t)
    return xc_p, prod_p


def pallas_head(x, params):
    """Fused fc1 + leaky + fc2 with a lane-dense (padded-to-128) output store."""
    spatial = x.shape[:-1]
    width = x.shape[-1]
    hidden = params["fc1_w"].shape[1]
    cout = params["fc2_w"].shape[1]
    cpad = _round_up(cout, 128)
    n = int(np.prod(spatial))
    tile, n_pad, steps = _row_tiling(n, max_rows=HEAD_MAX_ROWS,
                                     min_steps=_MIN_STEPS)

    x2 = _pad_rows(x.reshape(n, width).astype(jnp.float32), n_pad)
    b1 = params["fc1_b"].reshape(1, hidden).astype(jnp.float32)
    w2p = jnp.pad(params["fc2_w"].astype(jnp.float32), ((0, 0), (0, cpad - cout)))
    b2p = jnp.pad(params["fc2_b"].astype(jnp.float32),
                  (0, cpad - cout)).reshape(1, cpad)

    out = pl.pallas_call(
        _head_kernel,
        grid=(steps,),
        in_specs=[pl.BlockSpec((tile, width), lambda i: (i, 0)),
                  pl.BlockSpec((width, hidden), lambda i: (0, 0)),
                  pl.BlockSpec((1, hidden), lambda i: (0, 0)),
                  pl.BlockSpec((hidden, cpad), lambda i: (0, 0)),
                  pl.BlockSpec((1, cpad), lambda i: (0, 0))],
        out_specs=pl.BlockSpec((tile, cpad), lambda i: (i, 0)),
        out_shape=jax.ShapeDtypeStruct((n_pad, cpad), jnp.float32),
        compiler_params=_PAR1,
    )(x2, params["fc1_w"], b1, w2p, b2p)

    return out[:n, :cout].reshape(spatial + (cout,))


def pallas_spectral(xr, xi, wr, wi, steps):
    """Grouped block-diagonal complex matmul over all frequency groups.

    xr/xi : (G, B, lane)    real / imag packed spectral coefficients
    wr/wi : (G, lane, lane) block-diagonal grouped weights (built once)
    returns (G, B, lane) real / imag.
    """
    g_pad, b, lane = xr.shape
    gt = g_pad // steps

    x_spec = pl.BlockSpec((gt, b, lane), lambda i: (i, 0, 0))
    w_spec = pl.BlockSpec((gt, lane, lane), lambda i: (i, 0, 0))
    osh = jax.ShapeDtypeStruct((g_pad, b, lane), jnp.float32)

    cost = pl.CostEstimate(
        flops=int(8 * g_pad * b * lane * lane),
        transcendentals=0,
        bytes_accessed=int((4 * g_pad * b * lane + 2 * g_pad * lane * lane) * 4))

    out_r, out_i = pl.pallas_call(
        _spectral_kernel,
        grid=(steps,),
        in_specs=[x_spec, x_spec, w_spec, w_spec],
        out_specs=[x_spec, x_spec],
        out_shape=[osh, osh],
        compiler_params=_PAR1,
        cost_estimate=cost,
    )(xr, xi, wr, wi)
    return out_r, out_i


# ----------------------------------------------------------------------------
# Model pieces (glue in plain JAX, hot path in Pallas)
# ----------------------------------------------------------------------------
def _prep_spectral_weights(params, width, modes1, modes2, steps):
    """Re-lay-out spectral weights ONCE into grouped block-diagonal form.

    (Cin, Cout, m1, m2) x2 -> (G_pad, lane, lane) with `bpg` bins per group
    (bpg = 128 // width), padded so G_pad is a multiple of `steps`.
    """
    bpg = _lane_copies(width)
    lane = bpg * width

    def lay(w):                                     # -> (m1*m2, Cin, Cout)
        cin, cout, m1, m2 = w.shape
        return jnp.transpose(w, (2, 3, 0, 1)).reshape(m1 * m2, cin, cout)

    wr = jnp.concatenate([lay(params["spec_w1_r"]), lay(params["spec_w2_r"])], 0)
    wi = jnp.concatenate([lay(params["spec_w1_i"]), lay(params["spec_w2_i"])], 0)
    f = wr.shape[0]                                 # 2 * m1 * m2
    g = _cdiv(f, bpg)
    g_pad = _round_up(g, steps)
    f_pad = g_pad * bpg
    if f_pad != f:
        wr = jnp.pad(wr, ((0, f_pad - f), (0, 0), (0, 0)))
        wi = jnp.pad(wi, ((0, f_pad - f), (0, 0), (0, 0)))

    eye = jnp.eye(bpg, dtype=jnp.float32)

    def blockdiag(wb):                              # -> (G_pad, lane, lane)
        wb = wb.reshape(g_pad, bpg, width, width).astype(jnp.float32)
        bd = jnp.einsum("gjio,jk->gjiko", wb, eye)
        return bd.reshape(g_pad, lane, lane)

    return blockdiag(wr), blockdiag(wi), bpg, lane, g_pad, f_pad


def spectral_conv_apply(prod, wr_g, wi_g, modes1, modes2,
                        bpg, lane, g_pad, f_pad, steps):
    """SpectralConv2d_born on an already-formed product x * x_eps (channels-last)."""
    b, hp, wp, cin = prod.shape
    wf = wp // 2 + 1
    f = 2 * modes1 * modes2

    # TODO(synk): FFT stays in jnp — no Pallas rfft2/irfft2.
    x_ft = jnp.fft.rfft2(prod, axes=(1, 2))                   # (B, Hp, Wf, Cin) c64

    blk = jnp.concatenate([x_ft[:, :modes1, :modes2, :],
                           x_ft[:, hp - modes1:, :modes2, :]], axis=1)  # (B,2m1,m2,Cin)

    def to_groups(a):                               # (B,2m1,m2,Cin) -> (G_pad,B,lane)
        a = a.reshape(b, f * cin)
        if f_pad != f:
            a = jnp.pad(a, ((0, 0), (0, (f_pad - f) * cin)))
        return jnp.transpose(a.reshape(b, g_pad, lane), (1, 0, 2))

    xr = to_groups(jnp.real(blk).astype(jnp.float32))
    xi = to_groups(jnp.imag(blk).astype(jnp.float32))

    o_r, o_i = pallas_spectral(xr, xi, wr_g, wi_g, steps)      # (G_pad, B, lane)

    o = jax.lax.complex(o_r, o_i)
    o = jnp.transpose(o, (1, 0, 2)).reshape(b, f_pad, cin)[:, :f, :]
    o = o.reshape(b, 2 * modes1, modes2, cin)                  # (B,2m1,m2,Cout)
    out1, out2 = o[:, :modes1], o[:, modes1:]

    colpad = ((0, 0), (0, 0), (0, wf - modes2), (0, 0))
    top = jnp.pad(out1, colpad)                                # (B, m1, Wf, Cout)
    bot = jnp.pad(out2, colpad)
    if hp >= 2 * modes1:
        mid = jnp.zeros((b, hp - 2 * modes1, wf, cin), jnp.complex64)
        out_ft = jnp.concatenate([top, mid, bot], axis=1)
    else:  # overlapping mode blocks (not the case here) — fall back to scatter
        out_ft = jnp.zeros((b, hp, wf, cin), jnp.complex64)
        out_ft = out_ft.at[:, :modes1, :modes2, :].set(out1)
        out_ft = out_ft.at[:, hp - modes1:, :modes2, :].set(out2)

    return jnp.fft.irfft2(out_ft, s=(hp, wp), axes=(1, 2)).astype(jnp.float32)


def fno2d_forward(x, params, *, modes1, modes2, layernum, padding=9):
    """x: (B, Sx, Sy, 3) float32; returns (B, Sx, Sy, 2)."""
    b, sx, sy, _ = x.shape
    width = params["fc_inc_w"].shape[1]

    gridx = jnp.broadcast_to(
        jnp.linspace(0.0, 1.0, sx, dtype=jnp.float32).reshape(1, sx, 1, 1),
        (b, sx, sy, 1))
    gridy = jnp.broadcast_to(
        jnp.linspace(0.0, 1.0, sy, dtype=jnp.float32).reshape(1, 1, sy, 1),
        (b, sx, sy, 1))
    grid = jnp.concatenate([gridx, gridy], axis=-1)

    x_in4 = jnp.concatenate([x[..., 1:], grid], axis=-1)       # (B,Sx,Sy,4)
    x_eps3 = jnp.concatenate([x[..., :1], grid], axis=-1)      # (B,Sx,Sy,3)

    # fc_inc, fc_eps and the first x*x_eps product (fused)
    x_in, x_eps, prod = pallas_lift(x_in4, x_eps3, params)

    # F.pad(NCHW, [0, p, 0, p]) == pad H and W on the bottom/right by p.
    pad4 = ((0, 0), (0, padding), (0, padding), (0, 0))
    x_in = jnp.pad(x_in, pad4)
    x_eps = jnp.pad(x_eps, pad4)
    prod_sp = jnp.pad(prod, pad4)    # pad(x_in)*pad(x_eps) == pad(x_in*x_eps)

    hp, wp = sx + padding, sy + padding
    n_full = b * hp * wp

    # lane-dense pixel packing: `copies` pixels x `width` channels = 128 lanes
    copies = _lane_copies(width)
    lane = copies * width
    tile, np_pad, steps = _row_tiling(_cdiv(n_full, copies), min_steps=_MIN_STEPS)
    n_pix = np_pad * copies

    def pack(a):                     # (B,Hp,Wp,width) -> (np_pad, lane)
        flat = a.reshape(n_full, width)
        if n_pix != n_full:
            flat = jnp.pad(flat, ((0, n_pix - n_full), (0, 0)))
        return flat.reshape(np_pad, lane)

    def unpack(ap):                  # (np_pad, lane) -> (B,Hp,Wp,width)
        return ap.reshape(n_pix, width)[:n_full].reshape(b, hp, wp, width)

    # constants of the layer loop, laid out once
    inc_p = pack(x_in)
    eps_p = pack(x_eps)
    w0_bd = _blockdiag_channel(params["w0_w"], copies)
    w1_bd = _blockdiag_channel(params["w1_w"], copies)
    b0_t = jnp.tile(params["w0_b"].astype(jnp.float32), copies).reshape(1, lane)
    b1_t = jnp.tile(params["w1_b"].astype(jnp.float32), copies).reshape(1, lane)

    spec_steps = _MIN_STEPS
    wr_g, wi_g, bpg, lane_f, g_pad, f_pad = _prep_spectral_weights(
        params, width, modes1, modes2, spec_steps)

    xc_p = inc_p
    for _ in range(layernum):
        xs_sp = spectral_conv_apply(prod_sp, wr_g, wi_g, modes1, modes2,
                                    bpg, lane_f, g_pad, f_pad, spec_steps)
        xs_p = pack(xs_sp)
        xc_p, prod_p = pallas_layer(xs_p, inc_p, eps_p,
                                    w0_bd, b0_t, w1_bd, b1_t,
                                    tile, np_pad, steps, lane)
        prod_sp = unpack(prod_p)

    xc = unpack(xc_p)[:, :sx, :sy, :]     # crop (safe even if padding == 0)
    return pallas_head(xc, params)        # fused fc1 + fc2


# ----------------------------------------------------------------------------
# Deterministic parameter construction
# ----------------------------------------------------------------------------
def init_params(key, modes1, modes2, width):
    ks = jax.random.split(key, 16)
    scale = 1.0 / (width * width)

    def lin(kw, kb, cin, cout):
        bound = 1.0 / np.sqrt(cin)
        w = jax.random.uniform(kw, (cin, cout), jnp.float32, -bound, bound)
        b = jax.random.uniform(kb, (cout,), jnp.float32, -bound, bound)
        return w, b

    p = {}
    p["fc_inc_w"], p["fc_inc_b"] = lin(ks[0], ks[1], 4, width)
    p["fc_eps_w"], p["fc_eps_b"] = lin(ks[2], ks[3], 3, width)
    p["w0_w"], p["w0_b"] = lin(ks[4], ks[5], width, width)
    p["w1_w"], p["w1_b"] = lin(ks[6], ks[7], width, width)
    p["fc1_w"], p["fc1_b"] = lin(ks[8], ks[9], width, 256)
    p["fc2_w"], p["fc2_b"] = lin(ks[10], ks[11], 256, 2)
    # complex spectral weights stored as separate real / imag parts
    p["spec_w1_r"] = scale * jax.random.uniform(ks[12], (width, width, modes1, modes2), jnp.float32)
    p["spec_w1_i"] = scale * jax.random.uniform(ks[13], (width, width, modes1, modes2), jnp.float32)
    p["spec_w2_r"] = scale * jax.random.uniform(ks[14], (width, width, modes1, modes2), jnp.float32)
    p["spec_w2_i"] = scale * jax.random.uniform(ks[15], (width, width, modes1, modes2), jnp.float32)
    return p


# ----------------------------------------------------------------------------
if __name__ == "__main__":
    MODES1, MODES2 = 6, 6
    WIDTH = 16
    LAYERNUM = 4
    B, SX, SY = 2, 16, 16

    key = jax.random.PRNGKey(0)
    kx, kp = jax.random.split(key)
    x = jax.random.normal(kx, (B, SX, SY, 3), dtype=jnp.float32)
    params = init_params(kp, MODES1, MODES2, WIDTH)

    fwd = jax.jit(functools.partial(
        fno2d_forward, modes1=MODES1, modes2=MODES2, layernum=LAYERNUM))

    out = fwd(x, params)
    out = jax.block_until_ready(out)
    assert out.shape == (B, SX, SY, 2), out.shape
    assert jnp.isfinite(out).all()
    print("KERNEL_OK")
</pallas_src>

<mosaic_0001>
module attributes {stable_mosaic.version = 11 : i64} {
  func.func @_lift_kernel(%arg0: i32, %arg1: memref<256x4xf32, #tpu.memory_space<vmem>>, %arg2: memref<256x3xf32, #tpu.memory_space<vmem>>, %arg3: memref<4x16xf32, #tpu.memory_space<vmem>>, %arg4: memref<1x16xf32, #tpu.memory_space<vmem>>, %arg5: memref<3x16xf32, #tpu.memory_space<vmem>>, %arg6: memref<1x16xf32, #tpu.memory_space<vmem>>, %arg7: memref<256x16xf32, #tpu.memory_space<vmem>>, %arg8: memref<256x16xf32, #tpu.memory_space<vmem>>, %arg9: memref<256x16xf32, #tpu.memory_space<vmem>>) attributes {dimension_semantics = [#tpu.dimension_semantics<parallel>], iteration_bounds = array<i64: 2>, scalar_prefetch = 0 : i64, scratch_operands = 0 : i64, tpu.core_type = #tpu.core_type<tc>, window_params = [{transform_indices = @transform_0, window_bounds = array<i64: 256, 4>}, {transform_indices = @transform_1, window_bounds = array<i64: 256, 3>}, {pipeline_mode = #tpu.pipeline_mode<synchronous>, transform_indices = @transform_2, window_bounds = array<i64: 4, 16>}, {pipeline_mode = #tpu.pipeline_mode<synchronous>, transform_indices = @transform_3, window_bounds = array<i64: 1, 16>}, {pipeline_mode = #tpu.pipeline_mode<synchronous>, transform_indices = @transform_4, window_bounds = array<i64: 3, 16>}, {pipeline_mode = #tpu.pipeline_mode<synchronous>, transform_indices = @transform_5, window_bounds = array<i64: 1, 16>}, {transform_indices = @transform_6, window_bounds = array<i64: 256, 16>}, {transform_indices = @transform_7, window_bounds = array<i64: 256, 16>}, {transform_indices = @transform_8, window_bounds = array<i64: 256, 16>}]} {
    %c0 = arith.constant 0 : index
    %c0_0 = arith.constant 0 : index
    %0 = vector.load %arg1[%c0, %c0_0] : memref<256x4xf32, #tpu.memory_space<vmem>>, vector<256x4xf32>
    %c0_1 = arith.constant 0 : index
    %c0_2 = arith.constant 0 : index
    %1 = vector.load %arg3[%c0_1, %c0_2] : memref<4x16xf32, #tpu.memory_space<vmem>>, vector<4x16xf32>
    %cst = arith.constant dense<0.000000e+00> : vector<256x16xf32>
    %2 = tpu.matmul %0, %1, %cst {dimension_numbers = #tpu.dot_dimension_numbers<[1], [0], [0], [1], [0, 0, 1, 1], [], []>} : vector<256x4xf32>, vector<4x16xf32>, vector<256x16xf32> -> vector<256x16xf32>
    %c0_3 = arith.constant 0 : index
    %c0_4 = arith.constant 0 : index
    %3 = vector.load %arg4[%c0_3, %c0_4] : memref<1x16xf32, #tpu.memory_space<vmem>>, vector<1x16xf32>
    %4 = vector.broadcast %3 : vector<1x16xf32> to vector<256x16xf32>
    %5 = arith.addf %2, %4 : vector<256x16xf32>
    %c0_5 = arith.constant 0 : index
    %c0_6 = arith.constant 0 : index
    %6 = vector.load %arg2[%c0_5, %c0_6] : memref<256x3xf32, #tpu.memory_space<vmem>>, vector<256x3xf32>
    %c0_7 = arith.constant 0 : index
    %c0_8 = arith.constant 0 : index
    %7 = vector.load %arg5[%c0_7, %c0_8] : memref<3x16xf32, #tpu.memory_space<vmem>>, vector<3x16xf32>
    %cst_9 = arith.constant dense<0.000000e+00> : vector<256x16xf32>
    %8 = tpu.matmul %6, %7, %cst_9 {dimension_numbers = #tpu.dot_dimension_numbers<[1], [0], [0], [1], [0, 0, 1, 1], [], []>} : vector<256x3xf32>, vector<3x16xf32>, vector<256x16xf32> -> vector<256x16xf32>
    %c0_10 = arith.constant 0 : index
    %c0_11 = arith.constant 0 : index
    %9 = vector.load %arg6[%c0_10, %c0_11] : memref<1x16xf32, #tpu.memory_space<vmem>>, vector<1x16xf32>
    %10 = vector.broadcast %9 : vector<1x16xf32> to vector<256x16xf32>
    %11 = arith.addf %8, %10 : vector<256x16xf32>
    %c0_12 = arith.constant 0 : index
    %c0_13 = arith.constant 0 : index
    %12 = vector.load %arg7[%c0_12, %c0_13] : memref<256x16xf32, #tpu.memory_space<vmem>>, vector<256x16xf32>
    tpu.vector_store %arg7[%c0_12, %c0_13], %5 {strides = array<i32>} : memref<256x16xf32, #tpu.memory_space<vmem>>, vector<256x16xf32>,
    %c0_14 = arith.constant 0 : index
    %c0_15 = arith.constant 0 : index
    %13 = vector.load %arg8[%c0_14, %c0_15] : memref<256x16xf32, #tpu.memory_space<vmem>>, vector<256x16xf32>
    tpu.vector_store %arg8[%c0_14, %c0_15], %11 {strides = array<i32>} : memref<256x16xf32, #tpu.memory_space<vmem>>, vector<256x16xf32>,
    %14 = arith.mulf %5, %11 : vector<256x16xf32>
    %c0_16 = arith.constant 0 : index
    %c0_17 = arith.constant 0 : index
    %15 = vector.load %arg9[%c0_16, %c0_17] : memref<256x16xf32, #tpu.memory_space<vmem>>, vector<256x16xf32>
    tpu.vector_store %arg9[%c0_16, %c0_17], %14 {strides = array<i32>} : memref<256x16xf32, #tpu.memory_space<vmem>>, vector<256x16xf32>,
    return
  }
  func.func @transform_0(%arg0: i32) -> (i32, i32) {
    %c0_i32 = arith.constant 0 : i32
    %c0_i32_0 = arith.constant 0 : i32
    return %arg0, %c0_i32 : i32, i32
  }
  func.func @transform_1(%arg0: i32) -> (i32, i32) {
    %c0_i32 = arith.constant 0 : i32
    %c0_i32_0 = arith.constant 0 : i32
    return %arg0, %c0_i32 : i32, i32
  }
  func.func @transform_2(%arg0: i32) -> (i32, i32) {
    %c0_i32 = arith.constant 0 : i32
    %c0_i32_0 = arith.constant 0 : i32
    %c0_i32_1 = arith.constant 0 : i32
    return %c0_i32, %c0_i32_0 : i32, i32
  }
  func.func @transform_3(%arg0: i32) -> (i32, i32) {
    %c0_i32 = arith.constant 0 : i32
    %c0_i32_0 = arith.constant 0 : i32
    %c0_i32_1 = arith.constant 0 : i32
    return %c0_i32, %c0_i32_0 : i32, i32
  }
  func.func @transform_4(%arg0: i32) -> (i32, i32) {
    %c0_i32 = arith.constant 0 : i32
    %c0_i32_0 = arith.constant 0 : i32
    %c0_i32_1 = arith.constant 0 : i32
    return %c0_i32, %c0_i32_0 : i32, i32
  }
  func.func @transform_5(%arg0: i32) -> (i32, i32) {
    %c0_i32 = arith.constant 0 : i32
    %c0_i32_0 = arith.constant 0 : i32
    %c0_i32_1 = arith.constant 0 : i32
    return %c0_i32, %c0_i32_0 : i32, i32
  }
  func.func @transform_6(%arg0: i32) -> (i32, i32) {
    %c0_i32 = arith.constant 0 : i32
    %c0_i32_0 = arith.constant 0 : i32
    return %arg0, %c0_i32 : i32, i32
  }
  func.func @transform_7(%arg0: i32) -> (i32, i32) {
    %c0_i32 = arith.constant 0 : i32
    %c0_i32_0 = arith.constant 0 : i32
    return %arg0, %c0_i32 : i32, i32
  }
  func.func @transform_8(%arg0: i32) -> (i32, i32) {
    %c0_i32 = arith.constant 0 : i32
    %c0_i32_0 = arith.constant 0 : i32
    return %arg0, %c0_i32 : i32, i32
  }
}

module attributes {stable_mosaic.version = 11 : i64} {
  func.func @_spectral_kernel(%arg0: i32, %arg1: memref<5x2x128xf32, #tpu.memory_space<vmem>>, %arg2: memref<5x2x128xf32, #tpu.memory_space<vmem>>, %arg3: memref<5x128x128xf32, #tpu.memory_space<vmem>>, %arg4: memref<5x128x128xf32, #tpu.memory_space<vmem>>, %arg5: memref<5x2x128xf32, #tpu.memory_space<vmem>>, %arg6: memref<5x2x128xf32, #tpu.memory_space<vmem>>) attributes {dimension_semantics = [#tpu.dimension_semantics<parallel>], iteration_bounds = array<i64: 2>, scalar_prefetch = 0 : i64, scratch_operands = 0 : i64, tpu.core_type = #tpu.core_type<tc>, window_params = [{transform_indices = @transform_0, window_bounds = array<i64: 5, 2, 128>}, {transform_indices = @transform_1, window_bounds = array<i64: 5, 2, 128>}, {transform_indices = @transform_2, window_bounds = array<i64: 5, 128, 128>}, {transform_indices = @transform_3, window_bounds = array<i64: 5, 128, 128>}, {transform_indices = @transform_4, window_bounds = array<i64: 5, 2, 128>}, {transform_indices = @transform_5, window_bounds = array<i64: 5, 2, 128>}]} {
    %c0 = arith.constant 0 : index
    %c0_0 = arith.constant 0 : index
    %c0_1 = arith.constant 0 : index
    %0 = vector.load %arg1[%c0, %c0_0, %c0_1] : memref<5x2x128xf32, #tpu.memory_space<vmem>>, vector<1x2x128xf32>
    %1 = vector.shape_cast %0 : vector<1x2x128xf32> to vector<2x128xf32>
    %c0_2 = arith.constant 0 : index
    %c0_3 = arith.constant 0 : index
    %c0_4 = arith.constant 0 : index
    %2 = vector.load %arg2[%c0_2, %c0_3, %c0_4] : memref<5x2x128xf32, #tpu.memory_space<vmem>>, vector<1x2x128xf32>
    %3 = vector.shape_cast %2 : vector<1x2x128xf32> to vector<2x128xf32>
    %c0_5 = arith.constant 0 : index
    %c0_6 = arith.constant 0 : index
    %c0_7 = arith.constant 0 : index
    %4 = vector.load %arg3[%c0_5, %c0_6, %c0_7] : memref<5x128x128xf32, #tpu.memory_space<vmem>>, vector<1x128x128xf32>
    %5 = vector.shape_cast %4 : vector<1x128x128xf32> to vector<128x128xf32>
    %c0_8 = arith.constant 0 : index
    %c0_9 = arith.constant 0 : index
    %c0_10 = arith.constant 0 : index
    %6 = vector.load %arg4[%c0_8, %c0_9, %c0_10] : memref<5x128x128xf32, #tpu.memory_space<vmem>>, vector<1x128x128xf32>
    %7 = vector.shape_cast %6 : vector<1x128x128xf32> to vector<128x128xf32>
    %cst = arith.constant dense<0.000000e+00> : vector<2x128xf32>
    %8 = tpu.matmul %1, %5, %cst {dimension_numbers = #tpu.dot_dimension_numbers<[1], [0], [0], [1], [0, 0, 1, 1], [], []>} : vector<2x128xf32>, vector<128x128xf32>, vector<2x128xf32> -> vector<2x128xf32>
    %cst_11 = arith.constant dense<0.000000e+00> : vector<2x128xf32>
    %9 = tpu.matmul %3, %7, %cst_11 {dimension_numbers = #tpu.dot_dimension_numbers<[1], [0], [0], [1], [0, 0, 1, 1], [], []>} : vector<2x128xf32>, vector<128x128xf32>, vector<2x128xf32> -> vector<2x128xf32>
    %cst_12 = arith.constant dense<0.000000e+00> : vector<2x128xf32>
    %10 = tpu.matmul %1, %7, %cst_12 {dimension_numbers = #tpu.dot_dimension_numbers<[1], [0], [0], [1], [0, 0, 1, 1], [], []>} : vector<2x128xf32>, vector<128x128xf32>, vector<2x128xf32> -> vector<2x128xf32>
    %cst_13 = arith.constant dense<0.000000e+00> : vector<2x128xf32>
    %11 = tpu.matmul %3, %5, %cst_13 {dimension_numbers = #tpu.dot_dimension_numbers<[1], [0], [0], [1], [0, 0, 1, 1], [], []>} : vector<2x128xf32>, vector<128x128xf32>, vector<2x128xf32> -> vector<2x128xf32>
    %12 = arith.subf %8, %9 : vector<2x128xf32>
    %c0_14 = arith.constant 0 : index
    %c0_15 = arith.constant 0 : index
    %c0_16 = arith.constant 0 : index
    %13 = vector.load %arg5[%c0_14, %c0_15, %c0_16] : memref<5x2x128xf32, #tpu.memory_space<vmem>>, vector<1x2x128xf32>
    %14 = vector.shape_cast %13 : vector<1x2x128xf32> to vector<2x128xf32>
    %15 = vector.shape_cast %12 : vector<2x128xf32> to vector<1x2x128xf32>
    tpu.vector_store %arg5[%c0_14, %c0_15, %c0_16], %15 {strides = array<i32>} : memref<5x2x128xf32, #tpu.memory_space<vmem>>, vector<1x2x128xf32>,
    %16 = arith.addf %10, %11 : vector<2x128xf32>
    %c0_17 = arith.constant 0 : index
    %c0_18 = arith.constant 0 : index
    %c0_19 = arith.constant 0 : index
    %17 = vector.load %arg6[%c0_17, %c0_18, %c0_19] : memref<5x2x128xf32, #tpu.memory_space<vmem>>, vector<1x2x128xf32>
    %18 = vector.shape_cast %17 : vector<1x2x128xf32> to vector<2x128xf32>
    %19 = vector.shape_cast %16 : vector<2x128xf32> to vector<1x2x128xf32>
    tpu.vector_store %arg6[%c0_17, %c0_18, %c0_19], %19 {strides = array<i32>} : memref<5x2x128xf32, #tpu.memory_space<vmem>>, vector<1x2x128xf32>,
    %c1 = arith.constant 1 : index
    %c0_20 = arith.constant 0 : index
    %c0_21 = arith.constant 0 : index
    %20 = vector.load %arg1[%c1, %c0_20, %c0_21] : memref<5x2x128xf32, #tpu.memory_space<vmem>>, vector<1x2x128xf32>
    %21 = vector.shape_cast %20 : vector<1x2x128xf32> to vector<2x128xf32>
    %c1_22 = arith.constant 1 : index
    %c0_23 = arith.constant 0 : index
    %c0_24 = arith.constant 0 : index
    %22 = vector.load %arg2[%c1_22, %c0_23, %c0_24] : memref<5x2x128xf32, #tpu.memory_space<vmem>>, vector<1x2x128xf32>
    %23 = vector.shape_cast %22 : vector<1x2x128xf32> to vector<2x128xf32>
    %c1_25 = arith.constant 1 : index
    %c0_26 = arith.constant 0 : index
    %c0_27 = arith.constant 0 : index
    %24 = vector.load %arg3[%c1_25, %c0_26, %c0_27] : memref<5x128x128xf32, #tpu.memory_space<vmem>>, vector<1x128x128xf32>
    %25 = vector.shape_cast %24 : vector<1x128x128xf32> to vector<128x128xf32>
    %c1_28 = arith.constant 1 : index
    %c0_29 = arith.constant 0 : index
    %c0_30 = arith.constant 0 : index
    %26 = vector.load %arg4[%c1_28, %c0_29, %c0_30] : memref<5x128x128xf32, #tpu.memory_space<vmem>>, vector<1x128x128xf32>
    %27 = vector.shape_cast %26 : vector<1x128x128xf32> to vector<128x128xf32>
    %cst_31 = arith.constant dense<0.000000e+00> : vector<2x128xf32>
    %28 = tpu.matmul %21, %25, %cst_31 {dimension_numbers = #tpu.dot_dimension_numbers<[1], [0], [0], [1], [0, 0, 1, 1], [], []>} : vector<2x128xf32>, vector<128x128xf32>, vector<2x128xf32> -> vector<2x128xf32>
    %cst_32 = arith.constant dense<0.000000e+00> : vector<2x128xf32>
    %29 = tpu.matmul %23, %27, %cst_32 {dimension_numbers = #tpu.dot_dimension_numbers<[1], [0], [0], [1], [0, 0, 1, 1], [], []>} : vector<2x128xf32>, vector<128x128xf32>, vector<2x128xf32> -> vector<2x128xf32>
    %cst_33 = arith.constant dense<0.000000e+00> : vector<2x128xf32>
    %30 = tpu.matmul %21, %27, %cst_33 {dimension_numbers = #tpu.dot_dimension_numbers<[1], [0], [0], [1], [0, 0, 1, 1], [], []>} : vector<2x128xf32>, vector<128x128xf32>, vector<2x128xf32> -> vector<2x128xf32>
    %cst_34 = arith.constant dense<0.000000e+00> : vector<2x128xf32>
    %31 = tpu.matmul %23, %25, %cst_34 {dimension_numbers = #tpu.dot_dimension_numbers<[1], [0], [0], [1], [0, 0, 1, 1], [], []>} : vector<2x128xf32>, vector<128x128xf32>, vector<2x128xf32> -> vector<2x128xf32>
    %32 = arith.subf %28, %29 : vector<2x128xf32>
    %c1_35 = arith.constant 1 : index
    %c0_36 = arith.constant 0 : index
    %c0_37 = arith.constant 0 : index
    %33 = vector.load %arg5[%c1_35, %c0_36, %c0_37] : memref<5x2x128xf32, #tpu.memory_space<vmem>>, vector<1x2x128xf32>
    %34 = vector.shape_cast %33 : vector<1x2x128xf32> to vector<2x128xf32>
    %35 = vector.shape_cast %32 : vector<2x128xf32> to vector<1x2x128xf32>
    tpu.vector_store %arg5[%c1_35, %c0_36, %c0_37], %35 {strides = array<i32>} : memref<5x2x128xf32, #tpu.memory_space<vmem>>, vector<1x2x128xf32>,
    %36 = arith.addf %30, %31 : vector<2x128xf32>
    %c1_38 = arith.constant 1 : index
    %c0_39 = arith.constant 0 : index
    %c0_40 = arith.constant 0 : index
    %37 = vector.load %arg6[%c1_38, %c0_39, %c0_40] : memref<5x2x128xf32, #tpu.memory_space<vmem>>, vector<1x2x128xf32>
    %38 = vector.shape_cast %37 : vector<1x2x128xf32> to vector<2x128xf32>
    %39 = vector.shape_cast %36 : vector<2x128xf32> to vector<1x2x128xf32>
    tpu.vector_store %arg6[%c1_38, %c0_39, %c0_40], %39 {strides = array<i32>} : memref<5x2x128xf32, #tpu.memory_space<vmem>>, vector<1x2x128xf32>,
    %c2 = arith.constant 2 : index
    %c0_41 = arith.constant 0 : index
    %c0_42 = arith.constant 0 : index
    %40 = vector.load %arg1[%c2, %c0_41, %c0_42] : memref<5x2x128xf32, #tpu.memory_space<vmem>>, vector<1x2x128xf32>
    %41 = vector.shape_cast %40 : vector<1x2x128xf32> to vector<2x128xf32>
    %c2_43 = arith.constant 2 : index
    %c0_44 = arith.constant 0 : index
    %c0_45 = arith.constant 0 : index
    %42 = vector.load %arg2[%c2_43, %c0_44, %c0_45] : memref<5x2x128xf32, #tpu.memory_space<vmem>>, vector<1x2x128xf32>
    %43 = vector.shape_cast %42 : vector<1x2x128xf32> to vector<2x128xf32>
    %c2_46 = arith.constant 2 : index
    %c0_47 = arith.constant 0 : index
    %c0_48 = arith.constant 0 : index
    %44 = vector.load %arg3[%c2_46, %c0_47, %c0_48] : memref<5x128x128xf32, #tpu.memory_space<vmem>>, vector<1x128x128xf32>
    %45 = vector.shape_cast %44 : vector<1x128x128xf32> to vector<128x128xf32>
    %c2_49 = arith.constant 2 : index
    %c0_50 = arith.constant 0 : index
    %c0_51 = arith.constant 0 : index
    %46 = vector.load %arg4[%c2_49, %c0_50, %c0_51] : memref<5x128x128xf32, #tpu.memory_space<vmem>>, vector<1x128x128xf32>
    %47 = vector.shape_cast %46 : vector<1x128x128xf32> to vector<128x128xf32>
    %cst_52 = arith.constant dense<0.000000e+00> : vector<2x128xf32>
    %48 = tpu.matmul %41, %45, %cst_52 {dimension_numbers = #tpu.dot_dimension_numbers<[1], [0], [0], [1], [0, 0, 1, 1], [], []>} : vector<2x128xf32>, vector<128x128xf32>, vector<2x128xf32> -> vector<2x128xf32>
    %cst_53 = arith.constant dense<0.000000e+00> : vector<2x128xf32>
    %49 = tpu.matmul %43, %47, %cst_53 {dimension_numbers = #tpu.dot_dimension_numbers<[1], [0], [0], [1], [0, 0, 1, 1], [], []>} : vector<2x128xf32>, vector<128x128xf32>, vector<2x128xf32> -> vector<2x128xf32>
    %cst_54 = arith.constant dense<0.000000e+00> : vector<2x128xf32>
    %50 = tpu.matmul %41, %47, %cst_54 {dimension_numbers = #tpu.dot_dimension_numbers<[1], [0], [0], [1], [0, 0, 1, 1], [], []>} : vector<2x128xf32>, vector<128x128xf32>, vector<2x128xf32> -> vector<2x128xf32>
    %cst_55 = arith.constant dense<0.000000e+00> : vector<2x128xf32>
    %51 = tpu.matmul %43, %45, %cst_55 {dimension_numbers = #tpu.dot_dimension_numbers<[1], [0], [0], [1], [0, 0, 1, 1], [], []>} : vector<2x128xf32>, vector<128x128xf32>, vector<2x128xf32> -> vector<2x128xf32>
    %52 = arith.subf %48, %49 : vector<2x128xf32>
    %c2_56 = arith.constant 2 : index
    %c0_57 = arith.constant 0 : index
    %c0_58 = arith.constant 0 : index
    %53 = vector.load %arg5[%c2_56, %c0_57, %c0_58] : memref<5x2x128xf32, #tpu.memory_space<vmem>>, vector<1x2x128xf32>
    %54 = vector.shape_cast %53 : vector<1x2x128xf32> to vector<2x128xf32>
    %55 = vector.shape_cast %52 : vector<2x128xf32> to vector<1x2x128xf32>
    tpu.vector_store %arg5[%c2_56, %c0_57, %c0_58], %55 {strides = array<i32>} : memref<5x2x128xf32, #tpu.memory_space<vmem>>, vector<1x2x128xf32>,
    %56 = arith.addf %50, %51 : vector<2x128xf32>
    %c2_59 = arith.constant 2 : index
    %c0_60 = arith.constant 0 : index
    %c0_61 = arith.constant 0 : index
    %57 = vector.load %arg6[%c2_59, %c0_60, %c0_61] : memref<5x2x128xf32, #tpu.memory_space<vmem>>, vector<1x2x128xf32>
    %58 = vector.shape_cast %57 : vector<1x2x128xf32> to vector<2x128xf32>
    %59 = vector.shape_cast %56 : vector<2x128xf32> to vector<1x2x128xf32>
    tpu.vector_store %arg6[%c2_59, %c0_60, %c0_61], %59 {strides = array<i32>} : memref<5x2x128xf32, #tpu.memory_space<vmem>>, vector<1x2x128xf32>,
    %c3 = arith.constant 3 : index
    %c0_62 = arith.constant 0 : index
    %c0_63 = arith.constant 0 : index
    %60 = vector.load %arg1[%c3, %c0_62, %c0_63] : memref<5x2x128xf32, #tpu.memory_space<vmem>>, vector<1x2x128xf32>
    %61 = vector.shape_cast %60 : vector<1x2x128xf32> to vector<2x128xf32>
    %c3_64 = arith.constant 3 : index
    %c0_65 = arith.constant 0 : index
    %c0_66 = arith.constant 0 : index
    %62 = vector.load %arg2[%c3_64, %c0_65, %c0_66] : memref<5x2x128xf32, #tpu.memory_space<vmem>>, vector<1x2x128xf32>
    %63 = vector.shape_cast %62 : vector<1x2x128xf32> to vector<2x128xf32>
    %c3_67 = arith.constant 3 : index
    %c0_68 = arith.constant 0 : index
    %c0_69 = arith.constant 0 : index
    %64 = vector.load %arg3[%c3_67, %c0_68, %c0_69] : memref<5x128x128xf32, #tpu.memory_space<vmem>>, vector<1x128x128xf32>
    %65 = vector.shape_cast %64 : vector<1x128x128xf32> to vector<128x128xf32>
    %c3_70 = arith.constant 3 : index
    %c0_71 = arith.constant 0 : index
    %c0_72 = arith.constant 0 : index
    %66 = vector.load %arg4[%c3_70, %c0_71, %c0_72] : memref<5x128x128xf32, #tpu.memory_space<vmem>>, vector<1x128x128xf32>
    %67 = vector.shape_cast %66 : vector<1x128x128xf32> to vector<128x128xf32>
    %cst_73 = arith.constant dense<0.000000e+00> : vector<2x128xf32>
    %68 = tpu.matmul %61, %65, %cst_73 {dimension_numbers = #tpu.dot_dimension_numbers<[1], [0], [0], [1], [0, 0, 1, 1], [], []>} : vector<2x128xf32>, vector<128x128xf32>, vector<2x128xf32> -> vector<2x128xf32>
    %cst_74 = arith.constant dense<0.000000e+00> : vector<2x128xf32>
    %69 = tpu.matmul %63, %67, %cst_74 {dimension_numbers = #tpu.dot_dimension_numbers<[1], [0], [0], [1], [0, 0, 1, 1], [], []>} : vector<2x128xf32>, vector<128x128xf32>, vector<2x128xf32> -> vector<2x128xf32>
    %cst_75 = arith.constant dense<0.000000e+00> : vector<2x128xf32>
    %70 = tpu.matmul %61, %67, %cst_75 {dimension_numbers = #tpu.dot_dimension_numbers<[1], [0], [0], [1], [0, 0, 1, 1], [], []>} : vector<2x128xf32>, vector<128x128xf32>, vector<2x128xf32> -> vector<2x128xf32>
    %cst_76 = arith.constant dense<0.000000e+00> : vector<2x128xf32>
    %71 = tpu.matmul %63, %65, %cst_76 {dimension_numbers = #tpu.dot_dimension_numbers<[1], [0], [0], [1], [0, 0, 1, 1], [], []>} : vector<2x128xf32>, vector<128x128xf32>, vector<2x128xf32> -> vector<2x128xf32>
    %72 = arith.subf %68, %69 : vector<2x128xf32>
    %c3_77 = arith.constant 3 : index
    %c0_78 = arith.constant 0 : index
    %c0_79 = arith.constant 0 : index
    %73 = vector.load %arg5[%c3_77, %c0_78, %c0_79] : memref<5x2x128xf32, #tpu.memory_space<vmem>>, vector<1x2x128xf32>
    %74 = vector.shape_cast %73 : vector<1x2x128xf32> to vector<2x128xf32>
    %75 = vector.shape_cast %72 : vector<2x128xf32> to vector<1x2x128xf32>
    tpu.vector_store %arg5[%c3_77, %c0_78, %c0_79], %75 {strides = array<i32>} : memref<5x2x128xf32, #tpu.memory_space<vmem>>, vector<1x2x128xf32>,
    %76 = arith.addf %70, %71 : vector<2x128xf32>
    %c3_80 = arith.constant 3 : index
    %c0_81 = arith.constant 0 : index
    %c0_82 = arith.constant 0 : index
    %77 = vector.load %arg6[%c3_80, %c0_81, %c0_82] : memref<5x2x128xf32, #tpu.memory_space<vmem>>, vector<1x2x128xf32>
    %78 = vector.shape_cast %77 : vector<1x2x128xf32> to vector<2x128xf32>
    %79 = vector.shape_cast %76 : vector<2x128xf32> to vector<1x2x128xf32>
    tpu.vector_store %arg6[%c3_80, %c0_81, %c0_82], %79 {strides = array<i32>} : memref<5x2x128xf32, #tpu.memory_space<vmem>>, vector<1x2x128xf32>,
    %c4 = arith.constant 4 : index
    %c0_83 = arith.constant 0 : index
    %c0_84 = arith.constant 0 : index
    %80 = vector.load %arg1[%c4, %c0_83, %c0_84] : memref<5x2x128xf32, #tpu.memory_space<vmem>>, vector<1x2x128xf32>
    %81 = vector.shape_cast %80 : vector<1x2x128xf32> to vector<2x128xf32>
    %c4_85 = arith.constant 4 : index
    %c0_86 = arith.constant 0 : index
    %c0_87 = arith.constant 0 : index
    %82 = vector.load %arg2[%c4_85, %c0_86, %c0_87] : memref<5x2x128xf32, #tpu.memory_space<vmem>>, vector<1x2x128xf32>
    %83 = vector.shape_cast %82 : vector<1x2x128xf32> to vector<2x128xf32>
    %c4_88 = arith.constant 4 : index
    %c0_89 = arith.constant 0 : index
    %c0_90 = arith.constant 0 : index
    %84 = vector.load %arg3[%c4_88, %c0_89, %c0_90] : memref<5x128x128xf32, #tpu.memory_space<vmem>>, vector<1x128x128xf32>
    %85 = vector.shape_cast %84 : vector<1x128x128xf32> to vector<128x128xf32>
    %c4_91 = arith.constant 4 : index
    %c0_92 = arith.constant 0 : index
    %c0_93 = arith.constant 0 : index
    %86 = vector.load %arg4[%c4_91, %c0_92, %c0_93] : memref<5x128x128xf32, #tpu.memory_space<vmem>>, vector<1x128x128xf32>
    %87 = vector.shape_cast %86 : vector<1x128x128xf32> to vector<128x128xf32>
    %cst_94 = arith.constant dense<0.000000e+00> : vector<2x128xf32>
    %88 = tpu.matmul %81, %85, %cst_94 {dimension_numbers = #tpu.dot_dimension_numbers<[1], [0], [0], [1], [0, 0, 1, 1], [], []>} : vector<2x128xf32>, vector<128x128xf32>, vector<2x128xf32> -> vector<2x128xf32>
    %cst_95 = arith.constant dense<0.000000e+00> : vector<2x128xf32>
    %89 = tpu.matmul %83, %87, %cst_95 {dimension_numbers = #tpu.dot_dimension_numbers<[1], [0], [0], [1], [0, 0, 1, 1], [], []>} : vector<2x128xf32>, vector<128x128xf32>, vector<2x128xf32> -> vector<2x128xf32>
    %cst_96 = arith.constant dense<0.000000e+00> : vector<2x128xf32>
    %90 = tpu.matmul %81, %87, %cst_96 {dimension_numbers = #tpu.dot_dimension_numbers<[1], [0], [0], [1], [0, 0, 1, 1], [], []>} : vector<2x128xf32>, vector<128x128xf32>, vector<2x128xf32> -> vector<2x128xf32>
    %cst_97 = arith.constant dense<0.000000e+00> : vector<2x128xf32>
    %91 = tpu.matmul %83, %85, %cst_97 {dimension_numbers = #tpu.dot_dimension_numbers<[1], [0], [0], [1], [0, 0, 1, 1], [], []>} : vector<2x128xf32>, vector<128x128xf32>, vector<2x128xf32> -> vector<2x128xf32>
    %92 = arith.subf %88, %89 : vector<2x128xf32>
    %c4_98 = arith.constant 4 : index
    %c0_99 = arith.constant 0 : index
    %c0_100 = arith.constant 0 : index
    %93 = vector.load %arg5[%c4_98, %c0_99, %c0_100] : memref<5x2x128xf32, #tpu.memory_space<vmem>>, vector<1x2x128xf32>
    %94 = vector.shape_cast %93 : vector<1x2x128xf32> to vector<2x128xf32>
    %95 = vector.shape_cast %92 : vector<2x128xf32> to vector<1x2x128xf32>
    tpu.vector_store %arg5[%c4_98, %c0_99, %c0_100], %95 {strides = array<i32>} : memref<5x2x128xf32, #tpu.memory_space<vmem>>, vector<1x2x128xf32>,
    %96 = arith.addf %90, %91 : vector<2x128xf32>
    %c4_101 = arith.constant 4 : index
    %c0_102 = arith.constant 0 : index
    %c0_103 = arith.constant 0 : index
    %97 = vector.load %arg6[%c4_101, %c0_102, %c0_103] : memref<5x2x128xf32, #tpu.memory_space<vmem>>, vector<1x2x128xf32>
    %98 = vector.shape_cast %97 : vector<1x2x128xf32> to vector<2x128xf32>
    %99 = vector.shape_cast %96 : vector<2x128xf32> to vector<1x2x128xf32>
    tpu.vector_store %arg6[%c4_101, %c0_102, %c0_103], %99 {strides = array<i32>} : memref<5x2x128xf32, #tpu.memory_space<vmem>>, vector<1x2x128xf32>,
    return
  }
  func.func @transform_0(%arg0: i32) -> (i32, i32, i32) {
    %c0_i32 = arith.constant 0 : i32
    %c0_i32_0 = arith.constant 0 : i32
    %c0_i32_1 = arith.constant 0 : i32
    return %arg0, %c0_i32, %c0_i32_0 : i32, i32, i32
  }
  func.func @transform_1(%arg0: i32) -> (i32, i32, i32) {
    %c0_i32 = arith.constant 0 : i32
    %c0_i32_0 = arith.constant 0 : i32
    %c0_i32_1 = arith.constant 0 : i32
    return %arg0, %c0_i32, %c0_i32_0 : i32, i32, i32
  }
  func.func @transform_2(%arg0: i32) -> (i32, i32, i32) {
    %c0_i32 = arith.constant 0 : i32
    %c0_i32_0 = arith.constant 0 : i32
    %c0_i32_1 = arith.constant 0 : i32
    return %arg0, %c0_i32, %c0_i32_0 : i32, i32, i32
  }
  func.func @transform_3(%arg0: i32) -> (i32, i32, i32) {
    %c0_i32 = arith.constant 0 : i32
    %c0_i32_0 = arith.constant 0 : i32
    %c0_i32_1 = arith.constant 0 : i32
    return %arg0, %c0_i32, %c0_i32_0 : i32, i32, i32
  }
  func.func @transform_4(%arg0: i32) -> (i32, i32, i32) {
    %c0_i32 = arith.constant 0 : i32
    %c0_i32_0 = arith.constant 0 : i32
    %c0_i32_1 = arith.constant 0 : i32
    return %arg0, %c0_i32, %c0_i32_0 : i32, i32, i32
  }
  func.func @transform_5(%arg0: i32) -> (i32, i32, i32) {
    %c0_i32 = arith.constant 0 : i32
    %c0_i32_0 = arith.constant 0 : i32
    %c0_i32_1 = arith.constant 0 : i32
    return %arg0, %c0_i32, %c0_i32_0 : i32, i32, i32
  }
}

module attributes {stable_mosaic.version = 11 : i64} {
  func.func @_layer_kernel(%arg0: i32, %arg1: memref<80x128xf32, #tpu.memory_space<vmem>>, %arg2: memref<80x128xf32, #tpu.memory_space<vmem>>, %arg3: memref<80x128xf32, #tpu.memory_space<vmem>>, %arg4: memref<128x128xf32, #tpu.memory_space<vmem>>, %arg5: memref<1x128xf32, #tpu.memory_space<vmem>>, %arg6: memref<128x128xf32, #tpu.memory_space<vmem>>, %arg7: memref<1x128xf32, #tpu.memory_space<vmem>>, %arg8: memref<80x128xf32, #tpu.memory_space<vmem>>, %arg9: memref<80x128xf32, #tpu.memory_space<vmem>>) attributes {dimension_semantics = [#tpu.dimension_semantics<parallel>], iteration_bounds = array<i64: 2>, scalar_prefetch = 0 : i64, scratch_operands = 0 : i64, tpu.core_type = #tpu.core_type<tc>, window_params = [{transform_indices = @transform_0, window_bounds = array<i64: 80, 128>}, {transform_indices = @transform_1, window_bounds = array<i64: 80, 128>}, {transform_indices = @transform_2, window_bounds = array<i64: 80, 128>}, {pipeline_mode = #tpu.pipeline_mode<synchronous>, transform_indices = @transform_3, window_bounds = array<i64: 128, 128>}, {pipeline_mode = #tpu.pipeline_mode<synchronous>, transform_indices = @transform_4, window_bounds = array<i64: 1, 128>}, {pipeline_mode = #tpu.pipeline_mode<synchronous>, transform_indices = @transform_5, window_bounds = array<i64: 128, 128>}, {pipeline_mode = #tpu.pipeline_mode<synchronous>, transform_indices = @transform_6, window_bounds = array<i64: 1, 128>}, {transform_indices = @transform_7, window_bounds = array<i64: 80, 128>}, {transform_indices = @transform_8, window_bounds = array<i64: 80, 128>}]} {
    %c0 = arith.constant 0 : index
    %c0_0 = arith.constant 0 : index
    %0 = vector.load %arg1[%c0, %c0_0] : memref<80x128xf32, #tpu.memory_space<vmem>>, vector<80x128xf32>
    %c0_1 = arith.constant 0 : index
    %c0_2 = arith.constant 0 : index
    %1 = vector.load %arg4[%c0_1, %c0_2] : memref<128x128xf32, #tpu.memory_space<vmem>>, vector<128x128xf32>
    %cst = arith.constant dense<0.000000e+00> : vector<80x128xf32>
    %2 = tpu.matmul %0, %1, %cst {dimension_numbers = #tpu.dot_dimension_numbers<[1], [0], [0], [1], [0, 0, 1, 1], [], []>} : vector<80x128xf32>, vector<128x128xf32>, vector<80x128xf32> -> vector<80x128xf32>
    %c0_3 = arith.constant 0 : index
    %c0_4 = arith.constant 0 : index
    %3 = vector.load %arg5[%c0_3, %c0_4] : memref<1x128xf32, #tpu.memory_space<vmem>>, vector<1x128xf32>
    %4 = vector.broadcast %3 : vector<1x128xf32> to vector<80x128xf32>
    %5 = arith.addf %2, %4 : vector<80x128xf32>
    %cst_5 = arith.constant 0.000000e+00 : f32
    %6 = vector.broadcast %cst_5 : f32 to vector<80x128xf32>
    %7 = arith.cmpf ogt, %5, %6 : vector<80x128xf32>
    %cst_6 = arith.constant 0.00999999977 : f32
    %8 = vector.broadcast %cst_6 : f32 to vector<80x128xf32>
    %9 = arith.mulf %8, %5 : vector<80x128xf32>
    %10 = arith.select %7, %5, %9 : vector<80x128xi1>, vector<80x128xf32>
    %c0_7 = arith.constant 0 : index
    %c0_8 = arith.constant 0 : index
    %11 = vector.load %arg6[%c0_7, %c0_8] : memref<128x128xf32, #tpu.memory_space<vmem>>, vector<128x128xf32>
    %cst_9 = arith.constant dense<0.000000e+00> : vector<80x128xf32>
    %12 = tpu.matmul %10, %11, %cst_9 {dimension_numbers = #tpu.dot_dimension_numbers<[1], [0], [0], [1], [0, 0, 1, 1], [], []>} : vector<80x128xf32>, vector<128x128xf32>, vector<80x128xf32> -> vector<80x128xf32>
    %c0_10 = arith.constant 0 : index
    %c0_11 = arith.constant 0 : index
    %13 = vector.load %arg7[%c0_10, %c0_11] : memref<1x128xf32, #tpu.memory_space<vmem>>, vector<1x128xf32>
    %14 = vector.broadcast %13 : vector<1x128xf32> to vector<80x128xf32>
    %15 = arith.addf %12, %14 : vector<80x128xf32>
    %cst_12 = arith.constant 0.000000e+00 : f32
    %16 = vector.broadcast %cst_12 : f32 to vector<80x128xf32>
    %17 = arith.cmpf ogt, %15, %16 : vector<80x128xf32>
    %cst_13 = arith.constant 0.00999999977 : f32
    %18 = vector.broadcast %cst_13 : f32 to vector<80x128xf32>
    %19 = arith.mulf %18, %15 : vector<80x128xf32>
    %20 = arith.select %17, %15, %19 : vector<80x128xi1>, vector<80x128xf32>
    %c0_14 = arith.constant 0 : index
    %c0_15 = arith.constant 0 : index
    %21 = vector.load %arg2[%c0_14, %c0_15] : memref<80x128xf32, #tpu.memory_space<vmem>>, vector<80x128xf32>
    %22 = arith.addf %20, %21 : vector<80x128xf32>
    %c0_16 = arith.constant 0 : index
    %c0_17 = arith.constant 0 : index
    %23 = vector.load %arg8[%c0_16, %c0_17] : memref<80x128xf32, #tpu.memory_space<vmem>>, vector<80x128xf32>
    tpu.vector_store %arg8[%c0_16, %c0_17], %22 {strides = array<i32>} : memref<80x128xf32, #tpu.memory_space<vmem>>, vector<80x128xf32>,
    %c0_18 = arith.constant 0 : index
    %c0_19 = arith.constant 0 : index
    %24 = vector.load %arg3[%c0_18, %c0_19] : memref<80x128xf32, #tpu.memory_space<vmem>>, vector<80x128xf32>
    %25 = arith.mulf %22, %24 : vector<80x128xf32>
    %c0_20 = arith.constant 0 : index
    %c0_21 = arith.constant 0 : index
    %26 = vector.load %arg9[%c0_20, %c0_21] : memref<80x128xf32, #tpu.memory_space<vmem>>, vector<80x128xf32>
    tpu.vector_store %arg9[%c0_20, %c0_21], %25 {strides = array<i32>} : memref<80x128xf32, #tpu.memory_space<vmem>>, vector<80x128xf32>,
    return
  }
  func.func @transform_0(%arg0: i32) -> (i32, i32) {
    %c0_i32 = arith.constant 0 : i32
    %c0_i32_0 = arith.constant 0 : i32
    return %arg0, %c0_i32 : i32, i32
  }
  func.func @transform_1(%arg0: i32) -> (i32, i32) {
    %c0_i32 = arith.constant 0 : i32
    %c0_i32_0 = arith.constant 0 : i32
    return %arg0, %c0_i32 : i32, i32
  }
  func.func @transform_2(%arg0: i32) -> (i32, i32) {
    %c0_i32 = arith.constant 0 : i32
    %c0_i32_0 = arith.constant 0 : i32
    return %arg0, %c0_i32 : i32, i32
  }
  func.func @transform_3(%arg0: i32) -> (i32, i32) {
    %c0_i32 = arith.constant 0 : i32
    %c0_i32_0 = arith.constant 0 : i32
    %c0_i32_1 = arith.constant 0 : i32
    return %c0_i32, %c0_i32_0 : i32, i32
  }
  func.func @transform_4(%arg0: i32) -> (i32, i32) {
    %c0_i32 = arith.constant 0 : i32
    %c0_i32_0 = arith.constant 0 : i32
    %c0_i32_1 = arith.constant 0 : i32
    return %c0_i32, %c0_i32_0 : i32, i32
  }
  func.func @transform_5(%arg0: i32) -> (i32, i32) {
    %c0_i32 = arith.constant 0 : i32
    %c0_i32_0 = arith.constant 0 : i32
    %c0_i32_1 = arith.constant 0 : i32
    return %c0_i32, %c0_i32_0 : i32, i32
  }
  func.func @transform_6(%arg0: i32) -> (i32, i32) {
    %c0_i32 = arith.constant 0 : i32
    %c0_i32_0 = arith.constant 0 : i32
    %c0_i32_1 = arith.constant 0 : i32
    return %c0_i32, %c0_i32_0 : i32, i32
  }
  func.func @transform_7(%arg0: i32) -> (i32, i32) {
    %c0_i32 = arith.constant 0 : i32
    %c0_i32_0 = arith.constant 0 : i32
    return %arg0, %c0_i32 : i32, i32
  }
  func.func @transform_8(%arg0: i32) -> (i32, i32) {
    %c0_i32 = arith.constant 0 : i32
    %c0_i32_0 = arith.constant 0 : i32
    return %arg0, %c0_i32 : i32, i32
  }
}

module attributes {stable_mosaic.version = 11 : i64} {
  func.func @_layer_kernel(%arg0: i32, %arg1: memref<80x128xf32, #tpu.memory_space<vmem>>, %arg2: memref<80x128xf32, #tpu.memory_space<vmem>>, %arg3: memref<80x128xf32, #tpu.memory_space<vmem>>, %arg4: memref<128x128xf32, #tpu.memory_space<vmem>>, %arg5: memref<1x128xf32, #tpu.memory_space<vmem>>, %arg6: memref<128x128xf32, #tpu.memory_space<vmem>>, %arg7: memref<1x128xf32, #tpu.memory_space<vmem>>, %arg8: memref<80x128xf32, #tpu.memory_space<vmem>>, %arg9: memref<80x128xf32, #tpu.memory_space<vmem>>) attributes {dimension_semantics = [#tpu.dimension_semantics<parallel>], iteration_bounds = array<i64: 2>, scalar_prefetch = 0 : i64, scratch_operands = 0 : i64, tpu.core_type = #tpu.core_type<tc>, window_params = [{transform_indices = @transform_0, window_bounds = array<i64: 80, 128>}, {transform_indices = @transform_1, window_bounds = array<i64: 80, 128>}, {transform_indices = @transform_2, window_bounds = array<i64: 80, 128>}, {pipeline_mode = #tpu.pipeline_mode<synchronous>, transform_indices = @transform_3, window_bounds = array<i64: 128, 128>}, {pipeline_mode = #tpu.pipeline_mode<synchronous>, transform_indices = @transform_4, window_bounds = array<i64: 1, 128>}, {pipeline_mode = #tpu.pipeline_mode<synchronous>, transform_indices = @transform_5, window_bounds = array<i64: 128, 128>}, {pipeline_mode = #tpu.pipeline_mode<synchronous>, transform_indices = @transform_6, window_bounds = array<i64: 1, 128>}, {transform_indices = @transform_7, window_bounds = array<i64: 80, 128>}, {transform_indices = @transform_8, window_bounds = array<i64: 80, 128>}]} {
    %c0 = arith.constant 0 : index
    %c0_0 = arith.constant 0 : index
    %0 = vector.load %arg1[%c0, %c0_0] : memref<80x128xf32, #tpu.memory_space<vmem>>, vector<80x128xf32>
    %c0_1 = arith.constant 0 : index
    %c0_2 = arith.constant 0 : index
    %1 = vector.load %arg4[%c0_1, %c0_2] : memref<128x128xf32, #tpu.memory_space<vmem>>, vector<128x128xf32>
    %cst = arith.constant dense<0.000000e+00> : vector<80x128xf32>
    %2 = tpu.matmul %0, %1, %cst {dimension_numbers = #tpu.dot_dimension_numbers<[1], [0], [0], [1], [0, 0, 1, 1], [], []>} : vector<80x128xf32>, vector<128x128xf32>, vector<80x128xf32> -> vector<80x128xf32>
    %c0_3 = arith.constant 0 : index
    %c0_4 = arith.constant 0 : index
    %3 = vector.load %arg5[%c0_3, %c0_4] : memref<1x128xf32, #tpu.memory_space<vmem>>, vector<1x128xf32>
    %4 = vector.broadcast %3 : vector<1x128xf32> to vector<80x128xf32>
    %5 = arith.addf %2, %4 : vector<80x128xf32>
    %cst_5 = arith.constant 0.000000e+00 : f32
    %6 = vector.broadcast %cst_5 : f32 to vector<80x128xf32>
    %7 = arith.cmpf ogt, %5, %6 : vector<80x128xf32>
    %cst_6 = arith.constant 0.00999999977 : f32
    %8 = vector.broadcast %cst_6 : f32 to vector<80x128xf32>
    %9 = arith.mulf %8, %5 : vector<80x128xf32>
    %10 = arith.select %7, %5, %9 : vector<80x128xi1>, vector<80x128xf32>
    %c0_7 = arith.constant 0 : index
    %c0_8 = arith.constant 0 : index
    %11 = vector.load %arg6[%c0_7, %c0_8] : memref<128x128xf32, #tpu.memory_space<vmem>>, vector<128x128xf32>
    %cst_9 = arith.constant dense<0.000000e+00> : vector<80x128xf32>
    %12 = tpu.matmul %10, %11, %cst_9 {dimension_numbers = #tpu.dot_dimension_numbers<[1], [0], [0], [1], [0, 0, 1, 1], [], []>} : vector<80x128xf32>, vector<128x128xf32>, vector<80x128xf32> -> vector<80x128xf32>
    %c0_10 = arith.constant 0 : index
    %c0_11 = arith.constant 0 : index
    %13 = vector.load %arg7[%c0_10, %c0_11] : memref<1x128xf32, #tpu.memory_space<vmem>>, vector<1x128xf32>
    %14 = vector.broadcast %13 : vector<1x128xf32> to vector<80x128xf32>
    %15 = arith.addf %12, %14 : vector<80x128xf32>
    %cst_12 = arith.constant 0.000000e+00 : f32
    %16 = vector.broadcast %cst_12 : f32 to vector<80x128xf32>
    %17 = arith.cmpf ogt, %15, %16 : vector<80x128xf32>
    %cst_13 = arith.constant 0.00999999977 : f32
    %18 = vector.broadcast %cst_13 : f32 to vector<80x128xf32>
    %19 = arith.mulf %18, %15 : vector<80x128xf32>
    %20 = arith.select %17, %15, %19 : vector<80x128xi1>, vector<80x128xf32>
    %c0_14 = arith.constant 0 : index
    %c0_15 = arith.constant 0 : index
    %21 = vector.load %arg2[%c0_14, %c0_15] : memref<80x128xf32, #tpu.memory_space<vmem>>, vector<80x128xf32>
    %22 = arith.addf %20, %21 : vector<80x128xf32>
    %c0_16 = arith.constant 0 : index
    %c0_17 = arith.constant 0 : index
    %23 = vector.load %arg8[%c0_16, %c0_17] : memref<80x128xf32, #tpu.memory_space<vmem>>, vector<80x128xf32>
    tpu.vector_store %arg8[%c0_16, %c0_17], %22 {strides = array<i32>} : memref<80x128xf32, #tpu.memory_space<vmem>>, vector<80x128xf32>,
    %c0_18 = arith.constant 0 : index
    %c0_19 = arith.constant 0 : index
    %24 = vector.load %arg3[%c0_18, %c0_19] : memref<80x128xf32, #tpu.memory_space<vmem>>, vector<80x128xf32>
    %25 = arith.mulf %22, %24 : vector<80x128xf32>
    %c0_20 = arith.constant 0 : index
    %c0_21 = arith.constant 0 : index
    %26 = vector.load %arg9[%c0_20, %c0_21] : memref<80x128xf32, #tpu.memory_space<vmem>>, vector<80x128xf32>
    tpu.vector_store %arg9[%c0_20, %c0_21], %25 {strides = array<i32>} : memref<80x128xf32, #tpu.memory_space<vmem>>, vector<80x128xf32>,
    return
  }
  func.func @transform_0(%arg0: i32) -> (i32, i32) {
    %c0_i32 = arith.constant 0 : i32
    %c0_i32_0 = arith.constant 0 : i32
    return %arg0, %c0_i32 : i32, i32
  }
  func.func @transform_1(%arg0: i32) -> (i32, i32) {
    %c0_i32 = arith.constant 0 : i32
    %c0_i32_0 = arith.constant 0 : i32
    return %arg0, %c0_i32 : i32, i32
  }
  func.func @transform_2(%arg0: i32) -> (i32, i32) {
    %c0_i32 = arith.constant 0 : i32
    %c0_i32_0 = arith.constant 0 : i32
    return %arg0, %c0_i32 : i32, i32
  }
  func.func @transform_3(%arg0: i32) -> (i32, i32) {
    %c0_i32 = arith.constant 0 : i32
    %c0_i32_0 = arith.constant 0 : i32
    %c0_i32_1 = arith.constant 0 : i32
    return %c0_i32, %c0_i32_0 : i32, i32
  }
  func.func @transform_4(%arg0: i32) -> (i32, i32) {
    %c0_i32 = arith.constant 0 : i32
    %c0_i32_0 = arith.constant 0 : i32
    %c0_i32_1 = arith.constant 0 : i32
    return %c0_i32, %c0_i32_0 : i32, i32
  }
  func.func @transform_5(%arg0: i32) -> (i32, i32) {
    %c0_i32 = arith.constant 0 : i32
    %c0_i32_0 = arith.constant 0 : i32
    %c0_i32_1 = arith.constant 0 : i32
    return %c0_i32, %c0_i32_0 : i32, i32
  }
  func.func @transform_6(%arg0: i32) -> (i32, i32) {
    %c0_i32 = arith.constant 0 : i32
    %c0_i32_0 = arith.constant 0 : i32
    %c0_i32_1 = arith.constant 0 : i32
    return %c0_i32, %c0_i32_0 : i32, i32
  }
  func.func @transform_7(%arg0: i32) -> (i32, i32) {
    %c0_i32 = arith.constant 0 : i32
    %c0_i32_0 = arith.constant 0 : i32
    return %arg0, %c0_i32 : i32, i32
  }
  func.func @transform_8(%arg0: i32) -> (i32, i32) {
    %c0_i32 = arith.constant 0 : i32
    %c0_i32_0 = arith.constant 0 : i32
    return %arg0, %c0_i32 : i32, i32
  }
}

module attributes {stable_mosaic.version = 11 : i64} {
  func.func @_head_kernel(%arg0: i32, %arg1: memref<256x16xf32, #tpu.memory_space<vmem>>, %arg2: memref<16x256xf32, #tpu.memory_space<vmem>>, %arg3: memref<1x256xf32, #tpu.memory_space<vmem>>, %arg4: memref<256x128xf32, #tpu.memory_space<vmem>>, %arg5: memref<1x128xf32, #tpu.memory_space<vmem>>, %arg6: memref<256x128xf32, #tpu.memory_space<vmem>>) attributes {dimension_semantics = [#tpu.dimension_semantics<parallel>], iteration_bounds = array<i64: 2>, scalar_prefetch = 0 : i64, scratch_operands = 0 : i64, tpu.core_type = #tpu.core_type<tc>, window_params = [{transform_indices = @transform_0, window_bounds = array<i64: 256, 16>}, {pipeline_mode = #tpu.pipeline_mode<synchronous>, transform_indices = @transform_1, window_bounds = array<i64: 16, 256>}, {pipeline_mode = #tpu.pipeline_mode<synchronous>, transform_indices = @transform_2, window_bounds = array<i64: 1, 256>}, {pipeline_mode = #tpu.pipeline_mode<synchronous>, transform_indices = @transform_3, window_bounds = array<i64: 256, 128>}, {pipeline_mode = #tpu.pipeline_mode<synchronous>, transform_indices = @transform_4, window_bounds = array<i64: 1, 128>}, {transform_indices = @transform_5, window_bounds = array<i64: 256, 128>}]} {
    %c0 = arith.constant 0 : index
    %c0_0 = arith.constant 0 : index
    %0 = vector.load %arg1[%c0, %c0_0] : memref<256x16xf32, #tpu.memory_space<vmem>>, vector<256x16xf32>
    %c0_1 = arith.constant 0 : index
    %c0_2 = arith.constant 0 : index
    %1 = vector.load %arg2[%c0_1, %c0_2] : memref<16x256xf32, #tpu.memory_space<vmem>>, vector<16x256xf32>
    %cst = arith.constant dense<0.000000e+00> : vector<256x256xf32>
    %2 = tpu.matmul %0, %1, %cst {dimension_numbers = #tpu.dot_dimension_numbers<[1], [0], [0], [1], [0, 0, 1, 1], [], []>} : vector<256x16xf32>, vector<16x256xf32>, vector<256x256xf32> -> vector<256x256xf32>
    %c0_3 = arith.constant 0 : index
    %c0_4 = arith.constant 0 : index
    %3 = vector.load %arg3[%c0_3, %c0_4] : memref<1x256xf32, #tpu.memory_space<vmem>>, vector<1x256xf32>
    %4 = vector.broadcast %3 : vector<1x256xf32> to vector<256x256xf32>
    %5 = arith.addf %2, %4 : vector<256x256xf32>
    %cst_5 = arith.constant 0.000000e+00 : f32
    %6 = vector.broadcast %cst_5 : f32 to vector<256x256xf32>
    %7 = arith.cmpf ogt, %5, %6 : vector<256x256xf32>
    %cst_6 = arith.constant 0.00999999977 : f32
    %8 = vector.broadcast %cst_6 : f32 to vector<256x256xf32>
    %9 = arith.mulf %8, %5 : vector<256x256xf32>
    %10 = arith.select %7, %5, %9 : vector<256x256xi1>, vector<256x256xf32>
    %c0_7 = arith.constant 0 : index
    %c0_8 = arith.constant 0 : index
    %11 = vector.load %arg4[%c0_7, %c0_8] : memref<256x128xf32, #tpu.memory_space<vmem>>, vector<256x128xf32>
    %cst_9 = arith.constant dense<0.000000e+00> : vector<256x128xf32>
    %12 = tpu.matmul %10, %11, %cst_9 {dimension_numbers = #tpu.dot_dimension_numbers<[1], [0], [0], [1], [0, 0, 1, 1], [], []>} : vector<256x256xf32>, vector<256x128xf32>, vector<256x128xf32> -> vector<256x128xf32>
    %c0_10 = arith.constant 0 : index
    %c0_11 = arith.constant 0 : index
    %13 = vector.load %arg5[%c0_10, %c0_11] : memref<1x128xf32, #tpu.memory_space<vmem>>, vector<1x128xf32>
    %14 = vector.broadcast %13 : vector<1x128xf32> to vector<256x128xf32>
    %15 = arith.addf %12, %14 : vector<256x128xf32>
    %c0_12 = arith.constant 0 : index
    %c0_13 = arith.constant 0 : index
    %16 = vector.load %arg6[%c0_12, %c0_13] : memref<256x128xf32, #tpu.memory_space<vmem>>, vector<256x128xf32>
    tpu.vector_store %arg6[%c0_12, %c0_13], %15 {strides = array<i32>} : memref<256x128xf32, #tpu.memory_space<vmem>>, vector<256x128xf32>,
    return
  }
  func.func @transform_0(%arg0: i32) -> (i32, i32) {
    %c0_i32 = arith.constant 0 : i32
    %c0_i32_0 = arith.constant 0 : i32
    return %arg0, %c0_i32 : i32, i32
  }
  func.func @transform_1(%arg0: i32) -> (i32, i32) {
    %c0_i32 = arith.constant 0 : i32
    %c0_i32_0 = arith.constant 0 : i32
    %c0_i32_1 = arith.constant 0 : i32
    return %c0_i32, %c0_i32_0 : i32, i32
  }
  func.func @transform_2(%arg0: i32) -> (i32, i32) {
    %c0_i32 = arith.constant 0 : i32
    %c0_i32_0 = arith.constant 0 : i32
    %c0_i32_1 = arith.constant 0 : i32
    return %c0_i32, %c0_i32_0 : i32, i32
  }
  func.func @transform_3(%arg0: i32) -> (i32, i32) {
    %c0_i32 = arith.constant 0 : i32
    %c0_i32_0 = arith.constant 0 : i32
    %c0_i32_1 = arith.constant 0 : i32
    return %c0_i32, %c0_i32_0 : i32, i32
  }
  func.func @transform_4(%arg0: i32) -> (i32, i32) {
    %c0_i32 = arith.constant 0 : i32
    %c0_i32_0 = arith.constant 0 : i32
    %c0_i32_1 = arith.constant 0 : i32
    return %c0_i32, %c0_i32_0 : i32, i32
  }
  func.func @transform_5(%arg0: i32) -> (i32, i32) {
    %c0_i32 = arith.constant 0 : i32
    %c0_i32_0 = arith.constant 0 : i32
    return %arg0, %c0_i32 : i32, i32
  }
}

</mosaic_0001>

<bundles_post_ra>
// kernel: tile.13
= control target key start
LH: loop header
LB: loop body
LE: loop exit
PB: predicated region body
PF: predicated region fallthrough
CT: control target
= control target key end

     0   :  { %2 = vsyncpa [#allocation1], 0  ;;  %s44_s6 = smov [#allocation0]   ;;  %s70_s0 = inlined_call_operand.hbm [shape: f32[16], index: 0, kind: input, shape index: {}]   ;;  %s71_s1 = inlined_call_operand.vmem [shape: f32[8,16], index: 1, kind: output, shape index: {}]  }
   0x1   :  { %s9_s7 = sshll.u32 %s44_s6, 4  ;;  %s20_s10 = scalar_lea.hbm %s70_s0, 16  ;;  %s10_s7 = int_to_ptr.vmem [resolvable:$true] %s9_s7 }
   0x2   :  { %p21_p0 = scmp.ne.s32.totalorder %s70_s0, %s20_s10  ;;  %p24_p1 = scmp.lt.u32.totalorder %s20_s10, %s70_s0 }
   0x4   :  { %p26_p2 = pnand %p24_p1, %p21_p0 }
   0x6   :  { %29 = shalt.err (!%p26_p2)
}
   0x7   :  { %s30_s15 = scalar_lea.vmem %s10_s7, 16  ;;  %s34_s16 = scalar_lea.vmem %s10_s7, 32 }
   0x8   :  { %p31_p3 = scmp.ne.s32.totalorder %s10_s7, %s30_s15  ;;  %p35_p4 = scmp.lt.s32.totalorder %s10_s7, %s10_s7 }
   0x9   :  { %p36_p5 = scmp.lt.s32.totalorder %s34_s16, %s30_s15 }
   0xb   :  { %p37_p6 = por %p36_p5, %p35_p4 }
   0xd   :  { %p38_p7 = pnand %p37_p6, %p31_p3 }
   0xf   :  { %41 = shalt.err (!%p38_p7)
}
  0x10   :  { %12 = dma.hbm_to_vmem [thread:$0]  %s70_s0, 16, %s10_s7, [#allocation1]  }
  0x11   :  { %42 = dma.done.wait [#allocation1], 16  }
  0x12   :  { %43 = vsyncadd [#allocation1], 4294967280  ;;  %v16_v0 = vld [vmem:[#allocation0] ss:$0 sm:$0xff] }
  0x13   :  { %17 = vst [vmem:[%s71_s1] sm:$0xff] %v16_v0 }
  0x14   :  { %18 = vsyncpa [#allocation1], 1 }

// kernel: tile.14
= control target key start
LH: loop header
LB: loop body
LE: loop exit
PB: predicated region body
PF: predicated region fallthrough
CT: control target
= control target key end

     0   :  { %s67_s10 = smov 112   ;;  %s68_s11 = smov 80   ;;  %vm3_vm0 = vcmask 130048   ;;  %vm9_vm1 = vcmask 1048448   ;;  %vm15_vm2 = vcmask 917248   ;;  %vm21_vm3 = vcmask 786048   ;;  %s111_s0 = inlined_call_operand.vmem [shape: f32[8,16], index: 0, kind: input, shape index: {}]   ;;  %s112_s1 = inlined_call_operand.vmem [shape: f32[1,128], index: 1, kind: output, shape index: {}]  }
   0x1   :  { %v53_v0 = vld [vmem:[%s111_s0 + $0x7] sm:$0x1]   ;;  %v55_v1 = vld [vmem:[%s111_s0 + $0x5] sm:$0x1]   ;;  %v54_v2 = vld [vmem:[%s111_s0 + $0x6] sm:$0x1]  }
   0x2   :  { %7 = vrot.lane.b32.xlu0 %v53_v0, %s67_s10  ;;  %19 = vrot.lane.b32.xlu1 %v55_v1, %s68_s11  ;;  %v56_v3 = vld [vmem:[%s111_s0 + $0x4] sm:$0x1]   ;;  %v2_v4 = vld [vmem:[%s111_s0] sm:$0x1]   ;;  %s69_s18 = smov 96   ;;  %s70_s19 = smov 64  }
   0x3   :  { %4 = vst.msk [vmem:[#allocation0] sm:$0x1] %vm3_vm0, %v2_v4   ;;  %v57_v5 = vld [vmem:[%s111_s0 + $0x3] sm:$0x1]   ;;  %v58_v6 = vld [vmem:[%s111_s0 + $0x2] sm:$0x1]  }
   0x4   :  { %s71_s24 = smov 48   ;;  %s72_s25 = smov 32   ;;  %v59_v7 = vld [vmem:[%s111_s0 + $0x1] sm:$0x1]   ;;  %vm27_vm4 = vcmask 654848   ;;  %vm33_vm5 = vcmask 523648  }
   0x5   :  { %s73_s0 = smov 16   ;;  %vm39_vm6 = vcmask 392448   ;;  %vm45_vm7 = vcmask 261248  }
   0x6   :  { %13 = vrot.lane.b32.xlu0 %v54_v2, %s69_s18  ;;  %25 = vrot.lane.b32.xlu1 %v56_v3, %s70_s19 }
   0xa   :  { %31 = vrot.lane.b32.xlu0 %v57_v5, %s71_s24  ;;  %37 = vrot.lane.b32.xlu1 %v58_v6, %s72_s25 }
   0xe   :  { %43 = vrot.lane.b32.xlu0 %v59_v7, %s73_s0 }
  0x74   :  { %v8_v8 = vpop.permute.xlu0 %7   ;;  %v20_v9 = vpop.permute.xlu1 %19  }
  0x75   :  { %10 = vst.msk [vmem:[#allocation0] sm:$0x1] %vm9_vm1, %v8_v8  }
  0x78   :  { %v14_v10 = vpop.permute.xlu0 %13   ;;  %v26_v11 = vpop.permute.xlu1 %25  }
  0x79   :  { %16 = vst.msk [vmem:[#allocation0] sm:$0x1] %vm15_vm2, %v14_v10  }
  0x7a   :  { %22 = vst.msk [vmem:[#allocation0] sm:$0x1] %vm21_vm3, %v20_v9  }
  0x7b   :  { %28 = vst.msk [vmem:[#allocation0] sm:$0x1] %vm27_vm4, %v26_v11  }
  0x7c   :  { %v32_v12 = vpop.permute.xlu0 %31   ;;  %v38_v13 = vpop.permute.xlu1 %37  }
  0x7d   :  { %34 = vst.msk [vmem:[#allocation0] sm:$0x1] %vm33_vm5, %v32_v12  }
  0x7e   :  { %40 = vst.msk [vmem:[#allocation0] sm:$0x1] %vm39_vm6, %v38_v13  }
  0x80   :  { %v44_v14 = vpop.permute.xlu0 %43  }
  0x81   :  { %46 = vst.msk [vmem:[#allocation0] sm:$0x1] %vm45_vm7, %v44_v14  }
  0x88   :  { %v50_v15 = vld [vmem:[#allocation0] sm:$0x1] }
  0x89   :  { %52 = vst [vmem:[%s112_s1] sm:$0x1] %v50_v15 }

// kernel: fno2d_forward.10
= control target key start
LH: loop header
LB: loop body
LE: loop exit
PB: predicated region body
PF: predicated region fallthrough
CT: control target
= control target key end

     0   :  { %14 = vsyncpa [#allocation3], 0  ;;  %s2503_s0 = inlined_call_operand.vmem [shape: f32[512,4], index: 0, kind: input, shape index: {}]   ;;  %s2504_s1 = inlined_call_operand.vmem [shape: f32[512,3], index: 1, kind: input, shape index: {}]   ;;  %s2505_s2 = inlined_call_operand.hbm [shape: f32[4,16], index: 2, kind: input, shape index: {}]   ;;  %s2506_s3 = inlined_call_operand.hbm [shape: f32[1,16], index: 3, kind: input, shape index: {}]   ;;  %s2507_s4 = inlined_call_operand.hbm [shape: f32[3,16], index: 4, kind: input, shape index: {}]   ;;  %s2508_s5 = inlined_call_operand.hbm [shape: f32[1,16], index: 5, kind: input, shape index: {}]   ;;  %s2509_s6 = inlined_call_operand.vmem [shape: f32[512,16], index: 6, kind: output, shape index: {0}]   ;;  %s2510_s7 = inlined_call_operand.vmem [shape: f32[512,16], index: 7, kind: output, shape index: {1}]   ;;  %s2511_s8 = inlined_call_operand.vmem [shape: f32[512,16], index: 8, kind: output, shape index: {2}]  }
   0x1   :  { %15 = vsyncpa [#allocation5], 0 }
   0x2   :  { %16 = vsyncpa [#allocation8], 0  ;;  %s1936_s27 = smov 0  }
   0x3 LB: > { %s1447_s28 = sadd.s32 4294967295, %s1885_s27   ;;  %p1449_p0 = scmp.ge.s32.totalorder %s1885_s27, 1  ;;  %s1885_s27 = sphi %s1936_s27, %s22_s27  }
   0x4   : > { %p241_p1 = scmp.lt.s32.totalorder %s1885_s27, 3  ;;  %p1946_p2 = scmp.eq.s32.totalorder %s1447_s28, 0 }
   0x5   : > { %s1887_s30 = smov [#allocation4]   ;;  %s1888_s11 = smov [#allocation2]  }
   0x6   : > { %s2515_s29 = scalar_select %p1946_p2, 1, 0 }
   0x7   : > { %s265_s9 = sshll.u32 %s1887_s30, 4  ;;  %p1950_p3 = pnand %p1449_p0, %p241_p1  ;;  %s266_s9 = int_to_ptr.vmem [resolvable:$true] %s265_s9 }
   0x8   : > { %s254_s12 = sshll.u32 %s1888_s11, 4  ;;  %s1889_s13 = smov [#allocation6]   ;;  %s1962_s12 = int_to_ptr.vmem [resolvable:$true] %s254_s12 }
   0x9   : > { %s2516_s10 = scalar_select %p1950_p3, 1, 0 }
   0xa   : > { %p1722_p4 = pneg %p1950_p3  ;;  %s276_s14 = sshll.u32 %s1889_s13, 4  ;;  %s1964_s14 = int_to_ptr.vmem [resolvable:$true] %s276_s14 }
   0xb   : > { %s1890_s16 = smov [#allocation7]   ;;  %s1755_s20 = scalar_lea.hbm %s2506_s3, 16 }
   0xc   : > { %p1958_p5 = pnand %p1946_p2, %p1722_p4  ;;  %s287_s17 = sshll.u32 %s1890_s16, 4  ;;  %s1966_s17 = int_to_ptr.vmem [resolvable:$true] %s287_s17 }
   0xd   : > { %p1756_p6 = scmp.ne.s32.totalorder %s2506_s3, %s1755_s20  ;;  %p1762_p10 = scmp.lt.u32.totalorder %s1755_s20, %s2506_s3 }
   0xe   : > { %p1976_p7 = pneg %p1958_p5 }
  0x10   : > { %p1758_p8 = pnand %p1976_p7, %p1756_p6 }
  0x12   : > { %p1759_p9 = pneg %p1758_p8 }
  0x14   : > { %p1764_p11 = pnand %p1762_p10, %p1759_p9 }
  0x16   : > { %1767 = shalt.err (!%p1764_p11)
}
  0x17   : > { %s1768_s26 = scalar_lea.vmem %s266_s9, 16  ;;  %s1775_s30 = scalar_lea.vmem %s266_s9, 32 }
  0x18   : > { %p1769_p12 = scmp.ne.s32.totalorder %s266_s9, %s1768_s26  ;;  %p1776_p1 = scmp.lt.s32.totalorder %s266_s9, %s266_s9 }
  0x19   : > { %p1777_p4 = scmp.lt.s32.totalorder %s1775_s30, %s1768_s26 }
  0x1a   : > { %p1771_p13 = pnand %p1769_p12, %p1976_p7 }
  0x1b   : > { %p1778_p2 = por %p1777_p4, %p1776_p1 }
  0x1c   : > { %p1772_p0 = pneg %p1771_p13 }
  0x1e   : > { %p1779_p3 = pnand %p1778_p2, %p1772_p0 }
  0x20   : > { %1782 = shalt.err (!%p1779_p3)
}
  0x21   : > { %1728 = dma.hbm_to_vmem [thread:$0]  (!%p1958_p5), %s2506_s3, 16, %s266_s9, [#allocation5]  }
  0x22   : > { %s1783_s19 = scalar_lea.hbm %s2505_s2, 64 }
  0x23   : > { %p1784_p6 = scmp.ne.s32.totalorder %s2505_s2, %s1783_s19  ;;  %p1790_p2 = scmp.lt.u32.totalorder %s1783_s19, %s2505_s2 }
  0x25   : > { %p1786_p8 = pnand %p1784_p6, %p1976_p7 }
  0x27   : > { %p1787_p9 = pneg %p1786_p8 }
  0x29   : > { %p1792_p3 = pnand %p1790_p2, %p1787_p9 }
  0x2b   : > { %1795 = shalt.err (!%p1792_p3)
}
  0x2c   : > { %s1796_s9 = scalar_lea.vmem %s1962_s12, 64  ;;  %p1804_p13 = scmp.lt.s32.totalorder %s1962_s12, %s1962_s12 }
  0x2d   : > { %p1797_p10 = scmp.ne.s32.totalorder %s1962_s12, %s1796_s9  ;;  %p1805_p0 = scmp.lt.s32.totalorder %s1796_s9, %s1796_s9 }
  0x2f   : > { %p1799_p11 = pnand %p1797_p10, %p1976_p7  ;;  %p1806_p1 = por %p1805_p0, %p1804_p13 }
  0x31   : > { %p1800_p12 = pneg %p1799_p11 }
  0x33   : > { %p1807_p4 = pnand %p1806_p1, %p1800_p12 }
  0x35   : > { %1810 = shalt.err (!%p1807_p4)
}
  0x36   : > { %1725 = dma.hbm_to_vmem [thread:$0]  (!%p1958_p5), %s2505_s2, 64, %s1962_s12, [#allocation3]  }
  0x37   : > { %s1811_s13 = scalar_lea.hbm %s2507_s4, 64 }
  0x38   : > { %p1812_p6 = scmp.ne.s32.totalorder %s2507_s4, %s1811_s13  ;;  %p1818_p2 = scmp.lt.u32.totalorder %s1811_s13, %s2507_s4 }
  0x3a   : > { %p1814_p8 = pnand %p1812_p6, %p1976_p7 }
  0x3c   : > { %p1815_p9 = pneg %p1814_p8 }
  0x3e   : > { %p1820_p3 = pnand %p1818_p2, %p1815_p9 }
  0x40   : > { %1823 = shalt.err (!%p1820_p3)
}
  0x41   : > { %s1824_s12 = scalar_lea.vmem %s1964_s14, 64  ;;  %p1832_p13 = scmp.lt.s32.totalorder %s1964_s14, %s1964_s14 }
  0x42   : > { %p1825_p10 = scmp.ne.s32.totalorder %s1964_s14, %s1824_s12  ;;  %p1833_p0 = scmp.lt.s32.totalorder %s1824_s12, %s1824_s12 }
  0x44   : > { %p1827_p11 = pnand %p1825_p10, %p1976_p7  ;;  %p1834_p1 = por %p1833_p0, %p1832_p13 }
  0x46   : > { %p1828_p12 = pneg %p1827_p11 }
  0x48   : > { %p1835_p4 = pnand %p1834_p1, %p1828_p12 }
  0x4a   : > { %1838 = shalt.err (!%p1835_p4)
}
  0x4b   : > { %1731 = dma.hbm_to_vmem [thread:$0]  (!%p1958_p5), %s2507_s4, 64, %s1964_s14, [#allocation5]  }
  0x4c   : > { %s1839_s25 = scalar_lea.hbm %s2508_s5, 16 }
  0x4d   : > { %p1840_p6 = scmp.ne.s32.totalorder %s2508_s5, %s1839_s25  ;;  %p1846_p2 = scmp.lt.u32.totalorder %s1839_s25, %s2508_s5 }
  0x4f   : > { %p1842_p8 = pnand %p1840_p6, %p1976_p7 }
  0x51   : > { %p1843_p9 = pneg %p1842_p8 }
  0x53   : > { %p1848_p3 = pnand %p1846_p2, %p1843_p9 }
  0x55   : > { %1851 = shalt.err (!%p1848_p3)
}
  0x56   : > { %s1852_s14 = scalar_lea.vmem %s1966_s17, 16  ;;  %s1859_s16 = scalar_lea.vmem %s1966_s17, 32 }
  0x57   : > { %p1853_p10 = scmp.ne.s32.totalorder %s1966_s17, %s1852_s14  ;;  %p1860_p13 = scmp.lt.s32.totalorder %s1966_s17, %s1966_s17 }
  0x58   : > { %p1861_p0 = scmp.lt.s32.totalorder %s1859_s16, %s1852_s14 }
  0x59   : > { %p1855_p11 = pnand %p1853_p10, %p1976_p7 }
  0x5a   : > { %p1862_p1 = por %p1861_p0, %p1860_p13 }
  0x5b   : > { %p1856_p12 = pneg %p1855_p11 }
  0x5d   : > { %p1863_p4 = pnand %p1862_p1, %p1856_p12 }
  0x5f   : > { %1866 = shalt.err (!%p1863_p4)
}
  0x60   : > { %1734 = dma.hbm_to_vmem [thread:$0]  (!%p1958_p5), %s2508_s5, 16, %s1966_s17, [#allocation8]  }
  0x61   : > { %p2519_p6 = scmp.ne.s32.totalorder %s2516_s10, 0 }
  0x62   : > { %p2520_p7 = scmp.ne.s32.totalorder (!%p2519_p6), %s2515_s29, 0 }
  0x63   : > { %318 = sbr.rel (%p2519_p6) target bundleno = 398 (0x18e), region = 44 }
  0x6a   : > { %1872 = dma.done.wait (%p2520_p7), [#allocation3], 64  }
  0x6b   : > { %1874 = vsyncadd (%p2520_p7), [#allocation3], 4294967232 }
  0x6c   : > { %1876 = dma.done.wait (%p2520_p7), [#allocation5], 80  }
  0x6d   : > { %1878 = vsyncadd (%p2520_p7), [#allocation5], 4294967216 }
  0x6e   : > { %1880 = dma.done.wait (%p2520_p7), [#allocation8], 16  }
  0x6f   : > { %1882 = vsyncadd (%p2520_p7), [#allocation8], 4294967280  ;;  %s1460_s10 = sshll.u32 %s1447_s28, 5  ;;  %vm546_vm0 = vcmask 1043456   ;;  %vm912_vm1 = vcmask 1042432   ;;  %vm449_vm2 = vcmask 31744  }
  0x70   : > { %p380_p5 = scmp.lt.s32.totalorder %s1460_s10, 63  ;;  %v441_v0 = vld [vmem:[#allocation2] sm:$0xf]  ;;  %v807_v1 = vld [vmem:[#allocation6] sm:$0x7]  ;;  %vm815_vm3 = vcmask 23552  }
  0x71   : > { %1606 = vmatprep.subr.msk.mxu0 %vm546_vm0, %v441_v0  ;;  %1656 = vmatprep.subr.msk.mxu1 %vm912_vm1, %v807_v1  ;;  %vm1141_vm4 = vcmask 130048  }
  0x72   : > { %s2522_s10 = smov (!%p380_p5, %s1460_s10), 63  ;;  %1607 = vmatpush3.msk.msra.mxu0 %vm546_vm0, %v441_v0  ;;  %1657 = vmatpush3.msk.msra.mxu1 %vm912_vm1, %v807_v1 }
  0x73   : > { %s2078_s15 = sshll.u32 %s2522_s10, 3 }
  0x74   : > { %s2084_s20 = scalar_lea.vmem %s2503_s0, %s2078_s15  ;;  %s2090_s28 = scalar_lea.vmem %s2504_s1, %s2078_s15 }
  0x75   : > { %v409_v2 = vld [vmem:[%s2084_s20] sm:$0xff]  ;;  %v410_v4 = vld [vmem:[%s2084_s20 + $0x8] sm:$0xff]  ;;  %v411_v6 = vld [vmem:[%s2084_s20 + $0x10] sm:$0xff]  ;;  %s2230_s24 = scalar_lea.vmem %s2509_s6, %s2078_s15  ;;  %s2236_s26 = scalar_lea.vmem %s2510_s7, %s2078_s15 }
  0x76   : > { %v775_v3 = vld [vmem:[%s2090_s28] sm:$0xff]  ;;  %v776_v5 = vld [vmem:[%s2090_s28 + $0x8] sm:$0xff]  ;;  %1608 = vmatprep.mubr.msk.f32.mxu0 %vm449_vm2, %v409_v2  ;;  %v777_v7 = vld [vmem:[%s2090_s28 + $0x10] sm:$0xff]  ;;  %s2244_s13 = scalar_lea.vmem %s2511_s8, %s2078_s15 }
  0x77   : > { %1658 = vmatprep.mubr.msk.f32.mxu1 %vm815_vm3, %v775_v3  ;;  %1609 = vmatmul.mubr.msk.f32.vlgmr.msra.gmra.mrb[0].mxu0 %vm449_vm2, %v410_v4  ;;  %v412_v8 = vld [vmem:[%s2084_s20 + $0x18] sm:$0xff]  ;;  %v413_v10 = vld [vmem:[%s2084_s20 + $0x20] sm:$0xff]  ;;  %v414_v12 = vld [vmem:[%s2084_s20 + $0x28] sm:$0xff] }
  0x78   : > { %1659 = vmatmul.mubr.msk.f32.vlgmr.msra.gmra.mrb[0].mxu1 %vm815_vm3, %v776_v5  ;;  %1611 = vmatprep.mubr.msk.f32.mxu0 %vm449_vm2, %v411_v6  ;;  %v778_v9 = vld [vmem:[%s2090_s28 + $0x18] sm:$0xff]  ;;  %v779_v11 = vld [vmem:[%s2090_s28 + $0x20] sm:$0xff]  ;;  %v780_v13 = vld [vmem:[%s2090_s28 + $0x28] sm:$0xff] }
  0x79   : > { %1661 = vmatprep.mubr.msk.f32.mxu1 %vm815_vm3, %v777_v7  ;;  %v415_v14 = vld [vmem:[%s2084_s20 + $0x30] sm:$0xff]  ;;  %v416_v16 = vld [vmem:[%s2084_s20 + $0x38] sm:$0xff]  ;;  %v417_v18 = vld [vmem:[%s2084_s20 + $0x40] sm:$0xff] }
  0x7a   : > { %v781_v15 = vld [vmem:[%s2090_s28 + $0x30] sm:$0xff]  ;;  %v782_v17 = vld [vmem:[%s2090_s28 + $0x38] sm:$0xff]  ;;  %v783_v19 = vld [vmem:[%s2090_s28 + $0x40] sm:$0xff] }
  0x7b   : > { %1612 = vmatmul.mubr.msk.f32.gmra.mrb[2].mxu0 %vm449_vm2, %v412_v8  ;;  %v418_v20 = vld [vmem:[%s2084_s20 + $0x48] sm:$0xff]  ;;  %v419_v22 = vld [vmem:[%s2084_s20 + $0x50] sm:$0xff]  ;;  %v420_v24 = vld [vmem:[%s2084_s20 + $0x58] sm:$0xff] }
  0x7c   : > { %1662 = vmatmul.mubr.msk.f32.gmra.mrb[2].mxu1 %vm815_vm3, %v778_v9  ;;  %1614 = vmatprep.mubr.msk.f32.mxu0 %vm449_vm2, %v413_v10  ;;  %v784_v21 = vld [vmem:[%s2090_s28 + $0x48] sm:$0xff]  ;;  %v785_v23 = vld [vmem:[%s2090_s28 + $0x50] sm:$0xff]  ;;  %v786_v25 = vld [vmem:[%s2090_s28 + $0x58] sm:$0xff] }
  0x7d   : > { %1664 = vmatprep.mubr.msk.f32.mxu1 %vm815_vm3, %v779_v11  ;;  %v421_v26 = vld [vmem:[%s2084_s20 + $0x60] sm:$0xff]  ;;  %v422_v28 = vld [vmem:[%s2084_s20 + $0x68] sm:$0xff]  ;;  %v423_v30 = vld [vmem:[%s2084_s20 + $0x70] sm:$0xff] }
  0x7e   : > { %v787_v27 = vld [vmem:[%s2090_s28 + $0x60] sm:$0xff]  ;;  %v788_v29 = vld [vmem:[%s2090_s28 + $0x68] sm:$0xff]  ;;  %v789_v31 = vld [vmem:[%s2090_s28 + $0x70] sm:$0xff] }
  0x7f   : > { %1615 = vmatmul.mubr.msk.f32.gmra.mrb[4].mxu0 %vm449_vm2, %v414_v12  ;;  %v424_v32 = vld [vmem:[%s2084_s20 + $0x78] sm:$0xff]  ;;  %v425_v34 = vld [vmem:[%s2084_s20 + $0x80] sm:$0xff]  ;;  %v426_v36 = vld [vmem:[%s2084_s20 + $0x88] sm:$0xff] }
  0x80   : > { %1665 = vmatmul.mubr.msk.f32.gmra.mrb[4].mxu1 %vm815_vm3, %v780_v13  ;;  %1617 = vmatprep.mubr.msk.f32.mxu0 %vm449_vm2, %v415_v14  ;;  %v790_v33 = vld [vmem:[%s2090_s28 + $0x78] sm:$0xff]  ;;  %v791_v35 = vld [vmem:[%s2090_s28 + $0x80] sm:$0xff]  ;;  %v792_v37 = vld [vmem:[%s2090_s28 + $0x88] sm:$0xff] }
  0x81   : > { %1667 = vmatprep.mubr.msk.f32.mxu1 %vm815_vm3, %v781_v15  ;;  %v427_v38 = vld [vmem:[%s2084_s20 + $0x90] sm:$0xff]  ;;  %v428_v40 = vld [vmem:[%s2084_s20 + $0x98] sm:$0xff]  ;;  %v429_v42 = vld [vmem:[%s2084_s20 + $0xa0] sm:$0xff] }
  0x82   : > { %v793_v39 = vld [vmem:[%s2090_s28 + $0x90] sm:$0xff]  ;;  %v794_v41 = vld [vmem:[%s2090_s28 + $0x98] sm:$0xff]  ;;  %v795_v43 = vld [vmem:[%s2090_s28 + $0xa0] sm:$0xff] }
  0x83   : > { %1618 = vmatmul.mubr.msk.f32.gmra.mrb[6].mxu0 %vm449_vm2, %v416_v16  ;;  %v430_v44 = vld [vmem:[%s2084_s20 + $0xa8] sm:$0xff]  ;;  %v431_v46 = vld [vmem:[%s2084_s20 + $0xb0] sm:$0xff]  ;;  %v432_v48 = vld [vmem:[%s2084_s20 + $0xb8] sm:$0xff] }
  0x84   : > { %1668 = vmatmul.mubr.msk.f32.gmra.mrb[6].mxu1 %vm815_vm3, %v782_v17  ;;  %1620 = vmatprep.mubr.msk.f32.mxu0 %vm449_vm2, %v417_v18  ;;  %v796_v45 = vld [vmem:[%s2090_s28 + $0xa8] sm:$0xff]  ;;  %v797_v47 = vld [vmem:[%s2090_s28 + $0xb0] sm:$0xff]  ;;  %v798_v49 = vld [vmem:[%s2090_s28 + $0xb8] sm:$0xff] }
  0x85   : > { %1670 = vmatprep.mubr.msk.f32.mxu1 %vm815_vm3, %v783_v19  ;;  %v433_v50 = vld [vmem:[%s2084_s20 + $0xc0] sm:$0xff]  ;;  %v434_v52 = vld [vmem:[%s2084_s20 + $0xc8] sm:$0xff]  ;;  %v435_v54 = vld [vmem:[%s2084_s20 + $0xd0] sm:$0xff] }
  0x86   : > { %v799_v51 = vld [vmem:[%s2090_s28 + $0xc0] sm:$0xff]  ;;  %v800_v53 = vld [vmem:[%s2090_s28 + $0xc8] sm:$0xff]  ;;  %v801_v55 = vld [vmem:[%s2090_s28 + $0xd0] sm:$0xff] }
  0x87   : > { %1621 = vmatmul.mubr.msk.f32.gmra.mrb[8].mxu0 %vm449_vm2, %v418_v20  ;;  %v436_v56 = vld [vmem:[%s2084_s20 + $0xd8] sm:$0xff]  ;;  %v437_v58 = vld [vmem:[%s2084_s20 + $0xe0] sm:$0xff]  ;;  %v438_v60 = vld [vmem:[%s2084_s20 + $0xe8] sm:$0xff] }
  0x88   : > { %1671 = vmatmul.mubr.msk.f32.gmra.mrb[8].mxu1 %vm815_vm3, %v784_v21  ;;  %1623 = vmatprep.mubr.msk.f32.mxu0 %vm449_vm2, %v419_v22  ;;  %v802_v57 = vld [vmem:[%s2090_s28 + $0xd8] sm:$0xff]  ;;  %v803_v59 = vld [vmem:[%s2090_s28 + $0xe0] sm:$0xff]  ;;  %v804_v61 = vld [vmem:[%s2090_s28 + $0xe8] sm:$0xff] }
  0x89   : > { %1673 = vmatprep.mubr.msk.f32.mxu1 %vm815_vm3, %v785_v23  ;;  %v439_v62 = vld [vmem:[%s2084_s20 + $0xf0] sm:$0xff]  ;;  %v440_v0 = vld [vmem:[%s2084_s20 + $0xf8] sm:$0xff]  ;;  %v2222_v2 = vld [vmem:[#allocation4] ss:$0 sm:$0xff] }
  0x8a   : > { %v805_v63 = vld [vmem:[%s2090_s28 + $0xf0] sm:$0xff]  ;;  %v806_v1 = vld [vmem:[%s2090_s28 + $0xf8] sm:$0xff]  ;;  %v2224_v3 = vld [vmem:[#allocation7] ss:$0 sm:$0xff] }
  0x8b   : > { %1624 = vmatmul.mubr.msk.f32.gmra.mrb[10].mxu0 %vm449_vm2, %v420_v24 }
  0x8c   : > { %1674 = vmatmul.mubr.msk.f32.gmra.mrb[10].mxu1 %vm815_vm3, %v786_v25  ;;  %1626 = vmatprep.mubr.msk.f32.mxu0 %vm449_vm2, %v421_v26 }
  0x8d   : > { %1676 = vmatprep.mubr.msk.f32.mxu1 %vm815_vm3, %v787_v27 }
  0x8f   : > { %1627 = vmatmul.mubr.msk.f32.gmra.mrb[12].mxu0 %vm449_vm2, %v422_v28 }
  0x90   : > { %1677 = vmatmul.mubr.msk.f32.gmra.mrb[12].mxu1 %vm815_vm3, %v788_v29  ;;  %1629 = vmatprep.mubr.msk.f32.mxu0 %vm449_vm2, %v423_v30 }
  0x91   : > { %1679 = vmatprep.mubr.msk.f32.mxu1 %vm815_vm3, %v789_v31 }
  0x93   : > { %1630 = vmatmul.mubr.msk.f32.gmra.mrb[14].mxu0 %vm449_vm2, %v424_v32 }
  0x94   : > { %1680 = vmatmul.mubr.msk.f32.gmra.mrb[14].mxu1 %vm815_vm3, %v790_v33  ;;  %1632 = vmatprep.mubr.msk.f32.mxu0 %vm449_vm2, %v425_v34 }
  0x95   : > { %1682 = vmatprep.mubr.msk.f32.mxu1 %vm815_vm3, %v791_v35 }
  0x97   : > { %1633 = vmatmul.mubr.msk.f32.gmra.mrb[16].mxu0 %vm449_vm2, %v426_v36 }
  0x98   : > { %1683 = vmatmul.mubr.msk.f32.gmra.mrb[16].mxu1 %vm815_vm3, %v792_v37  ;;  %1635 = vmatprep.mubr.msk.f32.mxu0 %vm449_vm2, %v427_v38 }
  0x99   : > { %1685 = vmatprep.mubr.msk.f32.mxu1 %vm815_vm3, %v793_v39 }
  0x9b   : > { %1636 = vmatmul.mubr.msk.f32.gmra.mrb[18].mxu0 %vm449_vm2, %v428_v40 }
  0x9c   : > { %1686 = vmatmul.mubr.msk.f32.gmra.mrb[18].mxu1 %vm815_vm3, %v794_v41  ;;  %1638 = vmatprep.mubr.msk.f32.mxu0 %vm449_vm2, %v429_v42 }
  0x9d   : > { %1688 = vmatprep.mubr.msk.f32.mxu1 %vm815_vm3, %v795_v43 }
  0x9f   : > { %1639 = vmatmul.mubr.msk.f32.gmra.mrb[20].mxu0 %vm449_vm2, %v430_v44 }
  0xa0   : > { %1689 = vmatmul.mubr.msk.f32.gmra.mrb[20].mxu1 %vm815_vm3, %v796_v45  ;;  %1641 = vmatprep.mubr.msk.f32.mxu0 %vm449_vm2, %v431_v46 }
  0xa1   : > { %1691 = vmatprep.mubr.msk.f32.mxu1 %vm815_vm3, %v797_v47 }
  0xa3   : > { %1642 = vmatmul.mubr.msk.f32.gmra.mrb[22].mxu0 %vm449_vm2, %v432_v48 }
  0xa4   : > { %1692 = vmatmul.mubr.msk.f32.gmra.mrb[22].mxu1 %vm815_vm3, %v798_v49  ;;  %1644 = vmatprep.mubr.msk.f32.mxu0 %vm449_vm2, %v433_v50 }
  0xa5   : > { %1694 = vmatprep.mubr.msk.f32.mxu1 %vm815_vm3, %v799_v51 }
  0xa7   : > { %1645 = vmatmul.mubr.msk.f32.gmra.mrb[24].mxu0 %vm449_vm2, %v434_v52 }
  0xa8   : > { %1695 = vmatmul.mubr.msk.f32.gmra.mrb[24].mxu1 %vm815_vm3, %v800_v53  ;;  %1647 = vmatprep.mubr.msk.f32.mxu0 %vm449_vm2, %v435_v54 }
  0xa9   : > { %1697 = vmatprep.mubr.msk.f32.mxu1 %vm815_vm3, %v801_v55 }
  0xab   : > { %1648 = vmatmul.mubr.msk.f32.gmra.mrb[26].mxu0 %vm449_vm2, %v436_v56 }
  0xac   : > { %1698 = vmatmul.mubr.msk.f32.gmra.mrb[26].mxu1 %vm815_vm3, %v802_v57  ;;  %1650 = vmatprep.mubr.msk.f32.mxu0 %vm449_vm2, %v437_v58 }
  0xad   : > { %1700 = vmatprep.mubr.msk.f32.mxu1 %vm815_vm3, %v803_v59 }
  0xaf   : > { %1651 = vmatmul.mubr.msk.f32.gmra.mrb[28].mxu0 %vm449_vm2, %v438_v60 }
  0xb0   : > { %1701 = vmatmul.mubr.msk.f32.gmra.mrb[28].mxu1 %vm815_vm3, %v804_v61  ;;  %1653 = vmatprep.mubr.msk.f32.mxu0 %vm449_vm2, %v439_v62 }
  0xb1   : > { %1703 = vmatprep.mubr.msk.f32.mxu1 %vm815_vm3, %v805_v63 }
  0xb3   : > { %1654 = vmatmul.mubr.msk.f32.gmra.mrb[30].mxu0 %vm449_vm2, %v440_v0 }
  0xb4   : > { %1704 = vmatmul.mubr.msk.f32.gmra.mrb[30].mxu1 %vm815_vm3, %v806_v1 }
 0x14a   : > { %v1610_v4 = vpop.f32.mrb[0].mxu0 }
 0x14b   : > { %v1660_v5 = vpop.f32.mrb[0].mxu1  ;;  %v622_v6 = vadd.f32 %v1610_v4, %v2222_v2  ;;  %v616_v8 = vpop.f32.mrb[1].mxu0 }
 0x14c   : > { %v988_v7 = vadd.f32 %v1660_v5, %v2224_v3  ;;  %v982_v9 = vpop.f32.mrb[1].mxu1  ;;  %v617_v10 = vadd.f32 %v2222_v2, %v616_v8 }
 0x14d   : > { %v983_v11 = vadd.f32 %v2224_v3, %v982_v9  ;;  %1143 = vst.msk [vmem:[%s2230_s24 + $0x8] sm:$0xff] %vm1141_vm4, %v622_v6 }
 0x14e   : > { %1175 = vst.msk [vmem:[%s2236_s26 + $0x8] sm:$0xff] %vm1141_vm4, %v988_v7  ;;  %v1207_v12 = vmul.f32 %v988_v7, %v622_v6  ;;  %1142 = vst.msk [vmem:[%s2230_s24] sm:$0xff] %vm1141_vm4, %v617_v10  ;;  %v1613_v14 = vpop.f32.mrb[2].mxu0 }
 0x14f   : > { %1174 = vst.msk [vmem:[%s2236_s26] sm:$0xff] %vm1141_vm4, %v983_v11  ;;  %v1206_v13 = vmul.f32 %v983_v11, %v617_v10  ;;  %v1663_v15 = vpop.f32.mrb[2].mxu1  ;;  %v632_v16 = vadd.f32 %v1613_v14, %v2222_v2  ;;  %v626_v18 = vpop.f32.mrb[3].mxu0 }
 0x150   : > { %1239 = vst.msk [vmem:[%s2244_s13 + $0x8] sm:$0xff] %vm1141_vm4, %v1207_v12  ;;  %v998_v17 = vadd.f32 %v1663_v15, %v2224_v3  ;;  %v992_v19 = vpop.f32.mrb[3].mxu1  ;;  %v627_v20 = vadd.f32 %v2222_v2, %v626_v18 }
 0x151   : > { %1238 = vst.msk [vmem:[%s2244_s13] sm:$0xff] %vm1141_vm4, %v1206_v13  ;;  %v993_v21 = vadd.f32 %v2224_v3, %v992_v19  ;;  %1145 = vst.msk [vmem:[%s2230_s24 + $0x18] sm:$0xff] %vm1141_vm4, %v632_v16 }
 0x152   : > { %1177 = vst.msk [vmem:[%s2236_s26 + $0x18] sm:$0xff] %vm1141_vm4, %v998_v17  ;;  %v1209_v22 = vmul.f32 %v998_v17, %v632_v16  ;;  %1144 = vst.msk [vmem:[%s2230_s24 + $0x10] sm:$0xff] %vm1141_vm4, %v627_v20  ;;  %v1616_v24 = vpop.f32.mrb[4].mxu0 }
 0x153   : > { %1176 = vst.msk [vmem:[%s2236_s26 + $0x10] sm:$0xff] %vm1141_vm4, %v993_v21  ;;  %v1208_v23 = vmul.f32 %v993_v21, %v627_v20  ;;  %v1666_v25 = vpop.f32.mrb[4].mxu1  ;;  %v642_v26 = vadd.f32 %v1616_v24, %v2222_v2  ;;  %v636_v28 = vpop.f32.mrb[5].mxu0 }
 0x154   : > { %1241 = vst.msk [vmem:[%s2244_s13 + $0x18] sm:$0xff] %vm1141_vm4, %v1209_v22  ;;  %v1008_v27 = vadd.f32 %v1666_v25, %v2224_v3  ;;  %v1002_v29 = vpop.f32.mrb[5].mxu1  ;;  %v637_v30 = vadd.f32 %v2222_v2, %v636_v28 }
 0x155   : > { %1240 = vst.msk [vmem:[%s2244_s13 + $0x10] sm:$0xff] %vm1141_vm4, %v1208_v23  ;;  %v1003_v31 = vadd.f32 %v2224_v3, %v1002_v29  ;;  %1147 = vst.msk [vmem:[%s2230_s24 + $0x28] sm:$0xff] %vm1141_vm4, %v642_v26 }
 0x156   : > { %1179 = vst.msk [vmem:[%s2236_s26 + $0x28] sm:$0xff] %vm1141_vm4, %v1008_v27  ;;  %v1211_v32 = vmul.f32 %v1008_v27, %v642_v26  ;;  %1146 = vst.msk [vmem:[%s2230_s24 + $0x20] sm:$0xff] %vm1141_vm4, %v637_v30  ;;  %v1619_v34 = vpop.f32.mrb[6].mxu0 }
 0x157   : > { %1178 = vst.msk [vmem:[%s2236_s26 + $0x20] sm:$0xff] %vm1141_vm4, %v1003_v31  ;;  %v1210_v33 = vmul.f32 %v1003_v31, %v637_v30  ;;  %v1669_v35 = vpop.f32.mrb[6].mxu1  ;;  %v652_v36 = vadd.f32 %v1619_v34, %v2222_v2  ;;  %v646_v38 = vpop.f32.mrb[7].mxu0 }
 0x158   : > { %1243 = vst.msk [vmem:[%s2244_s13 + $0x28] sm:$0xff] %vm1141_vm4, %v1211_v32  ;;  %v1018_v37 = vadd.f32 %v1669_v35, %v2224_v3  ;;  %v1012_v39 = vpop.f32.mrb[7].mxu1  ;;  %v647_v40 = vadd.f32 %v2222_v2, %v646_v38 }
 0x159   : > { %1242 = vst.msk [vmem:[%s2244_s13 + $0x20] sm:$0xff] %vm1141_vm4, %v1210_v33  ;;  %v1013_v41 = vadd.f32 %v2224_v3, %v1012_v39  ;;  %1149 = vst.msk [vmem:[%s2230_s24 + $0x38] sm:$0xff] %vm1141_vm4, %v652_v36 }
 0x15a   : > { %1181 = vst.msk [vmem:[%s2236_s26 + $0x38] sm:$0xff] %vm1141_vm4, %v1018_v37  ;;  %v1213_v42 = vmul.f32 %v1018_v37, %v652_v36  ;;  %1148 = vst.msk [vmem:[%s2230_s24 + $0x30] sm:$0xff] %vm1141_vm4, %v647_v40  ;;  %v1622_v44 = vpop.f32.mrb[8].mxu0 }
 0x15b   : > { %1180 = vst.msk [vmem:[%s2236_s26 + $0x30] sm:$0xff] %vm1141_vm4, %v1013_v41  ;;  %v1212_v43 = vmul.f32 %v1013_v41, %v647_v40  ;;  %v1672_v45 = vpop.f32.mrb[8].mxu1  ;;  %v662_v46 = vadd.f32 %v1622_v44, %v2222_v2  ;;  %v656_v48 = vpop.f32.mrb[9].mxu0 }
 0x15c   : > { %1245 = vst.msk [vmem:[%s2244_s13 + $0x38] sm:$0xff] %vm1141_vm4, %v1213_v42  ;;  %v1028_v47 = vadd.f32 %v1672_v45, %v2224_v3  ;;  %v1022_v49 = vpop.f32.mrb[9].mxu1  ;;  %v657_v50 = vadd.f32 %v2222_v2, %v656_v48 }
 0x15d   : > { %1244 = vst.msk [vmem:[%s2244_s13 + $0x30] sm:$0xff] %vm1141_vm4, %v1212_v43  ;;  %v1023_v51 = vadd.f32 %v2224_v3, %v1022_v49  ;;  %1151 = vst.msk [vmem:[%s2230_s24 + $0x48] sm:$0xff] %vm1141_vm4, %v662_v46 }
 0x15e   : > { %1183 = vst.msk [vmem:[%s2236_s26 + $0x48] sm:$0xff] %vm1141_vm4, %v1028_v47  ;;  %v1215_v52 = vmul.f32 %v1028_v47, %v662_v46  ;;  %1150 = vst.msk [vmem:[%s2230_s24 + $0x40] sm:$0xff] %vm1141_vm4, %v657_v50  ;;  %v1625_v54 = vpop.f32.mrb[10].mxu0 }
 0x15f   : > { %1182 = vst.msk [vmem:[%s2236_s26 + $0x40] sm:$0xff] %vm1141_vm4, %v1023_v51  ;;  %v1214_v53 = vmul.f32 %v1023_v51, %v657_v50  ;;  %v1675_v55 = vpop.f32.mrb[10].mxu1  ;;  %v672_v56 = vadd.f32 %v1625_v54, %v2222_v2  ;;  %v666_v58 = vpop.f32.mrb[11].mxu0 }
 0x160   : > { %1247 = vst.msk [vmem:[%s2244_s13 + $0x48] sm:$0xff] %vm1141_vm4, %v1215_v52  ;;  %v1038_v57 = vadd.f32 %v1675_v55, %v2224_v3  ;;  %v1032_v59 = vpop.f32.mrb[11].mxu1  ;;  %v667_v60 = vadd.f32 %v2222_v2, %v666_v58 }
 0x161   : > { %1246 = vst.msk [vmem:[%s2244_s13 + $0x40] sm:$0xff] %vm1141_vm4, %v1214_v53  ;;  %v1033_v61 = vadd.f32 %v2224_v3, %v1032_v59  ;;  %1153 = vst.msk [vmem:[%s2230_s24 + $0x58] sm:$0xff] %vm1141_vm4, %v672_v56 }
 0x162   : > { %1185 = vst.msk [vmem:[%s2236_s26 + $0x58] sm:$0xff] %vm1141_vm4, %v1038_v57  ;;  %v1217_v62 = vmul.f32 %v1038_v57, %v672_v56  ;;  %1152 = vst.msk [vmem:[%s2230_s24 + $0x50] sm:$0xff] %vm1141_vm4, %v667_v60  ;;  %v1628_v0 = vpop.f32.mrb[12].mxu0 }
 0x163   : > { %1184 = vst.msk [vmem:[%s2236_s26 + $0x50] sm:$0xff] %vm1141_vm4, %v1033_v61  ;;  %v1216_v63 = vmul.f32 %v1033_v61, %v667_v60  ;;  %v1678_v1 = vpop.f32.mrb[12].mxu1  ;;  %v682_v4 = vadd.f32 %v1628_v0, %v2222_v2  ;;  %v676_v6 = vpop.f32.mrb[13].mxu0 }
 0x164   : > { %1249 = vst.msk [vmem:[%s2244_s13 + $0x58] sm:$0xff] %vm1141_vm4, %v1217_v62  ;;  %v1048_v5 = vadd.f32 %v1678_v1, %v2224_v3  ;;  %v1042_v7 = vpop.f32.mrb[13].mxu1  ;;  %v677_v8 = vadd.f32 %v2222_v2, %v676_v6 }
 0x165   : > { %1248 = vst.msk [vmem:[%s2244_s13 + $0x50] sm:$0xff] %vm1141_vm4, %v1216_v63  ;;  %v1043_v9 = vadd.f32 %v2224_v3, %v1042_v7  ;;  %1155 = vst.msk [vmem:[%s2230_s24 + $0x68] sm:$0xff] %vm1141_vm4, %v682_v4 }
 0x166   : > { %1187 = vst.msk [vmem:[%s2236_s26 + $0x68] sm:$0xff] %vm1141_vm4, %v1048_v5  ;;  %v1219_v10 = vmul.f32 %v1048_v5, %v682_v4  ;;  %1154 = vst.msk [vmem:[%s2230_s24 + $0x60] sm:$0xff] %vm1141_vm4, %v677_v8  ;;  %v1631_v12 = vpop.f32.mrb[14].mxu0 }
 0x167   : > { %1186 = vst.msk [vmem:[%s2236_s26 + $0x60] sm:$0xff] %vm1141_vm4, %v1043_v9  ;;  %v1218_v11 = vmul.f32 %v1043_v9, %v677_v8  ;;  %v1681_v13 = vpop.f32.mrb[14].mxu1  ;;  %v692_v14 = vadd.f32 %v1631_v12, %v2222_v2  ;;  %v686_v16 = vpop.f32.mrb[15].mxu0 }
 0x168   : > { %1251 = vst.msk [vmem:[%s2244_s13 + $0x68] sm:$0xff] %vm1141_vm4, %v1219_v10  ;;  %v1058_v15 = vadd.f32 %v1681_v13, %v2224_v3  ;;  %v1052_v17 = vpop.f32.mrb[15].mxu1  ;;  %v687_v18 = vadd.f32 %v2222_v2, %v686_v16 }
 0x169   : > { %1250 = vst.msk [vmem:[%s2244_s13 + $0x60] sm:$0xff] %vm1141_vm4, %v1218_v11  ;;  %v1053_v19 = vadd.f32 %v2224_v3, %v1052_v17  ;;  %1157 = vst.msk [vmem:[%s2230_s24 + $0x78] sm:$0xff] %vm1141_vm4, %v692_v14 }
 0x16a   : > { %1189 = vst.msk [vmem:[%s2236_s26 + $0x78] sm:$0xff] %vm1141_vm4, %v1058_v15  ;;  %v1221_v20 = vmul.f32 %v1058_v15, %v692_v14  ;;  %1156 = vst.msk [vmem:[%s2230_s24 + $0x70] sm:$0xff] %vm1141_vm4, %v687_v18  ;;  %v1634_v22 = vpop.f32.mrb[16].mxu0 }
 0x16b   : > { %1188 = vst.msk [vmem:[%s2236_s26 + $0x70] sm:$0xff] %vm1141_vm4, %v1053_v19  ;;  %v1220_v21 = vmul.f32 %v1053_v19, %v687_v18  ;;  %v1684_v23 = vpop.f32.mrb[16].mxu1  ;;  %v702_v24 = vadd.f32 %v1634_v22, %v2222_v2  ;;  %v696_v26 = vpop.f32.mrb[17].mxu0 }
 0x16c   : > { %1253 = vst.msk [vmem:[%s2244_s13 + $0x78] sm:$0xff] %vm1141_vm4, %v1221_v20  ;;  %v1068_v25 = vadd.f32 %v1684_v23, %v2224_v3  ;;  %v1062_v27 = vpop.f32.mrb[17].mxu1  ;;  %v697_v28 = vadd.f32 %v2222_v2, %v696_v26 }
 0x16d   : > { %1252 = vst.msk [vmem:[%s2244_s13 + $0x70] sm:$0xff] %vm1141_vm4, %v1220_v21  ;;  %v1063_v29 = vadd.f32 %v2224_v3, %v1062_v27  ;;  %1159 = vst.msk [vmem:[%s2230_s24 + $0x88] sm:$0xff] %vm1141_vm4, %v702_v24 }
 0x16e   : > { %1191 = vst.msk [vmem:[%s2236_s26 + $0x88] sm:$0xff] %vm1141_vm4, %v1068_v25  ;;  %v1223_v30 = vmul.f32 %v1068_v25, %v702_v24  ;;  %1158 = vst.msk [vmem:[%s2230_s24 + $0x80] sm:$0xff] %vm1141_vm4, %v697_v28  ;;  %v1637_v32 = vpop.f32.mrb[18].mxu0 }
 0x16f   : > { %1190 = vst.msk [vmem:[%s2236_s26 + $0x80] sm:$0xff] %vm1141_vm4, %v1063_v29  ;;  %v1222_v31 = vmul.f32 %v1063_v29, %v697_v28  ;;  %v1687_v33 = vpop.f32.mrb[18].mxu1  ;;  %v712_v34 = vadd.f32 %v1637_v32, %v2222_v2  ;;  %v706_v36 = vpop.f32.mrb[19].mxu0 }
 0x170   : > { %1255 = vst.msk [vmem:[%s2244_s13 + $0x88] sm:$0xff] %vm1141_vm4, %v1223_v30  ;;  %v1078_v35 = vadd.f32 %v1687_v33, %v2224_v3  ;;  %v1072_v37 = vpop.f32.mrb[19].mxu1  ;;  %v707_v38 = vadd.f32 %v2222_v2, %v706_v36 }
 0x171   : > { %1254 = vst.msk [vmem:[%s2244_s13 + $0x80] sm:$0xff] %vm1141_vm4, %v1222_v31  ;;  %v1073_v39 = vadd.f32 %v2224_v3, %v1072_v37  ;;  %1161 = vst.msk [vmem:[%s2230_s24 + $0x98] sm:$0xff] %vm1141_vm4, %v712_v34 }
 0x172   : > { %1193 = vst.msk [vmem:[%s2236_s26 + $0x98] sm:$0xff] %vm1141_vm4, %v1078_v35  ;;  %v1225_v40 = vmul.f32 %v1078_v35, %v712_v34  ;;  %1160 = vst.msk [vmem:[%s2230_s24 + $0x90] sm:$0xff] %vm1141_vm4, %v707_v38  ;;  %v1640_v42 = vpop.f32.mrb[20].mxu0 }
 0x173   : > { %1192 = vst.msk [vmem:[%s2236_s26 + $0x90] sm:$0xff] %vm1141_vm4, %v1073_v39  ;;  %v1224_v41 = vmul.f32 %v1073_v39, %v707_v38  ;;  %v1690_v43 = vpop.f32.mrb[20].mxu1  ;;  %v722_v44 = vadd.f32 %v1640_v42, %v2222_v2  ;;  %v716_v46 = vpop.f32.mrb[21].mxu0 }
 0x174   : > { %1257 = vst.msk [vmem:[%s2244_s13 + $0x98] sm:$0xff] %vm1141_vm4, %v1225_v40  ;;  %v1088_v45 = vadd.f32 %v1690_v43, %v2224_v3  ;;  %v1082_v47 = vpop.f32.mrb[21].mxu1  ;;  %v717_v48 = vadd.f32 %v2222_v2, %v716_v46 }
 0x175   : > { %1256 = vst.msk [vmem:[%s2244_s13 + $0x90] sm:$0xff] %vm1141_vm4, %v1224_v41  ;;  %v1083_v49 = vadd.f32 %v2224_v3, %v1082_v47  ;;  %1163 = vst.msk [vmem:[%s2230_s24 + $0xa8] sm:$0xff] %vm1141_vm4, %v722_v44 }
 0x176   : > { %1195 = vst.msk [vmem:[%s2236_s26 + $0xa8] sm:$0xff] %vm1141_vm4, %v1088_v45  ;;  %v1227_v50 = vmul.f32 %v1088_v45, %v722_v44  ;;  %1162 = vst.msk [vmem:[%s2230_s24 + $0xa0] sm:$0xff] %vm1141_vm4, %v717_v48  ;;  %v1643_v52 = vpop.f32.mrb[22].mxu0 }
 0x177   : > { %1194 = vst.msk [vmem:[%s2236_s26 + $0xa0] sm:$0xff] %vm1141_vm4, %v1083_v49  ;;  %v1226_v51 = vmul.f32 %v1083_v49, %v717_v48  ;;  %v1693_v53 = vpop.f32.mrb[22].mxu1  ;;  %v732_v54 = vadd.f32 %v1643_v52, %v2222_v2  ;;  %v726_v56 = vpop.f32.mrb[23].mxu0 }
 0x178   : > { %1259 = vst.msk [vmem:[%s2244_s13 + $0xa8] sm:$0xff] %vm1141_vm4, %v1227_v50  ;;  %v1098_v55 = vadd.f32 %v1693_v53, %v2224_v3  ;;  %v1092_v57 = vpop.f32.mrb[23].mxu1  ;;  %v727_v58 = vadd.f32 %v2222_v2, %v726_v56 }
 0x179   : > { %1258 = vst.msk [vmem:[%s2244_s13 + $0xa0] sm:$0xff] %vm1141_vm4, %v1226_v51  ;;  %v1093_v59 = vadd.f32 %v2224_v3, %v1092_v57  ;;  %1165 = vst.msk [vmem:[%s2230_s24 + $0xb8] sm:$0xff] %vm1141_vm4, %v732_v54 }
 0x17a   : > { %1197 = vst.msk [vmem:[%s2236_s26 + $0xb8] sm:$0xff] %vm1141_vm4, %v1098_v55  ;;  %v1229_v60 = vmul.f32 %v1098_v55, %v732_v54  ;;  %1164 = vst.msk [vmem:[%s2230_s24 + $0xb0] sm:$0xff] %vm1141_vm4, %v727_v58  ;;  %v1646_v62 = vpop.f32.mrb[24].mxu0 }
 0x17b   : > { %1196 = vst.msk [vmem:[%s2236_s26 + $0xb0] sm:$0xff] %vm1141_vm4, %v1093_v59  ;;  %v1228_v61 = vmul.f32 %v1093_v59, %v727_v58  ;;  %v1696_v63 = vpop.f32.mrb[24].mxu1  ;;  %v742_v0 = vadd.f32 %v1646_v62, %v2222_v2  ;;  %v736_v4 = vpop.f32.mrb[25].mxu0 }
 0x17c   : > { %1261 = vst.msk [vmem:[%s2244_s13 + $0xb8] sm:$0xff] %vm1141_vm4, %v1229_v60  ;;  %v1108_v1 = vadd.f32 %v1696_v63, %v2224_v3  ;;  %v1102_v5 = vpop.f32.mrb[25].mxu1  ;;  %v737_v6 = vadd.f32 %v2222_v2, %v736_v4 }
 0x17d   : > { %1260 = vst.msk [vmem:[%s2244_s13 + $0xb0] sm:$0xff] %vm1141_vm4, %v1228_v61  ;;  %v1103_v7 = vadd.f32 %v2224_v3, %v1102_v5  ;;  %1167 = vst.msk [vmem:[%s2230_s24 + $0xc8] sm:$0xff] %vm1141_vm4, %v742_v0 }
 0x17e   : > { %1199 = vst.msk [vmem:[%s2236_s26 + $0xc8] sm:$0xff] %vm1141_vm4, %v1108_v1  ;;  %v1231_v8 = vmul.f32 %v1108_v1, %v742_v0  ;;  %1166 = vst.msk [vmem:[%s2230_s24 + $0xc0] sm:$0xff] %vm1141_vm4, %v737_v6  ;;  %v1649_v10 = vpop.f32.mrb[26].mxu0 }
 0x17f   : > { %1198 = vst.msk [vmem:[%s2236_s26 + $0xc0] sm:$0xff] %vm1141_vm4, %v1103_v7  ;;  %v1230_v9 = vmul.f32 %v1103_v7, %v737_v6  ;;  %v1699_v11 = vpop.f32.mrb[26].mxu1  ;;  %v752_v12 = vadd.f32 %v1649_v10, %v2222_v2  ;;  %v746_v14 = vpop.f32.mrb[27].mxu0 }
 0x180   : > { %1263 = vst.msk [vmem:[%s2244_s13 + $0xc8] sm:$0xff] %vm1141_vm4, %v1231_v8  ;;  %v1118_v13 = vadd.f32 %v1699_v11, %v2224_v3  ;;  %v1112_v15 = vpop.f32.mrb[27].mxu1  ;;  %v747_v16 = vadd.f32 %v2222_v2, %v746_v14 }
 0x181   : > { %1262 = vst.msk [vmem:[%s2244_s13 + $0xc0] sm:$0xff] %vm1141_vm4, %v1230_v9  ;;  %v1113_v17 = vadd.f32 %v2224_v3, %v1112_v15  ;;  %1169 = vst.msk [vmem:[%s2230_s24 + $0xd8] sm:$0xff] %vm1141_vm4, %v752_v12 }
 0x182   : > { %1201 = vst.msk [vmem:[%s2236_s26 + $0xd8] sm:$0xff] %vm1141_vm4, %v1118_v13  ;;  %v1233_v18 = vmul.f32 %v1118_v13, %v752_v12  ;;  %1168 = vst.msk [vmem:[%s2230_s24 + $0xd0] sm:$0xff] %vm1141_vm4, %v747_v16  ;;  %v1652_v20 = vpop.f32.mrb[28].mxu0 }
 0x183   : > { %1200 = vst.msk [vmem:[%s2236_s26 + $0xd0] sm:$0xff] %vm1141_vm4, %v1113_v17  ;;  %v1232_v19 = vmul.f32 %v1113_v17, %v747_v16  ;;  %v1702_v21 = vpop.f32.mrb[28].mxu1  ;;  %v762_v22 = vadd.f32 %v1652_v20, %v2222_v2  ;;  %v756_v24 = vpop.f32.mrb[29].mxu0 }
 0x184   : > { %1265 = vst.msk [vmem:[%s2244_s13 + $0xd8] sm:$0xff] %vm1141_vm4, %v1233_v18  ;;  %v1128_v23 = vadd.f32 %v1702_v21, %v2224_v3  ;;  %v1122_v25 = vpop.f32.mrb[29].mxu1  ;;  %v757_v26 = vadd.f32 %v2222_v2, %v756_v24 }
 0x185   : > { %1264 = vst.msk [vmem:[%s2244_s13 + $0xd0] sm:$0xff] %vm1141_vm4, %v1232_v19  ;;  %v1123_v27 = vadd.f32 %v2224_v3, %v1122_v25  ;;  %1171 = vst.msk [vmem:[%s2230_s24 + $0xe8] sm:$0xff] %vm1141_vm4, %v762_v22 }
 0x186   : > { %1203 = vst.msk [vmem:[%s2236_s26 + $0xe8] sm:$0xff] %vm1141_vm4, %v1128_v23  ;;  %v1235_v28 = vmul.f32 %v1128_v23, %v762_v22  ;;  %1170 = vst.msk [vmem:[%s2230_s24 + $0xe0] sm:$0xff] %vm1141_vm4, %v757_v26  ;;  %v1655_v30 = vpop.f32.mrb[30].mxu0 }
 0x187   : > { %1202 = vst.msk [vmem:[%s2236_s26 + $0xe0] sm:$0xff] %vm1141_vm4, %v1123_v27  ;;  %v1234_v29 = vmul.f32 %v1123_v27, %v757_v26  ;;  %v1705_v31 = vpop.f32.mrb[30].mxu1  ;;  %v772_v32 = vadd.f32 %v1655_v30, %v2222_v2  ;;  %v766_v34 = vpop.f32.mrb[31].mxu0 }
 0x188   : > { %1267 = vst.msk [vmem:[%s2244_s13 + $0xe8] sm:$0xff] %vm1141_vm4, %v1235_v28  ;;  %v1138_v33 = vadd.f32 %v1705_v31, %v2224_v3  ;;  %v1132_v35 = vpop.f32.mrb[31].mxu1  ;;  %v767_v36 = vadd.f32 %v2222_v2, %v766_v34 }
 0x189   : > { %1266 = vst.msk [vmem:[%s2244_s13 + $0xe0] sm:$0xff] %vm1141_vm4, %v1234_v29  ;;  %v1133_v37 = vadd.f32 %v2224_v3, %v1132_v35  ;;  %1173 = vst.msk [vmem:[%s2230_s24 + $0xf8] sm:$0xff] %vm1141_vm4, %v772_v32 }
 0x18a   : > { %1205 = vst.msk [vmem:[%s2236_s26 + $0xf8] sm:$0xff] %vm1141_vm4, %v1138_v33  ;;  %v1237_v38 = vmul.f32 %v1138_v33, %v772_v32  ;;  %1172 = vst.msk [vmem:[%s2230_s24 + $0xf0] sm:$0xff] %vm1141_vm4, %v767_v36 }
 0x18b   : > { %1204 = vst.msk [vmem:[%s2236_s26 + $0xf0] sm:$0xff] %vm1141_vm4, %v1133_v37  ;;  %v1236_v39 = vmul.f32 %v1133_v37, %v767_v36 }
 0x18c   : > { %1269 = vst.msk [vmem:[%s2244_s13 + $0xf8] sm:$0xff] %vm1141_vm4, %v1237_v38 }
 0x18d   : > { %1268 = vst.msk [vmem:[%s2244_s13 + $0xf0] sm:$0xff] %vm1141_vm4, %v1236_v39 }
 0x18e PF: > { %s22_s27 = sadd.s32 1, %s1885_s27  }
 0x18f   : > { %p19_p8 = scmp.ge.s32.totalorder %s22_s27, 4  }
 0x191   :  { %21 = sbr.rel (!%p19_p8) target bundleno = 3 (0x3), region = 118 }
 0x198   :  { %1326 = vsyncpa [#allocation3], 1 }
 0x199   :  { %1328 = vsyncpa [#allocation3 + $0x1], 1 }
 0x19a   :  { %1329 = vsyncpa [#allocation5], 1 }
 0x19b   :  { %1330 = vsyncpa [#allocation8], 1 }

// kernel: fno2d_forward.11
= control target key start
LH: loop header
LB: loop body
LE: loop exit
PB: predicated region body
PF: predicated region fallthrough
CT: control target
= control target key end

     0   :  { %s3792_s18 = smov 0   ;;  %s4262_s0 = inlined_call_operand.vmem [shape: f32[10,2,128], index: 0, kind: input, shape index: {}]   ;;  %s4263_s1 = inlined_call_operand.vmem [shape: f32[10,2,128], index: 1, kind: input, shape index: {}]   ;;  %s4264_s2 = inlined_call_operand.vmem [shape: f32[10,128,128], index: 2, kind: input, shape index: {}]   ;;  %s4265_s3 = inlined_call_operand.vmem [shape: f32[10,128,128], index: 3, kind: input, shape index: {}]   ;;  %s4266_s4 = inlined_call_operand.vmem [shape: f32[10,2,128], index: 4, kind: output, shape index: {0}]   ;;  %s4267_s5 = inlined_call_operand.vmem [shape: f32[10,2,128], index: 5, kind: output, shape index: {1}]  }
   0x1 LB: > { %s2049_s19 = sadd.s32 4294967295, %s3757_s18   ;;  %p2053_p0 = scmp.ge.s32.totalorder %s3757_s18, 1  ;;  %s3757_s18 = sphi %s3792_s18, %s16_s18  }
   0x2   : > { %p226_p1 = scmp.lt.s32.totalorder %s3757_s18, 3 }
   0x4   : > { %p227_p2 = pnand %p2053_p0, %p226_p1 }
   0x5   : > { %s276_s20 = smul.u32 (!%p227_p2), 5, %s2049_s19  ;;  %v3759_v0 = vmov (!%p227_p2), 0.0|0.0   ;;  %vm3760_vm0 = vmmov (!%p227_p2), 0   ;;  %v3761_v1 = vmov (!%p227_p2), 0.0  }
   0x6   : > { %230 = sbr.rel (%p227_p2) target bundleno = 553 (0x229), region = 36  ;;  %3250 = vmatprep.subr.bf16.mxu1 (!%p227_p2), %v3759_v0  ;;  %3298 = vmatprep.subr.bf16.mxu0 (!%p227_p2), %v3759_v0 }
   0x7   : > { %p277_p3 = scmp.lt.s32.totalorder (!%p227_p2), %s276_s20, 9  ;;  %2582 = vmatprep.mubr.msk.f32.mxu1 (!%p227_p2), %vm3760_vm0, %v3761_v1  ;;  %2652 = vmatprep.mubr.msk.f32.mxu0 (!%p227_p2), %vm3760_vm0, %v3761_v1 }
   0xd   : > { %s4269_s20 = smov (!%p277_p3, %s276_s20), 9 }
   0xe   : > { %s2208_s21 = sshll.u32 %s4269_s20, 7  ;;  %s3852_s28 = sshll.u32 %s4269_s20, 1 }
   0xf   : > { %s3814_s24 = scalar_lea.vmem %s4264_s2, %s2208_s21  ;;  %s3849_s27 = scalar_lea.vmem %s4265_s3, %s2208_s21 }
  0x10   : > { %v316_v2 = vld [vmem:[%s3814_s24] sm:$0xff]  ;;  %v317_v3 = vld [vmem:[%s3814_s24 + $0x8] sm:$0xff]  ;;  %v318_v4 = vld [vmem:[%s3814_s24 + $0x10] sm:$0xff]  ;;  %s3860_s6 = scalar_lea.vmem %s4262_s0, %s3852_s28  ;;  %s3868_s9 = scalar_lea.vmem %s4263_s1, %s3852_s28 }
  0x11   : > { %v3251_v5 = vpack.c.bf16 %v317_v3, %v316_v2  ;;  %v319_v6 = vld [vmem:[%s3814_s24 + $0x18] sm:$0xff]  ;;  %v320_v8 = vld [vmem:[%s3814_s24 + $0x20] sm:$0xff]  ;;  %v321_v9 = vld [vmem:[%s3814_s24 + $0x28] sm:$0xff]  ;;  %s4192_s12 = scalar_lea.vmem %s4267_s5, %s3852_s28  ;;  %s4202_s15 = scalar_lea.vmem %s4266_s4, %s3852_s28 }
  0x12   : > { %v3254_v7 = vpack.c.bf16 %v319_v6, %v318_v4  ;;  %v3257_v10 = vpack.c.bf16 %v321_v9, %v320_v8  ;;  %v322_v11 = vld [vmem:[%s3814_s24 + $0x30] sm:$0xff]  ;;  %v323_v12 = vld [vmem:[%s3814_s24 + $0x38] sm:$0xff]  ;;  %v324_v14 = vld [vmem:[%s3814_s24 + $0x40] sm:$0xff] }
  0x13   : > { %3252 = vmatpush3.bf16.msra.mxu1 %v3251_v5  ;;  %3300 = vmatpush3.bf16.msra.mxu0 %v3251_v5  ;;  %v3260_v13 = vpack.c.bf16 %v323_v12, %v322_v11  ;;  %v325_v15 = vld [vmem:[%s3814_s24 + $0x48] sm:$0xff]  ;;  %v326_v17 = vld [vmem:[%s3814_s24 + $0x50] sm:$0xff]  ;;  %v327_v18 = vld [vmem:[%s3814_s24 + $0x58] sm:$0xff] }
  0x14   : > { %3253 = vmatprep.subr.bf16.mxu1 %v3759_v0  ;;  %3301 = vmatprep.subr.bf16.mxu0 %v3759_v0  ;;  %v3263_v16 = vpack.c.bf16 %v325_v15, %v324_v14  ;;  %v3266_v19 = vpack.c.bf16 %v327_v18, %v326_v17  ;;  %v328_v20 = vld [vmem:[%s3814_s24 + $0x60] sm:$0xff]  ;;  %v329_v21 = vld [vmem:[%s3814_s24 + $0x68] sm:$0xff]  ;;  %v330_v23 = vld [vmem:[%s3814_s24 + $0x70] sm:$0xff] }
  0x15   : > { %v3269_v22 = vpack.c.bf16 %v329_v21, %v328_v20  ;;  %v331_v24 = vld [vmem:[%s3814_s24 + $0x78] sm:$0xff]  ;;  %v332_v26 = vld [vmem:[%s3849_s27] sm:$0xff]  ;;  %v333_v27 = vld [vmem:[%s3849_s27 + $0x8] sm:$0xff] }
  0x16   : > { %v3272_v25 = vpack.c.bf16 %v331_v24, %v330_v23  ;;  %v3871_v28 = vld [vmem:[%s3860_s6] sm:$0x3]  ;;  %v3275_v29 = vpack.c.bf16 %v333_v27, %v332_v26  ;;  %v334_v31 = vld [vmem:[%s3849_s27 + $0x10] sm:$0xff]  ;;  %v335_v32 = vld [vmem:[%s3849_s27 + $0x18] sm:$0xff] }
  0x17   : > { %3255 = vmatpush3.bf16.msra.mxu1 %v3254_v7  ;;  %3303 = vmatpush3.bf16.msra.mxu0 %v3254_v7  ;;  %v3874_v30 = vld [vmem:[%s3868_s9] sm:$0x3]  ;;  %v3278_v33 = vpack.c.bf16 %v335_v32, %v334_v31  ;;  %v337_v35 = vld [vmem:[%s3849_s27 + $0x28] sm:$0xff]  ;;  %v338_v37 = vld [vmem:[%s3849_s27 + $0x30] sm:$0xff] }
  0x18   : > { %3256 = vmatprep.subr.bf16.mxu1 %v3759_v0  ;;  %3304 = vmatprep.subr.bf16.mxu0 %v3759_v0  ;;  %v336_v34 = vld [vmem:[%s3849_s27 + $0x20] sm:$0xff]  ;;  %v339_v38 = vld [vmem:[%s3849_s27 + $0x38] sm:$0xff]  ;;  %v341_v41 = vld [vmem:[%s3849_s27 + $0x48] sm:$0xff] }
  0x19   : > { %v3281_v36 = vpack.c.bf16 %v337_v35, %v336_v34  ;;  %v3284_v39 = vpack.c.bf16 %v339_v38, %v338_v37  ;;  %v340_v40 = vld [vmem:[%s3849_s27 + $0x40] sm:$0xff]  ;;  %v342_v43 = vld [vmem:[%s3849_s27 + $0x50] sm:$0xff]  ;;  %v343_v44 = vld [vmem:[%s3849_s27 + $0x58] sm:$0xff] }
  0x1a   : > { %v3287_v42 = vpack.c.bf16 %v341_v41, %v340_v40  ;;  %v3290_v45 = vpack.c.bf16 %v343_v44, %v342_v43  ;;  %v344_v46 = vld [vmem:[%s3849_s27 + $0x60] sm:$0xff]  ;;  %v345_v47 = vld [vmem:[%s3849_s27 + $0x68] sm:$0xff]  ;;  %v346_v49 = vld [vmem:[%s3849_s27 + $0x70] sm:$0xff] }
  0x1b   : > { %3258 = vmatpush3.bf16.msra.mxu1 %v3257_v10  ;;  %3306 = vmatpush3.bf16.msra.mxu0 %v3257_v10  ;;  %v3293_v48 = vpack.c.bf16 %v345_v47, %v344_v46  ;;  %v347_v50 = vld [vmem:[%s3849_s27 + $0x78] sm:$0xff]  ;;  %v2064_v52 = vld [vmem:[%s3814_s24 + $0x80] sm:$0xff]  ;;  %v2065_v53 = vld [vmem:[%s3814_s24 + $0x88] sm:$0xff] }
  0x1c   : > { %3259 = vmatprep.subr.bf16.mxu1 %v3759_v0  ;;  %3307 = vmatprep.subr.bf16.mxu0 %v3759_v0  ;;  %v3296_v51 = vpack.c.bf16 %v347_v50, %v346_v49  ;;  %v3347_v54 = vpack.c.bf16 %v2065_v53, %v2064_v52  ;;  %v2066_v55 = vld [vmem:[%s3814_s24 + $0x90] sm:$0xff]  ;;  %v2067_v56 = vld [vmem:[%s3814_s24 + $0x98] sm:$0xff]  ;;  %v2068_v58 = vld [vmem:[%s3814_s24 + $0xa0] sm:$0xff] }
  0x1d   : > { %v3350_v57 = vpack.c.bf16 %v2067_v56, %v2066_v55  ;;  %v2069_v59 = vld [vmem:[%s3814_s24 + $0xa8] sm:$0xff]  ;;  %v2070_v61 = vld [vmem:[%s3814_s24 + $0xb0] sm:$0xff]  ;;  %v2071_v62 = vld [vmem:[%s3814_s24 + $0xb8] sm:$0xff] }
  0x1e   : > { %v3353_v60 = vpack.c.bf16 %v2069_v59, %v2068_v58  ;;  %v3356_v63 = vpack.c.bf16 %v2071_v62, %v2070_v61  ;;  %v2072_v2 = vld [vmem:[%s3814_s24 + $0xc0] sm:$0xff]  ;;  %v2073_v3 = vld [vmem:[%s3814_s24 + $0xc8] sm:$0xff]  ;;  %v2074_v5 = vld [vmem:[%s3814_s24 + $0xd0] sm:$0xff] }
  0x1f   : > { %3261 = vmatpush3.bf16.msra.mxu1 %v3260_v13  ;;  %3309 = vmatpush3.bf16.msra.mxu0 %v3260_v13  ;;  %v3359_v4 = vpack.c.bf16 %v2073_v3, %v2072_v2  ;;  %v2075_v6 = vld [vmem:[%s3814_s24 + $0xd8] sm:$0xff]  ;;  %v2076_v8 = vld [vmem:[%s3814_s24 + $0xe0] sm:$0xff]  ;;  %v2077_v9 = vld [vmem:[%s3814_s24 + $0xe8] sm:$0xff] }
  0x20   : > { %3262 = vmatprep.subr.bf16.mxu1 %v3759_v0  ;;  %3310 = vmatprep.subr.bf16.mxu0 %v3759_v0  ;;  %v3362_v7 = vpack.c.bf16 %v2075_v6, %v2074_v5  ;;  %v3365_v10 = vpack.c.bf16 %v2077_v9, %v2076_v8  ;;  %v2078_v11 = vld [vmem:[%s3814_s24 + $0xf0] sm:$0xff]  ;;  %v2079_v12 = vld [vmem:[%s3814_s24 + $0xf8] sm:$0xff]  ;;  %v2080_v14 = vld [vmem:[%s3849_s27 + $0x80] sm:$0xff] }
  0x21   : > { %v3368_v13 = vpack.c.bf16 %v2079_v12, %v2078_v11  ;;  %v2081_v15 = vld [vmem:[%s3849_s27 + $0x88] sm:$0xff]  ;;  %v3956_v18 = vld [vmem:[%s3868_s9 + $0x2] sm:$0x3]  ;;  %v2083_v20 = vld [vmem:[%s3849_s27 + $0x98] sm:$0xff] }
  0x22   : > { %v3371_v17 = vpack.c.bf16 %v2081_v15, %v2080_v14  ;;  %v2085_v23 = vld [vmem:[%s3849_s27 + $0xa8] sm:$0xff]  ;;  %v2087_v26 = vld [vmem:[%s3849_s27 + $0xb8] sm:$0xff]  ;;  %v2090_v31 = vld [vmem:[%s3849_s27 + $0xd0] sm:$0xff] }
  0x23   : > { %3264 = vmatpush3.bf16.msra.mxu1 %v3263_v16  ;;  %3312 = vmatpush3.bf16.msra.mxu0 %v3263_v16  ;;  %v3953_v16 = vld [vmem:[%s3860_s6 + $0x2] sm:$0x3]  ;;  %v2091_v32 = vld [vmem:[%s3849_s27 + $0xd8] sm:$0xff]  ;;  %v2093_v35 = vld [vmem:[%s3849_s27 + $0xe8] sm:$0xff] }
  0x24   : > { %3265 = vmatprep.subr.bf16.mxu1 %v3759_v0  ;;  %3313 = vmatprep.subr.bf16.mxu0 %v3759_v0  ;;  %v2092_v34 = vld [vmem:[%s3849_s27 + $0xe0] sm:$0xff]  ;;  %v2094_v37 = vld [vmem:[%s3849_s27 + $0xf0] sm:$0xff]  ;;  %v2095_v38 = vld [vmem:[%s3849_s27 + $0xf8] sm:$0xff] }
  0x25   : > { %v2100_v40 = vld [vmem:[%s3814_s24 + $0x100] sm:$0xff]  ;;  %v2101_v41 = vld [vmem:[%s3814_s24 + $0x108] sm:$0xff]  ;;  %v2102_v43 = vld [vmem:[%s3814_s24 + $0x110] sm:$0xff] }
  0x26   : > { %v2103_v44 = vld [vmem:[%s3814_s24 + $0x118] sm:$0xff]  ;;  %v2104_v46 = vld [vmem:[%s3814_s24 + $0x120] sm:$0xff]  ;;  %v2105_v47 = vld [vmem:[%s3814_s24 + $0x128] sm:$0xff] }
  0x27   : > { %3267 = vmatpush3.bf16.msra.mxu1 %v3266_v19  ;;  %3315 = vmatpush3.bf16.msra.mxu0 %v3266_v19  ;;  %v2082_v19 = vld [vmem:[%s3849_s27 + $0x90] sm:$0xff]  ;;  %v2107_v50 = vld [vmem:[%s3814_s24 + $0x138] sm:$0xff]  ;;  %v2108_v52 = vld [vmem:[%s3814_s24 + $0x140] sm:$0xff] }
  0x28   : > { %3268 = vmatprep.subr.bf16.mxu1 %v3759_v0  ;;  %3316 = vmatprep.subr.bf16.mxu0 %v3759_v0  ;;  %v3374_v21 = vpack.c.bf16 %v2083_v20, %v2082_v19  ;;  %v2106_v49 = vld [vmem:[%s3814_s24 + $0x130] sm:$0xff]  ;;  %v2109_v53 = vld [vmem:[%s3814_s24 + $0x148] sm:$0xff]  ;;  %v2111_v56 = vld [vmem:[%s3814_s24 + $0x158] sm:$0xff] }
  0x29   : > { %v2110_v55 = vld [vmem:[%s3814_s24 + $0x150] sm:$0xff]  ;;  %v2112_v58 = vld [vmem:[%s3814_s24 + $0x160] sm:$0xff]  ;;  %v2113_v59 = vld [vmem:[%s3814_s24 + $0x168] sm:$0xff] }
  0x2a   : > { %v2114_v61 = vld [vmem:[%s3814_s24 + $0x170] sm:$0xff]  ;;  %v2115_v62 = vld [vmem:[%s3814_s24 + $0x178] sm:$0xff]  ;;  %v2116_v2 = vld [vmem:[%s3849_s27 + $0x100] sm:$0xff] }
  0x2b   : > { %3270 = vmatpush3.bf16.msra.mxu1 %v3269_v22  ;;  %3318 = vmatpush3.bf16.msra.mxu0 %v3269_v22  ;;  %v2084_v22 = vld [vmem:[%s3849_s27 + $0xa0] sm:$0xff]  ;;  %v2117_v3 = vld [vmem:[%s3849_s27 + $0x108] sm:$0xff]  ;;  %v2119_v8 = vld [vmem:[%s3849_s27 + $0x118] sm:$0xff] }
  0x2c   : > { %3271 = vmatprep.subr.bf16.mxu1 %v3759_v0  ;;  %3319 = vmatprep.subr.bf16.mxu0 %v3759_v0  ;;  %v3377_v24 = vpack.c.bf16 %v2085_v23, %v2084_v22  ;;  %v3467_v5 = vpack.c.bf16 %v2117_v3, %v2116_v2  ;;  %v4038_v6 = vld [vmem:[%s3868_s9 + $0x4] sm:$0x3]  ;;  %v2121_v11 = vld [vmem:[%s3849_s27 + $0x128] sm:$0xff]  ;;  %v2123_v14 = vld [vmem:[%s3849_s27 + $0x138] sm:$0xff] }
  0x2d   : > { %v2126_v19 = vld [vmem:[%s3849_s27 + $0x150] sm:$0xff]  ;;  %v2127_v20 = vld [vmem:[%s3849_s27 + $0x158] sm:$0xff]  ;;  %v2128_v22 = vld [vmem:[%s3849_s27 + $0x160] sm:$0xff] }
  0x2e   : > { %v2129_v23 = vld [vmem:[%s3849_s27 + $0x168] sm:$0xff]  ;;  %v2159_v2 = vld [vmem:[%s3849_s27 + $0x1b8] sm:$0xff] }
  0x2f   : > { %3273 = vmatpush3.bf16.msra.mxu1 %v3272_v25  ;;  %3321 = vmatpush3.bf16.msra.mxu0 %v3272_v25  ;;  %v2086_v25 = vld [vmem:[%s3849_s27 + $0xb0] sm:$0xff] }
  0x30   : > { %3274 = vmatprep.subr.bf16.mxu1 %v3759_v0  ;;  %3322 = vmatprep.subr.bf16.mxu0 %v3759_v0  ;;  %v3380_v27 = vpack.c.bf16 %v2087_v26, %v2086_v25  ;;  %v2130_v25 = vld [vmem:[%s3849_s27 + $0x170] sm:$0xff]  ;;  %v2131_v26 = vld [vmem:[%s3849_s27 + $0x178] sm:$0xff] }
  0x32   : > { %2583 = vmatmul.mubr.f32.vlgmr.msra.gmra.mrb[0].mxu1 %v3871_v28  ;;  %2653 = vmatmul.mubr.f32.vlgmr.msra.gmra.mrb[0].mxu0 %v3874_v30 }
  0x33   : > { %3276 = vmatpush3.bf16.msra.mxu1 %v3275_v29  ;;  %3324 = vmatpush3.bf16.msra.mxu0 %v3275_v29  ;;  %v2089_v29 = vld [vmem:[%s3849_s27 + $0xc8] sm:$0xff] }
  0x34   : > { %3277 = vmatprep.subr.bf16.mxu1 %v3759_v0  ;;  %3325 = vmatprep.subr.bf16.mxu0 %v3759_v0 }
  0x35   : > { %2617 = vmatprep.mubr.msk.f32.mxu1 %vm3760_vm0, %v3761_v1  ;;  %2687 = vmatprep.mubr.msk.f32.mxu0 %vm3760_vm0, %v3761_v1 }
  0x37   : > { %3279 = vmatpush3.bf16.msra.mxu1 %v3278_v33  ;;  %3327 = vmatpush3.bf16.msra.mxu0 %v3278_v33  ;;  %v3386_v33 = vpack.c.bf16 %v2091_v32, %v2090_v31  ;;  %v2138_v31 = vld [vmem:[%s3814_s24 + $0x190] sm:$0xff]  ;;  %v2139_v32 = vld [vmem:[%s3814_s24 + $0x198] sm:$0xff] }
  0x38   : > { %3280 = vmatprep.subr.bf16.mxu1 %v3759_v0  ;;  %3328 = vmatprep.subr.bf16.mxu0 %v3759_v0 }
  0x3b   : > { %3282 = vmatpush3.bf16.msra.mxu1 %v3281_v36  ;;  %3330 = vmatpush3.bf16.msra.mxu0 %v3281_v36  ;;  %v3389_v36 = vpack.c.bf16 %v2093_v35, %v2092_v34  ;;  %v2140_v34 = vld [vmem:[%s3814_s24 + $0x1a0] sm:$0xff]  ;;  %v2141_v35 = vld [vmem:[%s3814_s24 + $0x1a8] sm:$0xff] }
  0x3c   : > { %3283 = vmatprep.subr.bf16.mxu1 %v3759_v0  ;;  %3331 = vmatprep.subr.bf16.mxu0 %v3759_v0 }
  0x3f   : > { %3285 = vmatpush3.bf16.msra.mxu1 %v3284_v39  ;;  %3333 = vmatpush3.bf16.msra.mxu0 %v3284_v39  ;;  %v3392_v39 = vpack.c.bf16 %v2095_v38, %v2094_v37  ;;  %v2142_v37 = vld [vmem:[%s3814_s24 + $0x1b0] sm:$0xff]  ;;  %v2143_v38 = vld [vmem:[%s3814_s24 + $0x1b8] sm:$0xff] }
  0x40   : > { %3286 = vmatprep.subr.bf16.mxu1 %v3759_v0  ;;  %3334 = vmatprep.subr.bf16.mxu0 %v3759_v0 }
  0x43   : > { %3288 = vmatpush3.bf16.msra.mxu1 %v3287_v42  ;;  %3336 = vmatpush3.bf16.msra.mxu0 %v3287_v42  ;;  %v3443_v42 = vpack.c.bf16 %v2101_v41, %v2100_v40  ;;  %v2144_v40 = vld [vmem:[%s3814_s24 + $0x1c0] sm:$0xff]  ;;  %v2145_v41 = vld [vmem:[%s3814_s24 + $0x1c8] sm:$0xff] }
  0x44   : > { %3289 = vmatprep.subr.bf16.mxu1 %v3759_v0  ;;  %3337 = vmatprep.subr.bf16.mxu0 %v3759_v0 }
  0x47   : > { %3291 = vmatpush3.bf16.msra.mxu1 %v3290_v45  ;;  %3339 = vmatpush3.bf16.msra.mxu0 %v3290_v45  ;;  %v3446_v45 = vpack.c.bf16 %v2103_v44, %v2102_v43  ;;  %v2146_v43 = vld [vmem:[%s3814_s24 + $0x1d0] sm:$0xff]  ;;  %v2147_v44 = vld [vmem:[%s3814_s24 + $0x1d8] sm:$0xff] }
  0x48   : > { %3292 = vmatprep.subr.bf16.mxu1 %v3759_v0  ;;  %3340 = vmatprep.subr.bf16.mxu0 %v3759_v0 }
  0x4b   : > { %3294 = vmatpush3.bf16.msra.mxu1 %v3293_v48  ;;  %3342 = vmatpush3.bf16.msra.mxu0 %v3293_v48  ;;  %v3449_v48 = vpack.c.bf16 %v2105_v47, %v2104_v46  ;;  %v2148_v46 = vld [vmem:[%s3814_s24 + $0x1e0] sm:$0xff]  ;;  %v2149_v47 = vld [vmem:[%s3814_s24 + $0x1e8] sm:$0xff] }
  0x4c   : > { %3295 = vmatprep.subr.bf16.mxu1 %v3759_v0  ;;  %3343 = vmatprep.subr.bf16.mxu0 %v3759_v0 }
  0x4f   : > { %3297 = vmatpush3.bf16.msra.mxu1 %v3296_v51  ;;  %3345 = vmatpush3.bf16.msra.mxu0 %v3296_v51  ;;  %v3452_v51 = vpack.c.bf16 %v2107_v50, %v2106_v49  ;;  %v2150_v49 = vld [vmem:[%s3814_s24 + $0x1f0] sm:$0xff]  ;;  %v2151_v50 = vld [vmem:[%s3814_s24 + $0x1f8] sm:$0xff] }
  0x50   : > { %3346 = vmatprep.subr.bf16.mxu1 %v3759_v0  ;;  %3394 = vmatprep.subr.bf16.mxu0 %v3759_v0 }
  0x52   : > { %2618 = vmatmul.mubr.f32.vlgmr.msra.gmra.mrb[2].mxu1 %v3874_v30  ;;  %2688 = vmatmul.mubr.f32.vlgmr.msra.gmra.mrb[0].mxu0 %v3871_v28  ;;  %v2088_v28 = vld [vmem:[%s3849_s27 + $0xc0] sm:$0xff] }
  0x53   : > { %3348 = vmatpush3.bf16.msra.mxu1 %v3347_v54  ;;  %3396 = vmatpush3.bf16.msra.mxu0 %v3347_v54  ;;  %v3383_v30 = vpack.c.bf16 %v2089_v29, %v2088_v28  ;;  %v3455_v54 = vpack.c.bf16 %v2109_v53, %v2108_v52  ;;  %v2136_v28 = vld [vmem:[%s3814_s24 + $0x180] sm:$0xff]  ;;  %v2137_v29 = vld [vmem:[%s3814_s24 + $0x188] sm:$0xff] }
  0x54   : > { %3349 = vmatprep.subr.bf16.mxu1 %v3759_v0  ;;  %3397 = vmatprep.subr.bf16.mxu0 %v3759_v0  ;;  %v2152_v52 = vld [vmem:[%s3849_s27 + $0x180] sm:$0xff]  ;;  %v2153_v53 = vld [vmem:[%s3849_s27 + $0x188] sm:$0xff] }
  0x55   : > { %2722 = vmatprep.mubr.msk.f32.mxu1 %vm3760_vm0, %v3761_v1  ;;  %2792 = vmatprep.mubr.msk.f32.mxu0 %vm3760_vm0, %v3761_v1 }
  0x57   : > { %3351 = vmatpush3.bf16.msra.mxu1 %v3350_v57  ;;  %3399 = vmatpush3.bf16.msra.mxu0 %v3350_v57  ;;  %v3458_v57 = vpack.c.bf16 %v2111_v56, %v2110_v55  ;;  %v3563_v55 = vpack.c.bf16 %v2153_v53, %v2152_v52  ;;  %v4120_v56 = vld [vmem:[%s3868_s9 + $0x6] sm:$0x3]  ;;  %v2190_v52 = vld [vmem:[%s3849_s27 + $0x210] sm:$0xff]  ;;  %v2191_v53 = vld [vmem:[%s3849_s27 + $0x218] sm:$0xff] }
  0x58   : > { %3352 = vmatprep.subr.bf16.mxu1 %v3759_v0  ;;  %3400 = vmatprep.subr.bf16.mxu0 %v3759_v0 }
  0x5b   : > { %3354 = vmatpush3.bf16.msra.mxu1 %v3353_v60  ;;  %3402 = vmatpush3.bf16.msra.mxu0 %v3353_v60  ;;  %v3461_v60 = vpack.c.bf16 %v2113_v59, %v2112_v58  ;;  %v2155_v58 = vld [vmem:[%s3849_s27 + $0x198] sm:$0xff] }
  0x5c   : > { %3355 = vmatprep.subr.bf16.mxu1 %v3759_v0  ;;  %3403 = vmatprep.subr.bf16.mxu0 %v3759_v0 }
  0x5f   : > { %3357 = vmatpush3.bf16.msra.mxu1 %v3356_v63  ;;  %3405 = vmatpush3.bf16.msra.mxu0 %v3356_v63  ;;  %v3464_v63 = vpack.c.bf16 %v2115_v62, %v2114_v61  ;;  %v2157_v61 = vld [vmem:[%s3849_s27 + $0x1a8] sm:$0xff] }
  0x60   : > { %3358 = vmatprep.subr.bf16.mxu1 %v3759_v0  ;;  %3406 = vmatprep.subr.bf16.mxu0 %v3759_v0 }
  0x63   : > { %3360 = vmatpush3.bf16.msra.mxu1 %v3359_v4  ;;  %3408 = vmatpush3.bf16.msra.mxu0 %v3359_v4  ;;  %v4035_v4 = vld [vmem:[%s3860_s6 + $0x4] sm:$0x3] }
  0x64   : > { %3361 = vmatprep.subr.bf16.mxu1 %v3759_v0  ;;  %3409 = vmatprep.subr.bf16.mxu0 %v3759_v0 }
  0x67   : > { %3363 = vmatpush3.bf16.msra.mxu1 %v3362_v7  ;;  %3411 = vmatpush3.bf16.msra.mxu0 %v3362_v7  ;;  %v2118_v7 = vld [vmem:[%s3849_s27 + $0x110] sm:$0xff] }
  0x68   : > { %3364 = vmatprep.subr.bf16.mxu1 %v3759_v0  ;;  %3412 = vmatprep.subr.bf16.mxu0 %v3759_v0  ;;  %v3470_v9 = vpack.c.bf16 %v2119_v8, %v2118_v7  ;;  %v2162_v7 = vld [vmem:[%s3849_s27 + $0x1d0] sm:$0xff]  ;;  %v2163_v8 = vld [vmem:[%s3849_s27 + $0x1d8] sm:$0xff] }
  0x6b   : > { %3366 = vmatpush3.bf16.msra.mxu1 %v3365_v10  ;;  %3414 = vmatpush3.bf16.msra.mxu0 %v3365_v10  ;;  %v2120_v10 = vld [vmem:[%s3849_s27 + $0x120] sm:$0xff] }
  0x6c   : > { %3367 = vmatprep.subr.bf16.mxu1 %v3759_v0  ;;  %3415 = vmatprep.subr.bf16.mxu0 %v3759_v0  ;;  %v3473_v12 = vpack.c.bf16 %v2121_v11, %v2120_v10  ;;  %v2164_v10 = vld [vmem:[%s3849_s27 + $0x1e0] sm:$0xff]  ;;  %v2165_v11 = vld [vmem:[%s3849_s27 + $0x1e8] sm:$0xff] }
  0x6f   : > { %3369 = vmatpush3.bf16.msra.mxu1 %v3368_v13  ;;  %3417 = vmatpush3.bf16.msra.mxu0 %v3368_v13  ;;  %v2122_v13 = vld [vmem:[%s3849_s27 + $0x130] sm:$0xff] }
  0x70   : > { %3370 = vmatprep.subr.bf16.mxu1 %v3759_v0  ;;  %3418 = vmatprep.subr.bf16.mxu0 %v3759_v0  ;;  %v3476_v15 = vpack.c.bf16 %v2123_v14, %v2122_v13  ;;  %v3581_v14 = vpack.c.bf16 %v2165_v11, %v2164_v10  ;;  %v2203_v10 = vld [vmem:[%s3849_s27 + $0x278] sm:$0xff] }
  0x72   : > { %2723 = vmatmul.mubr.f32.vlgmr.msra.gmra.mrb[4].mxu1 %v3953_v16  ;;  %2793 = vmatmul.mubr.f32.vlgmr.msra.gmra.mrb[2].mxu0 %v3956_v18 }
  0x73   : > { %3372 = vmatpush3.bf16.msra.mxu1 %v3371_v17  ;;  %3420 = vmatpush3.bf16.msra.mxu0 %v3371_v17  ;;  %v2125_v17 = vld [vmem:[%s3849_s27 + $0x148] sm:$0xff] }
  0x74   : > { %3373 = vmatprep.subr.bf16.mxu1 %v3759_v0  ;;  %3421 = vmatprep.subr.bf16.mxu0 %v3759_v0 }
  0x75   : > { %2757 = vmatprep.mubr.msk.f32.mxu1 %vm3760_vm0, %v3761_v1  ;;  %2827 = vmatprep.mubr.msk.f32.mxu0 %vm3760_vm0, %v3761_v1 }
  0x77   : > { %3375 = vmatpush3.bf16.msra.mxu1 %v3374_v21  ;;  %3423 = vmatpush3.bf16.msra.mxu0 %v3374_v21  ;;  %v3482_v21 = vpack.c.bf16 %v2127_v20, %v2126_v19  ;;  %v2173_v19 = vld [vmem:[%s3814_s24 + $0x208] sm:$0xff] }
  0x78   : > { %3376 = vmatprep.subr.bf16.mxu1 %v3759_v0  ;;  %3424 = vmatprep.subr.bf16.mxu0 %v3759_v0 }
  0x7b   : > { %3378 = vmatpush3.bf16.msra.mxu1 %v3377_v24  ;;  %3426 = vmatpush3.bf16.msra.mxu0 %v3377_v24  ;;  %v3485_v24 = vpack.c.bf16 %v2129_v23, %v2128_v22  ;;  %v2175_v22 = vld [vmem:[%s3814_s24 + $0x218] sm:$0xff] }
  0x7c   : > { %3379 = vmatprep.subr.bf16.mxu1 %v3759_v0  ;;  %3427 = vmatprep.subr.bf16.mxu0 %v3759_v0 }
  0x7f   : > { %3381 = vmatpush3.bf16.msra.mxu1 %v3380_v27  ;;  %3429 = vmatpush3.bf16.msra.mxu0 %v3380_v27  ;;  %v3488_v27 = vpack.c.bf16 %v2131_v26, %v2130_v25  ;;  %v2177_v25 = vld [vmem:[%s3814_s24 + $0x228] sm:$0xff] }
  0x80   : > { %3382 = vmatprep.subr.bf16.mxu1 %v3759_v0  ;;  %3430 = vmatprep.subr.bf16.mxu0 %v3759_v0 }
  0x83   : > { %3384 = vmatpush3.bf16.msra.mxu1 %v3383_v30  ;;  %3432 = vmatpush3.bf16.msra.mxu0 %v3383_v30  ;;  %v3539_v30 = vpack.c.bf16 %v2137_v29, %v2136_v28  ;;  %v2179_v28 = vld [vmem:[%s3814_s24 + $0x238] sm:$0xff] }
  0x84   : > { %3385 = vmatprep.subr.bf16.mxu1 %v3759_v0  ;;  %3433 = vmatprep.subr.bf16.mxu0 %v3759_v0 }
  0x87   : > { %3387 = vmatpush3.bf16.msra.mxu1 %v3386_v33  ;;  %3435 = vmatpush3.bf16.msra.mxu0 %v3386_v33  ;;  %v3542_v33 = vpack.c.bf16 %v2139_v32, %v2138_v31  ;;  %v2181_v31 = vld [vmem:[%s3814_s24 + $0x248] sm:$0xff] }
  0x88   : > { %3388 = vmatprep.subr.bf16.mxu1 %v3759_v0  ;;  %3436 = vmatprep.subr.bf16.mxu0 %v3759_v0 }
  0x8b   : > { %3390 = vmatpush3.bf16.msra.mxu1 %v3389_v36  ;;  %3438 = vmatpush3.bf16.msra.mxu0 %v3389_v36  ;;  %v3545_v36 = vpack.c.bf16 %v2141_v35, %v2140_v34  ;;  %v2183_v34 = vld [vmem:[%s3814_s24 + $0x258] sm:$0xff] }
  0x8c   : > { %3391 = vmatprep.subr.bf16.mxu1 %v3759_v0  ;;  %3439 = vmatprep.subr.bf16.mxu0 %v3759_v0 }
  0x8f   : > { %3393 = vmatpush3.bf16.msra.mxu1 %v3392_v39  ;;  %3441 = vmatpush3.bf16.msra.mxu0 %v3392_v39  ;;  %v3548_v39 = vpack.c.bf16 %v2143_v38, %v2142_v37  ;;  %v2185_v37 = vld [vmem:[%s3814_s24 + $0x268] sm:$0xff] }
  0x90   : > { %3442 = vmatprep.subr.bf16.mxu1 %v3759_v0  ;;  %3490 = vmatprep.subr.bf16.mxu0 %v3759_v0 }
  0x92   : > { %2758 = vmatmul.mubr.f32.vlgmr.msra.gmra.mrb[6].mxu1 %v3956_v18  ;;  %2828 = vmatmul.mubr.f32.vlgmr.msra.gmra.mrb[2].mxu0 %v3953_v16  ;;  %v2124_v16 = vld [vmem:[%s3849_s27 + $0x140] sm:$0xff] }
  0x93   : > { %3444 = vmatpush3.bf16.msra.mxu1 %v3443_v42  ;;  %3492 = vmatpush3.bf16.msra.mxu0 %v3443_v42  ;;  %v3479_v18 = vpack.c.bf16 %v2125_v17, %v2124_v16  ;;  %v3551_v42 = vpack.c.bf16 %v2145_v41, %v2144_v40  ;;  %v2167_v16 = vld [vmem:[%s3849_s27 + $0x1f8] sm:$0xff] }
  0x94   : > { %3445 = vmatprep.subr.bf16.mxu1 %v3759_v0  ;;  %3493 = vmatprep.subr.bf16.mxu0 %v3759_v0 }
  0x95   : > { %2862 = vmatprep.mubr.msk.f32.mxu1 %vm3760_vm0, %v3761_v1  ;;  %2932 = vmatprep.mubr.msk.f32.mxu0 %vm3760_vm0, %v3761_v1 }
  0x97   : > { %3447 = vmatpush3.bf16.msra.mxu1 %v3446_v45  ;;  %3495 = vmatpush3.bf16.msra.mxu0 %v3446_v45  ;;  %v3554_v45 = vpack.c.bf16 %v2147_v44, %v2146_v43  ;;  %v2186_v44 = vld [vmem:[%s3814_s24 + $0x270] sm:$0xff] }
  0x98   : > { %3448 = vmatprep.subr.bf16.mxu1 %v3759_v0  ;;  %3496 = vmatprep.subr.bf16.mxu0 %v3759_v0 }
  0x9b   : > { %3450 = vmatpush3.bf16.msra.mxu1 %v3449_v48  ;;  %3498 = vmatpush3.bf16.msra.mxu0 %v3449_v48  ;;  %v3557_v48 = vpack.c.bf16 %v2149_v47, %v2148_v46  ;;  %v2188_v47 = vld [vmem:[%s3849_s27 + $0x200] sm:$0xff] }
  0x9c   : > { %3451 = vmatprep.subr.bf16.mxu1 %v3759_v0  ;;  %3499 = vmatprep.subr.bf16.mxu0 %v3759_v0 }
  0x9f   : > { %3453 = vmatpush3.bf16.msra.mxu1 %v3452_v51  ;;  %3501 = vmatpush3.bf16.msra.mxu0 %v3452_v51  ;;  %v3560_v51 = vpack.c.bf16 %v2151_v50, %v2150_v49  ;;  %v2170_v49 = vld [vmem:[%s3860_s6 + $0x8] sm:$0x3] }
  0xa0   : > { %3454 = vmatprep.subr.bf16.mxu1 %v3759_v0  ;;  %3502 = vmatprep.subr.bf16.mxu0 %v3759_v0 }
  0xa3   : > { %3456 = vmatpush3.bf16.msra.mxu1 %v3455_v54  ;;  %3504 = vmatpush3.bf16.msra.mxu0 %v3455_v54  ;;  %v4117_v54 = vld [vmem:[%s3860_s6 + $0x6] sm:$0x3] }
  0xa4   : > { %3457 = vmatprep.subr.bf16.mxu1 %v3759_v0  ;;  %3505 = vmatprep.subr.bf16.mxu0 %v3759_v0 }
  0xa7   : > { %3459 = vmatpush3.bf16.msra.mxu1 %v3458_v57  ;;  %3507 = vmatpush3.bf16.msra.mxu0 %v3458_v57  ;;  %v2154_v57 = vld [vmem:[%s3849_s27 + $0x190] sm:$0xff] }
  0xa8   : > { %3460 = vmatprep.subr.bf16.mxu1 %v3759_v0  ;;  %3508 = vmatprep.subr.bf16.mxu0 %v3759_v0  ;;  %v3566_v59 = vpack.c.bf16 %v2155_v58, %v2154_v57  ;;  %v2194_v58 = vld [vmem:[%s3849_s27 + $0x230] sm:$0xff] }
  0xab   : > { %3462 = vmatpush3.bf16.msra.mxu1 %v3461_v60  ;;  %3510 = vmatpush3.bf16.msra.mxu0 %v3461_v60  ;;  %v2156_v60 = vld [vmem:[%s3849_s27 + $0x1a0] sm:$0xff] }
  0xac   : > { %3463 = vmatprep.subr.bf16.mxu1 %v3759_v0  ;;  %3511 = vmatprep.subr.bf16.mxu0 %v3759_v0  ;;  %v3569_v62 = vpack.c.bf16 %v2157_v61, %v2156_v60  ;;  %v2197_v61 = vld [vmem:[%s3849_s27 + $0x248] sm:$0xff] }
  0xaf   : > { %3465 = vmatpush3.bf16.msra.mxu1 %v3464_v63  ;;  %3513 = vmatpush3.bf16.msra.mxu0 %v3464_v63  ;;  %v2158_v63 = vld [vmem:[%s3849_s27 + $0x1b0] sm:$0xff] }
  0xb0   : > { %3466 = vmatprep.subr.bf16.mxu1 %v3759_v0  ;;  %3514 = vmatprep.subr.bf16.mxu0 %v3759_v0  ;;  %v3572_v3 = vpack.c.bf16 %v2159_v2, %v2158_v63  ;;  %v2198_v63 = vld [vmem:[%s3849_s27 + $0x250] sm:$0xff]  ;;  %v2199_v2 = vld [vmem:[%s3849_s27 + $0x258] sm:$0xff] }
  0xb2   : > { %2863 = vmatmul.mubr.f32.vlgmr.msra.gmra.mrb[8].mxu1 %v4035_v4  ;;  %2933 = vmatmul.mubr.f32.vlgmr.msra.gmra.mrb[4].mxu0 %v4038_v6 }
  0xb3   : > { %3468 = vmatpush3.bf16.msra.mxu1 %v3467_v5  ;;  %3516 = vmatpush3.bf16.msra.mxu0 %v3467_v5  ;;  %v2161_v5 = vld [vmem:[%s3849_s27 + $0x1c8] sm:$0xff] }
  0xb4   : > { %3469 = vmatprep.subr.bf16.mxu1 %v3759_v0  ;;  %3517 = vmatprep.subr.bf16.mxu0 %v3759_v0 }
  0xb5   : > { %2897 = vmatprep.mubr.msk.f32.mxu1 %vm3760_vm0, %v3761_v1  ;;  %2967 = vmatprep.mubr.msk.f32.mxu0 %vm3760_vm0, %v3761_v1 }
  0xb7   : > { %3471 = vmatpush3.bf16.msra.mxu1 %v3470_v9  ;;  %3519 = vmatpush3.bf16.msra.mxu0 %v3470_v9  ;;  %v3578_v9 = vpack.c.bf16 %v2163_v8, %v2162_v7 }
  0xb8   : > { %3472 = vmatprep.subr.bf16.mxu1 %v3759_v0  ;;  %3520 = vmatprep.subr.bf16.mxu0 %v3759_v0 }
  0xbb   : > { %3474 = vmatpush3.bf16.msra.mxu1 %v3473_v12  ;;  %3522 = vmatpush3.bf16.msra.mxu0 %v3473_v12 }
  0xbc   : > { %3475 = vmatprep.subr.bf16.mxu1 %v3759_v0  ;;  %3523 = vmatprep.subr.bf16.mxu0 %v3759_v0 }
  0xbf   : > { %3477 = vmatpush3.bf16.msra.mxu1 %v3476_v15  ;;  %3525 = vmatpush3.bf16.msra.mxu0 %v3476_v15  ;;  %v2166_v15 = vld [vmem:[%s3849_s27 + $0x1f0] sm:$0xff] }
  0xc0   : > { %3478 = vmatprep.subr.bf16.mxu1 %v3759_v0  ;;  %3526 = vmatprep.subr.bf16.mxu0 %v3759_v0  ;;  %v3584_v17 = vpack.c.bf16 %v2167_v16, %v2166_v15 }
  0xc3   : > { %3480 = vmatpush3.bf16.msra.mxu1 %v3479_v18  ;;  %3528 = vmatpush3.bf16.msra.mxu0 %v3479_v18  ;;  %v2172_v18 = vld [vmem:[%s3814_s24 + $0x200] sm:$0xff] }
  0xc4   : > { %3481 = vmatprep.subr.bf16.mxu1 %v3759_v0  ;;  %3529 = vmatprep.subr.bf16.mxu0 %v3759_v0  ;;  %v3635_v20 = vpack.c.bf16 %v2173_v19, %v2172_v18 }
  0xc7   : > { %3483 = vmatpush3.bf16.msra.mxu1 %v3482_v21  ;;  %3531 = vmatpush3.bf16.msra.mxu0 %v3482_v21  ;;  %v2174_v21 = vld [vmem:[%s3814_s24 + $0x210] sm:$0xff] }
  0xc8   : > { %3484 = vmatprep.subr.bf16.mxu1 %v3759_v0  ;;  %3532 = vmatprep.subr.bf16.mxu0 %v3759_v0  ;;  %v3638_v23 = vpack.c.bf16 %v2175_v22, %v2174_v21 }
  0xcb   : > { %3486 = vmatpush3.bf16.msra.mxu1 %v3485_v24  ;;  %3534 = vmatpush3.bf16.msra.mxu0 %v3485_v24  ;;  %v2176_v24 = vld [vmem:[%s3814_s24 + $0x220] sm:$0xff] }
  0xcc   : > { %3487 = vmatprep.subr.bf16.mxu1 %v3759_v0  ;;  %3535 = vmatprep.subr.bf16.mxu0 %v3759_v0  ;;  %v3641_v26 = vpack.c.bf16 %v2177_v25, %v2176_v24 }
  0xcf   : > { %3489 = vmatpush3.bf16.msra.mxu1 %v3488_v27  ;;  %3537 = vmatpush3.bf16.msra.mxu0 %v3488_v27  ;;  %v2178_v27 = vld [vmem:[%s3814_s24 + $0x230] sm:$0xff] }
  0xd0   : > { %3538 = vmatprep.subr.bf16.mxu1 %v3759_v0  ;;  %3586 = vmatprep.subr.bf16.mxu0 %v3759_v0  ;;  %v3644_v29 = vpack.c.bf16 %v2179_v28, %v2178_v27 }
  0xd2   : > { %2898 = vmatmul.mubr.f32.vlgmr.msra.gmra.mrb[10].mxu1 %v4038_v6  ;;  %2968 = vmatmul.mubr.f32.vlgmr.msra.gmra.mrb[4].mxu0 %v4035_v4  ;;  %v2160_v4 = vld [vmem:[%s3849_s27 + $0x1c0] sm:$0xff] }
  0xd3   : > { %3540 = vmatpush3.bf16.msra.mxu1 %v3539_v30  ;;  %3588 = vmatpush3.bf16.msra.mxu0 %v3539_v30  ;;  %v3575_v6 = vpack.c.bf16 %v2161_v5, %v2160_v4  ;;  %v2180_v30 = vld [vmem:[%s3814_s24 + $0x240] sm:$0xff]  ;;  %v2201_v5 = vld [vmem:[%s3849_s27 + $0x268] sm:$0xff] }
  0xd4   : > { %3541 = vmatprep.subr.bf16.mxu1 %v3759_v0  ;;  %3589 = vmatprep.subr.bf16.mxu0 %v3759_v0  ;;  %v3647_v32 = vpack.c.bf16 %v2181_v31, %v2180_v30  ;;  %v2200_v4 = vld [vmem:[%s3849_s27 + $0x260] sm:$0xff] }
  0xd5   : > { %3002 = vmatprep.mubr.msk.f32.mxu1 %vm3760_vm0, %v3761_v1  ;;  %3072 = vmatprep.mubr.msk.f32.mxu0 %vm3760_vm0, %v3761_v1  ;;  %v3677_v8 = vpack.c.bf16 %v2201_v5, %v2200_v4 }
  0xd7   : > { %3543 = vmatpush3.bf16.msra.mxu1 %v3542_v33  ;;  %3591 = vmatpush3.bf16.msra.mxu0 %v3542_v33  ;;  %v2182_v33 = vld [vmem:[%s3814_s24 + $0x250] sm:$0xff] }
  0xd8   : > { %3544 = vmatprep.subr.bf16.mxu1 %v3759_v0  ;;  %3592 = vmatprep.subr.bf16.mxu0 %v3759_v0  ;;  %v3650_v35 = vpack.c.bf16 %v2183_v34, %v2182_v33 }
  0xdb   : > { %3546 = vmatpush3.bf16.msra.mxu1 %v3545_v36  ;;  %3594 = vmatpush3.bf16.msra.mxu0 %v3545_v36  ;;  %v2184_v36 = vld [vmem:[%s3814_s24 + $0x260] sm:$0xff] }
  0xdc   : > { %3547 = vmatprep.subr.bf16.mxu1 %v3759_v0  ;;  %3595 = vmatprep.subr.bf16.mxu0 %v3759_v0  ;;  %v3653_v43 = vpack.c.bf16 %v2185_v37, %v2184_v36 }
  0xdf   : > { %3549 = vmatpush3.bf16.msra.mxu1 %v3548_v39  ;;  %3597 = vmatpush3.bf16.msra.mxu0 %v3548_v39 }
  0xe0   : > { %3550 = vmatprep.subr.bf16.mxu1 %v3759_v0  ;;  %3598 = vmatprep.subr.bf16.mxu0 %v3759_v0 }
  0xe3   : > { %3552 = vmatpush3.bf16.msra.mxu1 %v3551_v42  ;;  %3600 = vmatpush3.bf16.msra.mxu0 %v3551_v42 }
  0xe4   : > { %3553 = vmatprep.subr.bf16.mxu1 %v3759_v0  ;;  %3601 = vmatprep.subr.bf16.mxu0 %v3759_v0 }
  0xe7   : > { %3555 = vmatpush3.bf16.msra.mxu1 %v3554_v45  ;;  %3603 = vmatpush3.bf16.msra.mxu0 %v3554_v45  ;;  %v2187_v45 = vld [vmem:[%s3814_s24 + $0x278] sm:$0xff] }
  0xe8   : > { %3556 = vmatprep.subr.bf16.mxu1 %v3759_v0  ;;  %3604 = vmatprep.subr.bf16.mxu0 %v3759_v0  ;;  %v3656_v46 = vpack.c.bf16 %v2187_v45, %v2186_v44 }
  0xeb   : > { %3558 = vmatpush3.bf16.msra.mxu1 %v3557_v48  ;;  %3606 = vmatpush3.bf16.msra.mxu0 %v3557_v48  ;;  %v2189_v48 = vld [vmem:[%s3849_s27 + $0x208] sm:$0xff] }
  0xec   : > { %3559 = vmatprep.subr.bf16.mxu1 %v3759_v0  ;;  %3607 = vmatprep.subr.bf16.mxu0 %v3759_v0  ;;  %v3659_v50 = vpack.c.bf16 %v2189_v48, %v2188_v47 }
  0xef   : > { %3561 = vmatpush3.bf16.msra.mxu1 %v3560_v51  ;;  %3609 = vmatpush3.bf16.msra.mxu0 %v3560_v51  ;;  %v2171_v51 = vld [vmem:[%s3868_s9 + $0x8] sm:$0x3] }
  0xf0   : > { %3562 = vmatprep.subr.bf16.mxu1 %v3759_v0  ;;  %3610 = vmatprep.subr.bf16.mxu0 %v3759_v0 }
  0xf2   : > { %3003 = vmatmul.mubr.f32.vlgmr.msra.gmra.mrb[12].mxu1 %v4117_v54  ;;  %3073 = vmatmul.mubr.f32.vlgmr.msra.gmra.mrb[6].mxu0 %v4120_v56 }
  0xf3   : > { %3564 = vmatpush3.bf16.msra.mxu1 %v3563_v55  ;;  %3612 = vmatpush3.bf16.msra.mxu0 %v3563_v55  ;;  %v2192_v55 = vld [vmem:[%s3849_s27 + $0x220] sm:$0xff] }
  0xf4   : > { %3565 = vmatprep.subr.bf16.mxu1 %v3759_v0  ;;  %3613 = vmatprep.subr.bf16.mxu0 %v3759_v0 }
  0xf5   : > { %3037 = vmatprep.mubr.msk.f32.mxu1 %vm3760_vm0, %v3761_v1  ;;  %3107 = vmatprep.mubr.msk.f32.mxu0 %vm3760_vm0, %v3761_v1 }
  0xf7   : > { %3567 = vmatpush3.bf16.msra.mxu1 %v3566_v59  ;;  %3615 = vmatpush3.bf16.msra.mxu0 %v3566_v59  ;;  %v2195_v59 = vld [vmem:[%s3849_s27 + $0x238] sm:$0xff] }
  0xf8   : > { %3568 = vmatprep.subr.bf16.mxu1 %v3759_v0  ;;  %3616 = vmatprep.subr.bf16.mxu0 %v3759_v0  ;;  %v3668_v60 = vpack.c.bf16 %v2195_v59, %v2194_v58 }
  0xfb   : > { %3570 = vmatpush3.bf16.msra.mxu1 %v3569_v62  ;;  %3618 = vmatpush3.bf16.msra.mxu0 %v3569_v62 }
  0xfc   : > { %3571 = vmatprep.subr.bf16.mxu1 %v3759_v0  ;;  %3619 = vmatprep.subr.bf16.mxu0 %v3759_v0 }
  0xff   : > { %3573 = vmatpush3.bf16.msra.mxu1 %v3572_v3  ;;  %3621 = vmatpush3.bf16.msra.mxu0 %v3572_v3  ;;  %v3674_v3 = vpack.c.bf16 %v2199_v2, %v2198_v63 }
 0x100   : > { %3574 = vmatprep.subr.bf16.mxu1 %v3759_v0  ;;  %3622 = vmatprep.subr.bf16.mxu0 %v3759_v0 }
 0x103   : > { %3576 = vmatpush3.bf16.msra.mxu1 %v3575_v6  ;;  %3624 = vmatpush3.bf16.msra.mxu0 %v3575_v6 }
 0x104   : > { %3577 = vmatprep.subr.bf16.mxu1 %v3759_v0  ;;  %3625 = vmatprep.subr.bf16.mxu0 %v3759_v0 }
 0x105   : > { %v4152_v12 = vpop.f32.mrb[0].mxu1 }
 0x106   : > { %v2584_v13 = vpop.f32.mrb[1].mxu1 }
 0x107   : > { %3579 = vmatpush3.bf16.msra.mxu1 %v3578_v9  ;;  %3627 = vmatpush3.bf16.msra.mxu0 %v3578_v9  ;;  %v2202_v9 = vld [vmem:[%s3849_s27 + $0x270] sm:$0xff] }
 0x108   : > { %3580 = vmatprep.subr.bf16.mxu1 %v3759_v0  ;;  %3628 = vmatprep.subr.bf16.mxu0 %v3759_v0  ;;  %v3680_v11 = vpack.c.bf16 %v2203_v10, %v2202_v9 }
 0x10b   : > { %3582 = vmatpush3.bf16.msra.mxu1 %v3581_v14  ;;  %3630 = vmatpush3.bf16.msra.mxu0 %v3581_v14 }
 0x10c   : > { %3583 = vmatprep.subr.bf16.mxu1 %v3759_v0  ;;  %3631 = vmatprep.subr.bf16.mxu0 %v3759_v0 }
 0x10f   : > { %3585 = vmatpush3.bf16.msra.mxu1 %v3584_v17  ;;  %3633 = vmatpush3.bf16.msra.mxu0 %v3584_v17 }
 0x110   : > { %3634 = vmatprep.subr.bf16.mxu1 %v3759_v0  ;;  %3682 = vmatprep.subr.bf16.mxu0 %v3759_v0 }
 0x112   : > { %3038 = vmatmul.mubr.f32.vlgmr.msra.gmra.mrb[14].mxu1 %v4120_v56  ;;  %3108 = vmatmul.mubr.f32.vlgmr.msra.gmra.mrb[6].mxu0 %v4117_v54  ;;  %v3662_v54 = vpack.c.bf16 %v2191_v53, %v2190_v52  ;;  %v2193_v56 = vld [vmem:[%s3849_s27 + $0x228] sm:$0xff] }
 0x113   : > { %3636 = vmatpush3.bf16.msra.mxu1 %v3635_v20  ;;  %3684 = vmatpush3.bf16.msra.mxu0 %v3635_v20  ;;  %v3665_v57 = vpack.c.bf16 %v2193_v56, %v2192_v55 }
 0x114   : > { %3637 = vmatprep.subr.bf16.mxu1 %v3759_v0  ;;  %3685 = vmatprep.subr.bf16.mxu0 %v3759_v0 }
 0x115   : > { %3142 = vmatprep.mubr.msk.f32.mxu1 %vm3760_vm0, %v3761_v1  ;;  %3212 = vmatprep.mubr.msk.f32.mxu0 %vm3760_vm0, %v3761_v1 }
 0x117   : > { %3639 = vmatpush3.bf16.msra.mxu1 %v3638_v23  ;;  %3687 = vmatpush3.bf16.msra.mxu0 %v3638_v23 }
 0x118   : > { %3640 = vmatprep.subr.bf16.mxu1 %v3759_v0  ;;  %3688 = vmatprep.subr.bf16.mxu0 %v3759_v0 }
 0x11b   : > { %3642 = vmatpush3.bf16.msra.mxu1 %v3641_v26  ;;  %3690 = vmatpush3.bf16.msra.mxu0 %v3641_v26 }
 0x11c   : > { %3643 = vmatprep.subr.bf16.mxu1 %v3759_v0  ;;  %3691 = vmatprep.subr.bf16.mxu0 %v3759_v0 }
 0x11f   : > { %3645 = vmatpush3.bf16.msra.mxu1 %v3644_v29  ;;  %3693 = vmatpush3.bf16.msra.mxu0 %v3644_v29 }
 0x120   : > { %3646 = vmatprep.subr.bf16.mxu1 %v3759_v0  ;;  %3694 = vmatprep.subr.bf16.mxu0 %v3759_v0 }
 0x123   : > { %3648 = vmatpush3.bf16.msra.mxu1 %v3647_v32  ;;  %3696 = vmatpush3.bf16.msra.mxu0 %v3647_v32 }
 0x124   : > { %3649 = vmatprep.subr.bf16.mxu1 %v3759_v0  ;;  %3697 = vmatprep.subr.bf16.mxu0 %v3759_v0 }
 0x125   : > { %v484_v38 = vpop.f32.mrb[2].mxu1  ;;  %v626_v39 = vpop.f32.mrb[0].mxu0 }
 0x126   : > { %v558_v40 = vsub.f32 %v4152_v12, %v484_v38  ;;  %630 = vst [vmem:[%s4192_s12] sm:$0x3] %v626_v39  ;;  %v2619_v41 = vpop.f32.mrb[3].mxu1  ;;  %v2689_v42 = vpop.f32.mrb[1].mxu0 }
 0x127   : > { %3651 = vmatpush3.bf16.msra.mxu1 %v3650_v35  ;;  %3699 = vmatpush3.bf16.msra.mxu0 %v3650_v35 }
 0x128   : > { %559 = vst [vmem:[%s4202_s15] sm:$0x3] %v558_v40  ;;  %3652 = vmatprep.subr.bf16.mxu1 %v3759_v0  ;;  %3700 = vmatprep.subr.bf16.mxu0 %v3759_v0 }
 0x12b   : > { %3654 = vmatpush3.bf16.msra.mxu1 %v3653_v43  ;;  %3702 = vmatpush3.bf16.msra.mxu0 %v3653_v43 }
 0x12c   : > { %3655 = vmatprep.subr.bf16.mxu1 %v3759_v0  ;;  %3703 = vmatprep.subr.bf16.mxu0 %v3759_v0 }
 0x12f   : > { %3657 = vmatpush3.bf16.msra.mxu1 %v3656_v46  ;;  %3705 = vmatpush3.bf16.msra.mxu0 %v3656_v46 }
 0x130   : > { %3658 = vmatprep.subr.bf16.mxu1 %v3759_v0  ;;  %3706 = vmatprep.subr.bf16.mxu0 %v3759_v0 }
 0x132   : > { %3143 = vmatmul.mubr.f32.vlgmr.msra.gmra.mrb[16].mxu1 %v2170_v49  ;;  %3213 = vmatmul.mubr.f32.vlgmr.msra.gmra.mrb[8].mxu0 %v2171_v51 }
 0x133   : > { %3660 = vmatpush3.bf16.msra.mxu1 %v3659_v50  ;;  %3708 = vmatpush3.bf16.msra.mxu0 %v3659_v50 }
 0x134   : > { %3661 = vmatprep.subr.bf16.mxu1 %v3759_v0  ;;  %3709 = vmatprep.subr.bf16.mxu0 %v3759_v0 }
 0x135   : > { %3177 = vmatprep.mubr.msk.f32.mxu1 %vm3760_vm0, %v3761_v1  ;;  %3247 = vmatprep.mubr.msk.f32.mxu0 %vm3760_vm0, %v3761_v1  ;;  %v2196_v1 = vld [vmem:[%s3849_s27 + $0x240] sm:$0xff] }
 0x136   : > { %v3671_v62 = vpack.c.bf16 %v2197_v61, %v2196_v1 }
 0x137   : > { %3663 = vmatpush3.bf16.msra.mxu1 %v3662_v54  ;;  %3711 = vmatpush3.bf16.msra.mxu0 %v3662_v54 }
 0x138   : > { %3664 = vmatprep.subr.bf16.mxu1 %v3759_v0  ;;  %3712 = vmatprep.subr.bf16.mxu0 %v3759_v0 }
 0x13b   : > { %3666 = vmatpush3.bf16.msra.mxu1 %v3665_v57  ;;  %3714 = vmatpush3.bf16.msra.mxu0 %v3665_v57 }
 0x13c   : > { %3667 = vmatprep.subr.bf16.mxu1 %v3759_v0  ;;  %3715 = vmatprep.subr.bf16.mxu0 %v3759_v0 }
 0x13f   : > { %3669 = vmatpush3.bf16.msra.mxu1 %v3668_v60  ;;  %3717 = vmatpush3.bf16.msra.mxu0 %v3668_v60 }
 0x140   : > { %3670 = vmatprep.subr.bf16.mxu1 %v3759_v0  ;;  %3718 = vmatprep.subr.bf16.mxu0 %v3759_v0 }
 0x143   : > { %3672 = vmatpush3.bf16.msra.mxu1 %v3671_v62  ;;  %3720 = vmatpush3.bf16.msra.mxu0 %v3671_v62 }
 0x144   : > { %3673 = vmatprep.subr.bf16.mxu1 %v3759_v0  ;;  %3721 = vmatprep.subr.bf16.mxu0 %v3759_v0 }
 0x145   : > { %v735_v6 = vpop.f32.mrb[4].mxu1 }
 0x146   : > { %v2724_v7 = vpop.f32.mrb[5].mxu1 }
 0x147   : > { %3675 = vmatpush3.bf16.msra.mxu1 %v3674_v3  ;;  %3723 = vmatpush3.bf16.msra.mxu0 %v3674_v3 }
 0x148   : > { %3676 = vmatprep.subr.bf16.mxu1 %v3759_v0  ;;  %3724 = vmatprep.subr.bf16.mxu0 %v3759_v0 }
 0x14b   : > { %3678 = vmatpush3.bf16.msra.mxu1 %v3677_v8  ;;  %3726 = vmatpush3.bf16.msra.mxu0 %v3677_v8 }
 0x14c   : > { %3679 = vmatprep.subr.bf16.mxu1 %v3759_v0  ;;  %3727 = vmatprep.subr.bf16.mxu0 %v3759_v0 }
 0x14f   : > { %3681 = vmatpush3.bf16.msra.mxu1 %v3680_v11  ;;  %3729 = vmatpush3.bf16.msra.mxu0 %v3680_v11 }
 0x152   : > { %3178 = vmatmul.mubr.f32.vlgmr.msra.gmra.mrb[18].mxu1 %v2171_v51  ;;  %3248 = vmatmul.mubr.f32.vlgmr.msra.gmra.mrb[8].mxu0 %v2170_v49 }
 0x165   : > { %v805_v12 = vpop.f32.mrb[6].mxu1  ;;  %v948_v13 = vpop.f32.mrb[2].mxu0 }
 0x166   : > { %v879_v14 = vsub.f32 %v735_v6, %v805_v12  ;;  %2097 = vst [vmem:[%s4192_s12 + $0x2] sm:$0x3] %v948_v13  ;;  %v2759_v15 = vpop.f32.mrb[7].mxu1  ;;  %v2829_v16 = vpop.f32.mrb[3].mxu0 }
 0x168   : > { %2096 = vst [vmem:[%s4202_s15 + $0x2] sm:$0x3] %v879_v14 }
 0x185   : > { %v1058_v17 = vpop.f32.mrb[8].mxu1 }
 0x186   : > { %v2864_v18 = vpop.f32.mrb[9].mxu1 }
 0x1a5   : > { %v1128_v19 = vpop.f32.mrb[10].mxu1  ;;  %v1271_v20 = vpop.f32.mrb[4].mxu0 }
 0x1a6   : > { %v1202_v0 = vsub.f32 %v1058_v17, %v1128_v19  ;;  %2133 = vst [vmem:[%s4192_s12 + $0x4] sm:$0x3] %v1271_v20  ;;  %v2899_v21 = vpop.f32.mrb[11].mxu1  ;;  %v2969_v22 = vpop.f32.mrb[5].mxu0 }
 0x1a8   : > { %2132 = vst [vmem:[%s4202_s15 + $0x4] sm:$0x3] %v1202_v0 }
 0x1c5   : > { %v1381_v23 = vpop.f32.mrb[12].mxu1 }
 0x1c6   : > { %v3004_v24 = vpop.f32.mrb[13].mxu1 }
 0x1e5   : > { %v1451_v25 = vpop.f32.mrb[14].mxu1  ;;  %v1594_v26 = vpop.f32.mrb[6].mxu0 }
 0x1e6   : > { %v1525_v27 = vsub.f32 %v1381_v23, %v1451_v25  ;;  %2169 = vst [vmem:[%s4192_s12 + $0x6] sm:$0x3] %v1594_v26  ;;  %v3039_v28 = vpop.f32.mrb[15].mxu1  ;;  %v3109_v29 = vpop.f32.mrb[7].mxu0 }
 0x1e8   : > { %2168 = vst [vmem:[%s4202_s15 + $0x6] sm:$0x3] %v1525_v27 }
 0x205   : > { %v1704_v30 = vpop.f32.mrb[16].mxu1 }
 0x206   : > { %v3144_v31 = vpop.f32.mrb[17].mxu1 }
 0x225   : > { %v1774_v32 = vpop.f32.mrb[18].mxu1  ;;  %v1917_v33 = vpop.f32.mrb[8].mxu0 }
 0x226   : > { %v1848_v34 = vsub.f32 %v1704_v30, %v1774_v32  ;;  %2205 = vst [vmem:[%s4192_s12 + $0x8] sm:$0x3] %v1917_v33  ;;  %v3179_v35 = vpop.f32.mrb[19].mxu1  ;;  %v3249_v36 = vpop.f32.mrb[9].mxu0 }
 0x228   : > { %2204 = vst [vmem:[%s4202_s15 + $0x8] sm:$0x3] %v1848_v34 }
 0x229 PF: > { %s16_s18 = sadd.s32 1, %s3757_s18  }
 0x22a   : > { %p13_p4 = scmp.ge.s32.totalorder %s16_s18, 4  }
 0x22c   :  { %15 = sbr.rel (!%p13_p4) target bundleno = 1 (0x1), region = 111 }

// kernel: reverse.8
= control target key start
LH: loop header
LB: loop body
LE: loop exit
PB: predicated region body
PF: predicated region fallthrough
CT: control target
= control target key end

     0   :  { %s584_s0 = inlined_call_operand.vmem [shape: f32[2,16,25,12], index: 0, kind: input, shape index: {}]   ;;  %s585_s1 = inlined_call_operand.vmem [shape: f32[2,16,25,12], index: 1, kind: output, shape index: {}]  }
   0x1   :  { %v192_v0 = vld [vmem:[%s584_s0 + $0xb0] sm:$0xff]  ;;  %v195_v2 = vld [vmem:[%s584_s0 + $0xa0] sm:$0xff]  ;;  %v238_v24 = vld [vmem:[%s584_s0 + $0xb8] sm:$0xff] }
   0x2   :  { %v193_v1 = vld [vmem:[%s584_s0 + $0x170] sm:$0xff]  ;;  %4 = vst [vmem:[%s585_s1] sm:$0xff] %v192_v0  ;;  %196 = vst [vmem:[%s585_s1 + $0x10] sm:$0xff] %v195_v2  ;;  %v197_v3 = vld [vmem:[%s584_s0 + $0x160] sm:$0xff] }
   0x3   :  { %194 = vst [vmem:[%s585_s1 + $0xc0] sm:$0xff] %v193_v1  ;;  %v199_v4 = vld [vmem:[%s584_s0 + $0x90] sm:$0xff]  ;;  %198 = vst [vmem:[%s585_s1 + $0xd0] sm:$0xff] %v197_v3  ;;  %v203_v6 = vld [vmem:[%s584_s0 + $0x80] sm:$0xff] }
   0x4   :  { %v201_v5 = vld [vmem:[%s584_s0 + $0x150] sm:$0xff]  ;;  %200 = vst [vmem:[%s585_s1 + $0x20] sm:$0xff] %v199_v4  ;;  %v205_v7 = vld [vmem:[%s584_s0 + $0x140] sm:$0xff]  ;;  %204 = vst [vmem:[%s585_s1 + $0x30] sm:$0xff] %v203_v6 }
   0x5   :  { %202 = vst [vmem:[%s585_s1 + $0xe0] sm:$0xff] %v201_v5  ;;  %v207_v8 = vld [vmem:[%s584_s0 + $0x70] sm:$0xff]  ;;  %206 = vst [vmem:[%s585_s1 + $0xf0] sm:$0xff] %v205_v7  ;;  %v211_v10 = vld [vmem:[%s584_s0 + $0x60] sm:$0xff] }
   0x6   :  { %208 = vst [vmem:[%s585_s1 + $0x40] sm:$0xff] %v207_v8  ;;  %v209_v9 = vld [vmem:[%s584_s0 + $0x130] sm:$0xff]  ;;  %v213_v11 = vld [vmem:[%s584_s0 + $0x120] sm:$0xff]  ;;  %212 = vst [vmem:[%s585_s1 + $0x50] sm:$0xff] %v211_v10 }
   0x7   :  { %210 = vst [vmem:[%s585_s1 + $0x100] sm:$0xff] %v209_v9  ;;  %214 = vst [vmem:[%s585_s1 + $0x110] sm:$0xff] %v213_v11  ;;  %v215_v12 = vld [vmem:[%s584_s0 + $0x50] sm:$0xff]  ;;  %v219_v14 = vld [vmem:[%s584_s0 + $0x40] sm:$0xff] }
   0x8   :  { %v217_v13 = vld [vmem:[%s584_s0 + $0x110] sm:$0xff]  ;;  %216 = vst [vmem:[%s585_s1 + $0x60] sm:$0xff] %v215_v12  ;;  %220 = vst [vmem:[%s585_s1 + $0x70] sm:$0xff] %v219_v14  ;;  %v221_v15 = vld [vmem:[%s584_s0 + $0x100] sm:$0xff] }
   0x9   :  { %218 = vst [vmem:[%s585_s1 + $0x120] sm:$0xff] %v217_v13  ;;  %v223_v16 = vld [vmem:[%s584_s0 + $0x30] sm:$0xff]  ;;  %222 = vst [vmem:[%s585_s1 + $0x130] sm:$0xff] %v221_v15  ;;  %v227_v18 = vld [vmem:[%s584_s0 + $0x20] sm:$0xff] }
   0xa   :  { %v225_v17 = vld [vmem:[%s584_s0 + $0xf0] sm:$0xff]  ;;  %224 = vst [vmem:[%s585_s1 + $0x80] sm:$0xff] %v223_v16  ;;  %v229_v19 = vld [vmem:[%s584_s0 + $0xe0] sm:$0xff]  ;;  %228 = vst [vmem:[%s585_s1 + $0x90] sm:$0xff] %v227_v18 }
   0xb   :  { %226 = vst [vmem:[%s585_s1 + $0x140] sm:$0xff] %v225_v17  ;;  %v231_v20 = vld [vmem:[%s584_s0 + $0x10] sm:$0xff]  ;;  %230 = vst [vmem:[%s585_s1 + $0x150] sm:$0xff] %v229_v19  ;;  %v89_v22 = vld [vmem:[%s584_s0] sm:$0xff] }
   0xc   :  { %232 = vst [vmem:[%s585_s1 + $0xa0] sm:$0xff] %v231_v20  ;;  %v233_v21 = vld [vmem:[%s584_s0 + $0xd0] sm:$0xff]  ;;  %v236_v23 = vld [vmem:[%s584_s0 + $0xc0] sm:$0xff]  ;;  %235 = vst [vmem:[%s585_s1 + $0xb0] sm:$0xff] %v89_v22 }
   0xd   :  { %234 = vst [vmem:[%s585_s1 + $0x160] sm:$0xff] %v233_v21  ;;  %237 = vst [vmem:[%s585_s1 + $0x170] sm:$0xff] %v236_v23  ;;  %v240_v25 = vld [vmem:[%s584_s0 + $0x178] sm:$0xff]  ;;  %v242_v26 = vld [vmem:[%s584_s0 + $0xa8] sm:$0xff] }
   0xe   :  { %239 = vst [vmem:[%s585_s1 + $0x8] sm:$0xff] %v238_v24  ;;  %241 = vst [vmem:[%s585_s1 + $0xc8] sm:$0xff] %v240_v25  ;;  %v244_v27 = vld [vmem:[%s584_s0 + $0x168] sm:$0xff]  ;;  %v246_v28 = vld [vmem:[%s584_s0 + $0x98] sm:$0xff] }
   0xf   :  { %243 = vst [vmem:[%s585_s1 + $0x18] sm:$0xff] %v242_v26  ;;  %v248_v29 = vld [vmem:[%s584_s0 + $0x158] sm:$0xff]  ;;  %245 = vst [vmem:[%s585_s1 + $0xd8] sm:$0xff] %v244_v27  ;;  %v250_v30 = vld [vmem:[%s584_s0 + $0x88] sm:$0xff] }
  0x10   :  { %247 = vst [vmem:[%s585_s1 + $0x28] sm:$0xff] %v246_v28  ;;  %249 = vst [vmem:[%s585_s1 + $0xe8] sm:$0xff] %v248_v29  ;;  %v252_v31 = vld [vmem:[%s584_s0 + $0x148] sm:$0xff]  ;;  %v254_v32 = vld [vmem:[%s584_s0 + $0x78] sm:$0xff] }
  0x11   :  { %251 = vst [vmem:[%s585_s1 + $0x38] sm:$0xff] %v250_v30  ;;  %253 = vst [vmem:[%s585_s1 + $0xf8] sm:$0xff] %v252_v31  ;;  %v256_v33 = vld [vmem:[%s584_s0 + $0x138] sm:$0xff]  ;;  %v258_v34 = vld [vmem:[%s584_s0 + $0x68] sm:$0xff] }
  0x12   :  { %255 = vst [vmem:[%s585_s1 + $0x48] sm:$0xff] %v254_v32  ;;  %v260_v35 = vld [vmem:[%s584_s0 + $0x128] sm:$0xff]  ;;  %257 = vst [vmem:[%s585_s1 + $0x108] sm:$0xff] %v256_v33  ;;  %v262_v36 = vld [vmem:[%s584_s0 + $0x58] sm:$0xff] }
  0x13   :  { %259 = vst [vmem:[%s585_s1 + $0x58] sm:$0xff] %v258_v34  ;;  %261 = vst [vmem:[%s585_s1 + $0x118] sm:$0xff] %v260_v35  ;;  %v264_v37 = vld [vmem:[%s584_s0 + $0x118] sm:$0xff]  ;;  %v266_v38 = vld [vmem:[%s584_s0 + $0x48] sm:$0xff] }
  0x14   :  { %263 = vst [vmem:[%s585_s1 + $0x68] sm:$0xff] %v262_v36  ;;  %265 = vst [vmem:[%s585_s1 + $0x128] sm:$0xff] %v264_v37  ;;  %v268_v39 = vld [vmem:[%s584_s0 + $0x108] sm:$0xff]  ;;  %v270_v40 = vld [vmem:[%s584_s0 + $0x38] sm:$0xff] }
  0x15   :  { %267 = vst [vmem:[%s585_s1 + $0x78] sm:$0xff] %v266_v38  ;;  %v272_v41 = vld [vmem:[%s584_s0 + $0xf8] sm:$0xff]  ;;  %269 = vst [vmem:[%s585_s1 + $0x138] sm:$0xff] %v268_v39  ;;  %v274_v42 = vld [vmem:[%s584_s0 + $0x28] sm:$0xff] }
  0x16   :  { %271 = vst [vmem:[%s585_s1 + $0x88] sm:$0xff] %v270_v40  ;;  %273 = vst [vmem:[%s585_s1 + $0x148] sm:$0xff] %v272_v41  ;;  %v276_v43 = vld [vmem:[%s584_s0 + $0xe8] sm:$0xff]  ;;  %v278_v44 = vld [vmem:[%s584_s0 + $0x18] sm:$0xff] }
  0x17   :  { %275 = vst [vmem:[%s585_s1 + $0x98] sm:$0xff] %v274_v42  ;;  %277 = vst [vmem:[%s585_s1 + $0x158] sm:$0xff] %v276_v43  ;;  %v280_v45 = vld [vmem:[%s584_s0 + $0xd8] sm:$0xff]  ;;  %v282_v46 = vld [vmem:[%s584_s0 + $0x8] sm:$0xff] }
  0x18   :  { %279 = vst [vmem:[%s585_s1 + $0xa8] sm:$0xff] %v278_v44  ;;  %v284_v47 = vld [vmem:[%s584_s0 + $0xc8] sm:$0xff]  ;;  %281 = vst [vmem:[%s585_s1 + $0x168] sm:$0xff] %v280_v45 }
  0x19   :  { %283 = vst [vmem:[%s585_s1 + $0xb8] sm:$0xff] %v282_v46  ;;  %285 = vst [vmem:[%s585_s1 + $0x178] sm:$0xff] %v284_v47 }

// kernel: fno2d_forward.12
= control target key start
LH: loop header
LB: loop body
LE: loop exit
PB: predicated region body
PF: predicated region fallthrough
CT: control target
= control target key end

     0   :  { %14 = vsyncpa [#allocation3], 0  ;;  %s1579_s0 = inlined_call_operand.vmem [shape: f32[160,128], index: 0, kind: input, shape index: {}]   ;;  %s1580_s1 = inlined_call_operand.vmem [shape: f32[160,128], index: 1, kind: input, shape index: {}]   ;;  %s1581_s2 = inlined_call_operand.vmem [shape: f32[160,128], index: 2, kind: input, shape index: {}]   ;;  %s1582_s3 = inlined_call_operand.vmem [shape: f32[128,128], index: 3, kind: input, shape index: {}]   ;;  %s1583_s4 = inlined_call_operand.vmem [shape: f32[1,128], index: 4, kind: input, shape index: {}]   ;;  %s1584_s5 = inlined_call_operand.vmem [shape: f32[128,128], index: 5, kind: input, shape index: {}]   ;;  %s1585_s6 = inlined_call_operand.vmem [shape: f32[1,128], index: 6, kind: input, shape index: {}]   ;;  %s1586_s7 = inlined_call_operand.hbm [shape: f32[160,128], index: 7, kind: output, shape index: {0}]   ;;  %s1587_s8 = inlined_call_operand.vmem [shape: f32[160,128], index: 8, kind: output, shape index: {1}]  }
   0x1   :  { %16 = vsyncpa [#allocation3 + $0x1], 0  ;;  %s1283_s27 = smov 0   ;;  %s1285_s28 = smov 0  }
   0x2   :  { %s1287_s29 = smov 0   ;;  %s1289_s30 = smov 0  }
   0x3 LB: > { %s1304_s9 = sadd.s32 4294967295, %s1233_s30   ;;  %s905_s10 = sadd.s32 4294967294, %s1233_s30   ;;  %s1233_s30 = sphi %s1289_s30, %s1593_s30   ;;  %s1229_s29 = sphi %s1287_s29, %s1592_s29   ;;  %s1225_s28 = sphi %s1285_s28, %s1591_s28   ;;  %s1221_s27 = sphi %s1283_s27, %s1590_s27  }
   0x4   : > { %s1308_s11 = sadd.s32 1, %s1233_s30   ;;  %s191_s12 = sadd.s32 1, %s1229_s29 }
   0x5   : > { %s188_s13 = ssub.s32 %s1233_s30, %s1308_s11  ;;  %p201_p0 = scmp.ne.s32.totalorder %s1229_s29, %s1225_s28 }
   0x6   : > { %p189_p1 = scmp.eq.s32.totalorder %s188_s13, 0  ;;  %p202_p2 = scmp.eq.s32.totalorder %s1304_s9, 1 }
   0x7   : > { %p207_p3 = scmp.ne.s32.totalorder %s1225_s28, %s1221_s27  ;;  %p208_p4 = scmp.eq.s32.totalorder %s905_s10, 1 }
   0x8   : > { %s1319_s14 = scalar_select %p189_p1, %s1229_s29, %s191_s12  }
   0x9   : > { %p1321_p5 = por %p202_p2, %p201_p0  ;;  %p1325_p6 = por %p208_p4, %p207_p3 }
   0xa   : > { %p908_p7 = scmp.ge.s32.totalorder %s1233_s30, 1  ;;  %p291_p8 = scmp.lt.s32.totalorder %s1233_s30, 3 }
   0xc   : > { %p292_p9 = pnand %p908_p7, %p291_p8 }
   0xd   : > { %v375_v0 = vld [vmem:[%s1582_s3] sm:$0xff] (!%p292_p9)  ;;  %v376_v1 = vld [vmem:[%s1582_s3 + $0x8] sm:$0xff] (!%p292_p9)  ;;  %v377_v2 = vld [vmem:[%s1582_s3 + $0x10] sm:$0xff] (!%p292_p9)  ;;  %s340_s23 = smul.u32 (!%p292_p9), 10, %s1304_s9  ;;  %s330_s17 = sand.u32 (!%p292_p9), 1, %s1225_s28  }
   0xe   : > { %295 = sbr.rel (%p292_p9) target bundleno = 519 (0x207), region = 48  ;;  %v1065_v3 = vpack.c.bf16 (!%p292_p9), %v376_v1, %v375_v0  ;;  %v378_v4 = vld [vmem:[%s1582_s3 + $0x18] sm:$0xff] (!%p292_p9)  ;;  %v379_v6 = vld [vmem:[%s1582_s3 + $0x20] sm:$0xff] (!%p292_p9)  ;;  %v380_v7 = vld [vmem:[%s1582_s3 + $0x28] sm:$0xff] (!%p292_p9)  ;;  %s1235_s10 = smov (!%p292_p9), [#allocation2]  }
   0xf   : > { %v1069_v5 = vpack.c.bf16 (!%p292_p9), %v378_v4, %v377_v2  ;;  %p341_p10 = scmp.lt.s32.totalorder (!%p292_p9), %s340_s23, 19  ;;  %v1073_v8 = vpack.c.bf16 (!%p292_p9), %v380_v7, %v379_v6  ;;  %v381_v9 = vld [vmem:[%s1582_s3 + $0x30] sm:$0xff] (!%p292_p9)  ;;  %v543_v10 = vld [vmem:[%s1584_s5] sm:$0xff] (!%p292_p9)  ;;  %v544_v11 = vld [vmem:[%s1584_s5 + $0x8] sm:$0xff] (!%p292_p9)  ;;  %s1129_s24 = smul.u32 (!%p292_p9), 80, %s330_s17 }
  0x10   : > { %1066 = vmatprep.subr.bf16.mxu0 (!%p292_p9), %v1065_v3  ;;  %v382_v12 = vld [vmem:[%s1582_s3 + $0x38] sm:$0xff] (!%p292_p9)  ;;  %v1097_v13 = vpack.c.bf16 (!%p292_p9), %v544_v11, %v543_v10  ;;  %v545_v14 = vld [vmem:[%s1584_s5 + $0x10] sm:$0xff] (!%p292_p9)  ;;  %v547_v18 = vld [vmem:[%s1584_s5 + $0x20] sm:$0xff] (!%p292_p9) }
  0x11   : > { %1068 = vmatpush3.bf16.msra.mxu0 (!%p292_p9), %v1065_v3  ;;  %v546_v15 = vld [vmem:[%s1584_s5 + $0x18] sm:$0xff] (!%p292_p9)  ;;  %v548_v19 = vld [vmem:[%s1584_s5 + $0x28] sm:$0xff] (!%p292_p9)  ;;  %v1077_v20 = vpack.c.bf16 (!%p292_p9), %v382_v12, %v381_v9  ;;  %v383_v21 = vld [vmem:[%s1582_s3 + $0x40] sm:$0xff] (!%p292_p9)  ;;  %s1484_s19 = scalar_lea.vmem (!%p292_p9), [#allocation2], %s1129_s24 }
  0x12   : > { %1070 = vmatprep.subr.bf16.mxu0 (!%p292_p9), %v1069_v5  ;;  %v1101_v16 = vpack.c.bf16 (!%p292_p9), %v546_v15, %v545_v14  ;;  %1098 = vmatprep.subr.bf16.mxu1 (!%p292_p9), %v1097_v13  ;;  %v384_v22 = vld [vmem:[%s1582_s3 + $0x48] sm:$0xff] (!%p292_p9)  ;;  %v1105_v23 = vpack.c.bf16 (!%p292_p9), %v548_v19, %v547_v18  ;;  %v549_v24 = vld [vmem:[%s1584_s5 + $0x30] sm:$0xff] (!%p292_p9)  ;;  %v550_v25 = vld [vmem:[%s1584_s5 + $0x38] sm:$0xff] (!%p292_p9) }
  0x13   : > { %1100 = vmatpush3.bf16.msra.mxu1 (!%p292_p9), %v1097_v13  ;;  %v1081_v26 = vpack.c.bf16 (!%p292_p9), %v384_v22, %v383_v21  ;;  %v385_v27 = vld [vmem:[%s1582_s3 + $0x50] sm:$0xff] (!%p292_p9)  ;;  %v386_v28 = vld [vmem:[%s1582_s3 + $0x58] sm:$0xff] (!%p292_p9)  ;;  %v1109_v29 = vpack.c.bf16 (!%p292_p9), %v550_v25, %v549_v24  ;;  %v551_v30 = vld [vmem:[%s1584_s5 + $0x40] sm:$0xff] (!%p292_p9) }
  0x14   : > { %1102 = vmatprep.subr.bf16.mxu1 (!%p292_p9), %v1101_v16  ;;  %v552_v31 = vld [vmem:[%s1584_s5 + $0x48] sm:$0xff] (!%p292_p9)  ;;  %v1085_v32 = vpack.c.bf16 (!%p292_p9), %v386_v28, %v385_v27  ;;  %v387_v33 = vld [vmem:[%s1582_s3 + $0x60] sm:$0xff] (!%p292_p9)  ;;  %v553_v36 = vld [vmem:[%s1584_s5 + $0x50] sm:$0xff] (!%p292_p9) }
  0x15   : > { %s1595_s23 = smov (!%p341_p10, %s340_s23), 19  ;;  %1072 = vmatpush3.bf16.msra.mxu0 %v1069_v5  ;;  %v388_v34 = vld [vmem:[%s1582_s3 + $0x68] sm:$0xff]  ;;  %v1113_v35 = vpack.c.bf16 %v552_v31, %v551_v30  ;;  %v554_v37 = vld [vmem:[%s1584_s5 + $0x58] sm:$0xff]  ;;  %v389_v39 = vld [vmem:[%s1582_s3 + $0x70] sm:$0xff] }
  0x16   : > { %s1362_s26 = sshll.u32 %s1595_s23, 3  ;;  %1074 = vmatprep.subr.bf16.mxu0 %v1073_v8  ;;  %v1089_v38 = vpack.c.bf16 %v388_v34, %v387_v33  ;;  %v390_v40 = vld [vmem:[%s1582_s3 + $0x78] sm:$0xff]  ;;  %v1117_v41 = vpack.c.bf16 %v554_v37, %v553_v36  ;;  %v555_v52 = vld [vmem:[%s1584_s5 + $0x60] sm:$0xff]  ;;  %v556_v53 = vld [vmem:[%s1584_s5 + $0x68] sm:$0xff]  ;;  %s790_s23 = sshll.u32 %s1484_s19, 4  ;;  %s1529_s23 = int_to_ptr.vmem [resolvable:$true] %s790_s23 }
  0x17   : > { %s1374_s20 = scalar_lea.vmem %s1579_s0, %s1362_s26  ;;  %1104 = vmatpush3.bf16.msra.mxu1 %v1101_v16  ;;  %v1093_v42 = vpack.c.bf16 %v390_v40, %v389_v39  ;;  %v1121_v54 = vpack.c.bf16 %v556_v53, %v555_v52  ;;  %v557_v55 = vld [vmem:[%s1584_s5 + $0x70] sm:$0xff]  ;;  %v558_v56 = vld [vmem:[%s1584_s5 + $0x78] sm:$0xff]  ;;  %v913_v58 = vld [vmem:[%s1583_s4] ss:$0 sm:$0xff]  ;;  %s1459_s22 = scalar_lea.vmem %s1580_s1, %s1362_s26 }
  0x18   : > { %v365_v17 = vld [vmem:[%s1374_s20] sm:$0xff]  ;;  %1106 = vmatprep.subr.bf16.mxu1 %v1105_v23  ;;  %v366_v43 = vld [vmem:[%s1374_s20 + $0x8] sm:$0xff]  ;;  %v367_v44 = vld [vmem:[%s1374_s20 + $0x10] sm:$0xff]  ;;  %v1125_v57 = vpack.c.bf16 %v558_v56, %v557_v55  ;;  %s1468_s12 = scalar_lea.vmem %s1581_s2, %s1362_s26  ;;  %s1481_s18 = scalar_lea.vmem %s1587_s8, %s1362_s26 }
  0x19   : > { %1003 = vmatprep.mubr.f32.mxu0 %v365_v17  ;;  %1076 = vmatpush3.bf16.msra.mxu0 %v1073_v8  ;;  %v368_v45 = vld [vmem:[%s1374_s20 + $0x18] sm:$0xff]  ;;  %v369_v46 = vld [vmem:[%s1374_s20 + $0x20] sm:$0xff]  ;;  %v370_v47 = vld [vmem:[%s1374_s20 + $0x28] sm:$0xff]  ;;  %s918_s26 = smul.u32 1280, %s1304_s9  ;;  %s1171_s25 = scalar_lea.vmem %s1529_s23, 1280 }
  0x1a   : > { %1078 = vmatprep.subr.bf16.mxu0 %v1077_v20  ;;  %v371_v48 = vld [vmem:[%s1374_s20 + $0x30] sm:$0xff]  ;;  %v372_v49 = vld [vmem:[%s1374_s20 + $0x38] sm:$0xff]  ;;  %v373_v50 = vld [vmem:[%s1374_s20 + $0x40] sm:$0xff]  ;;  %p1172_p11 = scmp.ne.s32.totalorder %s1529_s23, %s1171_s25 }
  0x1b   : > { %1108 = vmatpush3.bf16.msra.mxu1 %v1105_v23  ;;  %v374_v51 = vld [vmem:[%s1374_s20 + $0x48] sm:$0xff]  ;;  %v714_v55 = vld [vmem:[%s1459_s22 + $0x18] sm:$0xff]  ;;  %s1527_s24 = scalar_lea.hbm %s1586_s7, %s918_s26 }
  0x1c   : > { %1110 = vmatprep.subr.bf16.mxu1 %v1109_v29  ;;  %p1173_p12 = pnand %p1172_p11, %p1321_p5 }
  0x1d   : > { %1080 = vmatpush3.bf16.msra.mxu0 %v1077_v20 }
  0x1e   : > { %1082 = vmatprep.subr.bf16.mxu0 %v1081_v26  ;;  %p1174_p13 = pneg %p1173_p12 }
  0x1f   : > { %1112 = vmatpush3.bf16.msra.mxu1 %v1109_v29 }
  0x20   : > { %1114 = vmatprep.subr.bf16.mxu1 %v1113_v35 }
  0x21   : > { %1084 = vmatpush3.bf16.msra.mxu0 %v1081_v26 }
  0x22   : > { %1086 = vmatprep.subr.bf16.mxu0 %v1085_v32 }
  0x23   : > { %1116 = vmatpush3.bf16.msra.mxu1 %v1113_v35  ;;  %v1453_v35 = vld [vmem:[%s1585_s6] ss:$0 sm:$0xff] }
  0x24   : > { %1118 = vmatprep.subr.bf16.mxu1 %v1117_v41 }
  0x25   : > { %1088 = vmatpush3.bf16.msra.mxu0 %v1085_v32 }
  0x26   : > { %1090 = vmatprep.subr.bf16.mxu0 %v1089_v38 }
  0x27   : > { %1120 = vmatpush3.bf16.msra.mxu1 %v1117_v41  ;;  %v712_v41 = vld [vmem:[%s1459_s22 + $0x8] sm:$0xff] }
  0x28   : > { %1122 = vmatprep.subr.bf16.mxu1 %v1121_v54 }
  0x29   : > { %1092 = vmatpush3.bf16.msra.mxu0 %v1089_v38 }
  0x2a   : > { %1094 = vmatprep.subr.bf16.mxu0 %v1093_v42 }
  0x2b   : > { %1124 = vmatpush3.bf16.msra.mxu1 %v1121_v54 }
  0x2c   : > { %1126 = vmatprep.subr.bf16.mxu1 %v1125_v57 }
  0x2d   : > { %1096 = vmatpush3.bf16.msra.mxu0 %v1093_v42 }
  0x2f   : > { %1128 = vmatpush3.bf16.msra.mxu1 %v1125_v57 }
  0x30   : > { %1004 = vmatmul.mubr.f32.vlgmr.msra.gmra.mrb[0].mxu0 %v366_v43  ;;  %v711_v43 = vld [vmem:[%s1459_s22] sm:$0xff] }
  0x31   : > { %1006 = vmatprep.mubr.f32.mxu0 %v367_v44 }
  0x34   : > { %1007 = vmatmul.mubr.f32.gmra.mrb[2].mxu0 %v368_v45 }
  0x35   : > { %1009 = vmatprep.mubr.f32.mxu0 %v369_v46  ;;  %v742_v46 = vld [vmem:[%s1468_s12 + $0x8] sm:$0xff] }
  0x38   : > { %1010 = vmatmul.mubr.f32.gmra.mrb[4].mxu0 %v370_v47 }
  0x39   : > { %1012 = vmatprep.mubr.f32.mxu0 %v371_v48 }
  0x3c   : > { %1013 = vmatmul.mubr.f32.gmra.mrb[6].mxu0 %v372_v49 }
  0x3d   : > { %1015 = vmatprep.mubr.f32.mxu0 %v373_v50 }
  0x40   : > { %1016 = vmatmul.mubr.f32.gmra.mrb[8].mxu0 %v374_v51  ;;  %v741_v51 = vld [vmem:[%s1468_s12] sm:$0xff] }
 0x103   : > { %v1005_v59 = vpop.f32.mrb[0].mxu0 }
 0x104   : > { %v470_v60 = vadd.f32 %v1005_v59, %v913_v58  ;;  %v464_v61 = vpop.f32.mrb[1].mxu0 }
 0x105   : > { %v465_v62 = vadd.f32 %v913_v58, %v464_v61 }
 0x106   : > { %v524_v63 = vmul.f32 0.01, %v470_v60  ;;  %vm514_vm1 = vcmp.gt.f32.partialorder %v470_v60, 0.0 }
 0x107   : > { %v1008_v0 = vpop.f32.mrb[2].mxu0  ;;  %vm513_vm0 = vcmp.gt.f32.partialorder %v465_v62, 0.0  ;;  %v523_v1 = vmul.f32 0.01, %v465_v62 }
 0x108   : > { %v480_v2 = vadd.f32 %v1008_v0, %v913_v58  ;;  %v474_v3 = vpop.f32.mrb[3].mxu0  ;;  %v534_v7 = vsel %vm514_vm1, %v470_v60, %v524_v63 }
 0x109   : > { %v475_v4 = vadd.f32 %v913_v58, %v474_v3  ;;  %v533_v5 = vsel %vm513_vm0, %v465_v62, %v523_v1  ;;  %v744_v62 = vld [vmem:[%s1468_s12 + $0x18] sm:$0xff]  ;;  %v743_v3 = vld [vmem:[%s1468_s12 + $0x10] sm:$0xff] }
 0x10a   : > { %v526_v6 = vmul.f32 0.01, %v480_v2  ;;  %1050 = vmatprep.mubr.f32.mxu1 %v533_v5  ;;  %vm516_vm3 = vcmp.gt.f32.partialorder %v480_v2, 0.0 }
 0x10b   : > { %v525_v8 = vmul.f32 0.01, %v475_v4  ;;  %v1011_v9 = vpop.f32.mrb[4].mxu0  ;;  %1051 = vmatmul.mubr.f32.vlgmr.msra.gmra.mrb[0].mxu1 %v534_v7  ;;  %vm515_vm2 = vcmp.gt.f32.partialorder %v475_v4, 0.0  ;;  %v716_v7 = vld [vmem:[%s1459_s22 + $0x28] sm:$0xff] }
 0x10c   : > { %v490_v10 = vadd.f32 %v1011_v9, %v913_v58  ;;  %v484_v11 = vpop.f32.mrb[5].mxu0  ;;  %v536_v15 = vsel %vm516_vm3, %v480_v2, %v526_v6 }
 0x10d   : > { %v485_v12 = vadd.f32 %v913_v58, %v484_v11  ;;  %v535_v13 = vsel %vm515_vm2, %v475_v4, %v525_v8 }
 0x10e   : > { %v528_v14 = vmul.f32 0.01, %v490_v10  ;;  %1053 = vmatprep.mubr.f32.mxu1 %v535_v13  ;;  %vm518_vm5 = vcmp.gt.f32.partialorder %v490_v10, 0.0 }
 0x10f   : > { %v527_v16 = vmul.f32 0.01, %v485_v12  ;;  %v1014_v17 = vpop.f32.mrb[6].mxu0  ;;  %1054 = vmatmul.mubr.f32.gmra.mrb[2].mxu1 %v536_v15  ;;  %vm517_vm4 = vcmp.gt.f32.partialorder %v485_v12, 0.0 }
 0x110   : > { %v500_v18 = vadd.f32 %v1014_v17, %v913_v58  ;;  %v494_v19 = vpop.f32.mrb[7].mxu0  ;;  %v538_v23 = vsel %vm518_vm5, %v490_v10, %v528_v14  ;;  %v715_v10 = vld [vmem:[%s1459_s22 + $0x20] sm:$0xff]  ;;  %v746_v14 = vld [vmem:[%s1468_s12 + $0x28] sm:$0xff] }
 0x111   : > { %v495_v20 = vadd.f32 %v913_v58, %v494_v19  ;;  %v537_v21 = vsel %vm517_vm4, %v485_v12, %v527_v16  ;;  %v745_v19 = vld [vmem:[%s1468_s12 + $0x20] sm:$0xff] }
 0x112   : > { %v530_v22 = vmul.f32 0.01, %v500_v18  ;;  %1056 = vmatprep.mubr.f32.mxu1 %v537_v21  ;;  %vm520_vm7 = vcmp.gt.f32.partialorder %v500_v18, 0.0 }
 0x113   : > { %v529_v24 = vmul.f32 0.01, %v495_v20  ;;  %v1017_v25 = vpop.f32.mrb[8].mxu0  ;;  %1057 = vmatmul.mubr.f32.gmra.mrb[4].mxu1 %v538_v23  ;;  %vm519_vm6 = vcmp.gt.f32.partialorder %v495_v20, 0.0  ;;  %v718_v23 = vld [vmem:[%s1459_s22 + $0x38] sm:$0xff] }
 0x114   : > { %v510_v26 = vadd.f32 %v1017_v25, %v913_v58  ;;  %v504_v27 = vpop.f32.mrb[9].mxu0  ;;  %v540_v31 = vsel %vm520_vm7, %v500_v18, %v530_v22 }
 0x115   : > { %v505_v28 = vadd.f32 %v913_v58, %v504_v27  ;;  %v539_v29 = vsel %vm519_vm6, %v495_v20, %v529_v24  ;;  %v713_v58 = vld [vmem:[%s1459_s22 + $0x10] sm:$0xff] }
 0x116   : > { %v532_v30 = vmul.f32 0.01, %v510_v26  ;;  %1059 = vmatprep.mubr.f32.mxu1 %v539_v29  ;;  %vm522_vm9 = vcmp.gt.f32.partialorder %v510_v26, 0.0 }
 0x117   : > { %v531_v32 = vmul.f32 0.01, %v505_v28  ;;  %1060 = vmatmul.mubr.f32.gmra.mrb[6].mxu1 %v540_v31  ;;  %vm521_vm8 = vcmp.gt.f32.partialorder %v505_v28, 0.0 }
 0x118   : > { %v542_v34 = vsel %vm522_vm9, %v510_v26, %v532_v30  ;;  %v717_v26 = vld [vmem:[%s1459_s22 + $0x30] sm:$0xff]  ;;  %v748_v30 = vld [vmem:[%s1468_s12 + $0x38] sm:$0xff] }
 0x119   : > { %v541_v33 = vsel %vm521_vm8, %v505_v28, %v531_v32 }
 0x11a   : > { %1062 = vmatprep.mubr.f32.mxu1 %v541_v33 }
 0x11b   : > { %1063 = vmatmul.mubr.f32.gmra.mrb[8].mxu1 %v542_v34 }
 0x1de   : > { %v1052_v36 = vpop.f32.mrb[0].mxu1 }
 0x1df   : > { %v638_v37 = vadd.f32 %v1052_v36, %v1453_v35  ;;  %v632_v38 = vpop.f32.mrb[1].mxu1  ;;  %v747_v36 = vld [vmem:[%s1468_s12 + $0x30] sm:$0xff] }
 0x1e0   : > { %v633_v39 = vadd.f32 %v1453_v35, %v632_v38 }
 0x1e1   : > { %vm682_vm10 = vcmp.gt.f32.partialorder %v638_v37, 0.0  ;;  %v692_v40 = vmul.f32 0.01, %v638_v37 }
 0x1e2   : > { %vm681_vm11 = vcmp.gt.f32.partialorder %v633_v39, 0.0  ;;  %v691_v42 = vmul.f32 0.01, %v633_v39  ;;  %v1055_v44 = vpop.f32.mrb[2].mxu1 }
 0x1e3   : > { %v702_v45 = vsel %vm682_vm10, %v638_v37, %v692_v40  ;;  %v648_v47 = vadd.f32 %v1055_v44, %v1453_v35  ;;  %v642_v48 = vpop.f32.mrb[3].mxu1  ;;  %v720_v40 = vld [vmem:[%s1459_s22 + $0x48] sm:$0xff] }
 0x1e4   : > { %v722_v49 = vadd.f32 %v712_v41, %v702_v45  ;;  %v701_v50 = vsel %vm681_vm11, %v633_v39, %v691_v42  ;;  %v643_v52 = vadd.f32 %v1453_v35, %v642_v48  ;;  %v750_v45 = vld [vmem:[%s1468_s12 + $0x48] sm:$0xff]  ;;  %v749_v48 = vld [vmem:[%s1468_s12 + $0x40] sm:$0xff]  ;;  %s1175_s12 = sshll.u32 %s1235_s10, 4  ;;  %s1176_s12 = int_to_ptr.vmem [resolvable:$false] %s1175_s12 }
 0x1e5   : > { %v721_v53 = vadd.f32 %v711_v43, %v701_v50  ;;  %vm684_vm12 = vcmp.gt.f32.partialorder %v648_v47, 0.0  ;;  %v694_v54 = vmul.f32 0.01, %v648_v47  ;;  %v719_v43 = vld [vmem:[%s1459_s22 + $0x40] sm:$0xff]  ;;  %s1537_s22 = scalar_lea.sflag [#allocation3], %s330_s17  ;;  %s1177_s20 = scalar_lea.vmem %s1176_s12, 2560 }
 0x1e6   : > { %732 = vst [vmem:[%s1484_s19 + $0x8] sm:$0xff] %v722_v49  ;;  %v752_v56 = vmul.f32 %v742_v46, %v722_v49  ;;  %vm683_vm13 = vcmp.gt.f32.partialorder %v643_v52, 0.0  ;;  %v693_v57 = vmul.f32 0.01, %v643_v52  ;;  %v1058_v59 = vpop.f32.mrb[4].mxu1  ;;  %p1178_p0 = scmp.lt.s32.totalorder %s1529_s23, %s1176_s12  ;;  %p1179_p1 = scmp.lt.s32.totalorder %s1177_s20, %s1171_s25 }
 0x1e7   : > { %731 = vst [vmem:[%s1484_s19] sm:$0xff] %v721_v53  ;;  %v751_v60 = vmul.f32 %v741_v51, %v721_v53  ;;  %v704_v61 = vsel %vm684_vm12, %v648_v47, %v694_v54  ;;  %v658_v63 = vadd.f32 %v1058_v59, %v1453_v35  ;;  %v652_v0 = vpop.f32.mrb[5].mxu1 }
 0x1e8   : > { %762 = vst [vmem:[%s1481_s18 + $0x8] sm:$0xff] %v752_v56  ;;  %v724_v1 = vadd.f32 %v714_v55, %v704_v61  ;;  %v703_v2 = vsel %vm683_vm13, %v643_v52, %v693_v57  ;;  %v653_v4 = vadd.f32 %v1453_v35, %v652_v0  ;;  %p1180_p2 = por %p1179_p1, %p1178_p0 }
 0x1e9   : > { %761 = vst [vmem:[%s1481_s18] sm:$0xff] %v751_v60  ;;  %v723_v5 = vadd.f32 %v713_v58, %v703_v2  ;;  %vm686_vm14 = vcmp.gt.f32.partialorder %v658_v63, 0.0  ;;  %v696_v6 = vmul.f32 0.01, %v658_v63 }
 0x1ea   : > { %734 = vst [vmem:[%s1484_s19 + $0x18] sm:$0xff] %v724_v1  ;;  %v754_v8 = vmul.f32 %v744_v62, %v724_v1  ;;  %vm685_vm15 = vcmp.gt.f32.partialorder %v653_v4, 0.0  ;;  %v695_v9 = vmul.f32 0.01, %v653_v4  ;;  %v1061_v11 = vpop.f32.mrb[6].mxu1  ;;  %p1181_p3 = pnand %p1180_p2, %p1174_p13 }
 0x1eb   : > { %733 = vst [vmem:[%s1484_s19 + $0x10] sm:$0xff] %v723_v5  ;;  %v753_v12 = vmul.f32 %v743_v3, %v723_v5  ;;  %v706_v13 = vsel %vm686_vm14, %v658_v63, %v696_v6  ;;  %v668_v15 = vadd.f32 %v1061_v11, %v1453_v35  ;;  %v662_v16 = vpop.f32.mrb[7].mxu1 }
 0x1ec   : > { %764 = vst [vmem:[%s1481_s18 + $0x18] sm:$0xff] %v754_v8  ;;  %v726_v17 = vadd.f32 %v716_v7, %v706_v13  ;;  %v705_v18 = vsel %vm685_vm15, %v653_v4, %v695_v9  ;;  %v663_v20 = vadd.f32 %v1453_v35, %v662_v16 }
 0x1ed   : > { %763 = vst [vmem:[%s1481_s18 + $0x10] sm:$0xff] %v753_v12  ;;  %v725_v21 = vadd.f32 %v715_v10, %v705_v18  ;;  %vm688_vm0 = vcmp.gt.f32.partialorder %v668_v15, 0.0  ;;  %v698_v22 = vmul.f32 0.01, %v668_v15 }
 0x1ee   : > { %736 = vst [vmem:[%s1484_s19 + $0x28] sm:$0xff] %v726_v17  ;;  %v756_v24 = vmul.f32 %v746_v14, %v726_v17  ;;  %vm687_vm1 = vcmp.gt.f32.partialorder %v663_v20, 0.0  ;;  %v697_v25 = vmul.f32 0.01, %v663_v20  ;;  %v1064_v27 = vpop.f32.mrb[8].mxu1 }
 0x1ef   : > { %735 = vst [vmem:[%s1484_s19 + $0x20] sm:$0xff] %v725_v21  ;;  %v755_v28 = vmul.f32 %v745_v19, %v725_v21  ;;  %v708_v29 = vsel %vm688_vm0, %v668_v15, %v698_v22  ;;  %v678_v31 = vadd.f32 %v1064_v27, %v1453_v35  ;;  %v672_v32 = vpop.f32.mrb[9].mxu1 }
 0x1f0   : > { %766 = vst [vmem:[%s1481_s18 + $0x28] sm:$0xff] %v756_v24  ;;  %v728_v33 = vadd.f32 %v718_v23, %v708_v29  ;;  %v707_v34 = vsel %vm687_vm1, %v663_v20, %v697_v25  ;;  %v673_v37 = vadd.f32 %v1453_v35, %v672_v32 }
 0x1f1   : > { %765 = vst [vmem:[%s1481_s18 + $0x20] sm:$0xff] %v755_v28  ;;  %v727_v38 = vadd.f32 %v717_v26, %v707_v34  ;;  %vm690_vm2 = vcmp.gt.f32.partialorder %v678_v31, 0.0  ;;  %v700_v39 = vmul.f32 0.01, %v678_v31 }
 0x1f2   : > { %738 = vst [vmem:[%s1484_s19 + $0x38] sm:$0xff] %v728_v33  ;;  %v758_v41 = vmul.f32 %v748_v30, %v728_v33  ;;  %vm689_vm3 = vcmp.gt.f32.partialorder %v673_v37, 0.0  ;;  %v699_v42 = vmul.f32 0.01, %v673_v37 }
 0x1f3   : > { %737 = vst [vmem:[%s1484_s19 + $0x30] sm:$0xff] %v727_v38  ;;  %v757_v35 = vmul.f32 %v747_v36, %v727_v38  ;;  %v710_v44 = vsel %vm690_vm2, %v678_v31, %v700_v39 }
 0x1f4   : > { %768 = vst [vmem:[%s1481_s18 + $0x38] sm:$0xff] %v758_v41  ;;  %v730_v46 = vadd.f32 %v720_v40, %v710_v44  ;;  %v709_v47 = vsel %vm689_vm3, %v673_v37, %v699_v42 }
 0x1f5   : > { %767 = vst [vmem:[%s1481_s18 + $0x30] sm:$0xff] %v757_v35  ;;  %v729_v49 = vadd.f32 %v719_v43, %v709_v47 }
 0x1f6   : > { %740 = vst [vmem:[%s1484_s19 + $0x48] sm:$0xff] %v730_v46  ;;  %v760_v50 = vmul.f32 %v750_v45, %v730_v46 }
 0x1f7   : > { %739 = vst [vmem:[%s1484_s19 + $0x40] sm:$0xff] %v729_v49  ;;  %v759_v51 = vmul.f32 %v749_v48, %v729_v49 }
 0x1f8   : > { %770 = vst [vmem:[%s1481_s18 + $0x48] sm:$0xff] %v760_v50 }
 0x1f9   : > { %1184 = shalt.err (!%p1181_p3)
}
 0x1fa   : > { %s1185_s17 = scalar_lea.hbm %s1527_s24, 1280  ;;  %s1189_s26 = scalar_lea.hbm %s1586_s7, 2560 }
 0x1fb   : > { %p1186_p4 = scmp.ne.s32.totalorder %s1527_s24, %s1185_s17  ;;  %p1190_p9 = scmp.lt.u32.totalorder %s1527_s24, %s1586_s7 }
 0x1fc   : > { %p1191_p10 = scmp.lt.u32.totalorder %s1189_s26, %s1185_s17  ;;  %p1193_p12 = scmp.lt.u32.totalorder %s1185_s17, %s1527_s24 }
 0x1fd   : > { %p1187_p7 = pnand %p1186_p4, %p1321_p5 }
 0x1fe   : > { %p1192_p11 = por %p1191_p10, %p1190_p9 }
 0x1ff   : > { %p1188_p8 = pneg %p1187_p7 }
 0x200   : > { %p1194_p13 = por %p1193_p12, %p1192_p11 }
 0x202   : > { %p1195_p0 = pnand %p1194_p13, %p1188_p8 }
 0x204   : > { %1198 = shalt.err (!%p1195_p0)
}
 0x205   : > { %s1236_s25 = smov 128   ;;  %s1237_s10 = smov 8   ;;  %769 = vst [vmem:[%s1481_s18 + $0x40] sm:$0xff] %v759_v51 }
 0x206   : > { %1130 = dma.vmem_to_hbm [thread:$0]  (%p1321_p5), %s1529_s23, 1280, %s1527_s24, %s1537_s22, %s1236_s25, %s1236_s25, %s1237_s10  }
 0x207 PF: > { %p1136_p1 = scmp.ge.s32.totalorder %s1233_s30, 2  ;;  %s809_s12 = sand.u32 1, %s1221_s27  }
 0x208   : > { %s810_s20 = scalar_lea.sflag [#allocation3], %s809_s12 }
 0x209   : > { %p1133_p2 = pnand %p1136_p1, %p1325_p6 }
 0x20b   : > { %1216 = dma.done.wait (!%p1133_p2), %s810_s20, 1280  }
 0x20c   : > { %1218 = vsyncadd (!%p1133_p2), %s810_s20, 4294966016  ;;  %p19_p3 = scmp.ge.s32.totalorder %s1308_s11, 4   ;;  %s1590_s27 = smov %s1225_s28 }
 0x20d   : > { %s1591_s28 = smov %s1229_s29  ;;  %s1592_s29 = smov %s1319_s14 }
 0x20e   : > { %s1593_s30 = smov %s1308_s11  ;;  %21 = sbr.rel (!%p19_p3) target bundleno = 3 (0x3), region = 101 }
 0x215   :  { %823 = vsyncpa [#allocation3], 1 }
 0x216   :  { %825 = vsyncpa [#allocation3 + $0x1], 1 }

// kernel: fno2d_forward.18
= control target key start
LH: loop header
LB: loop body
LE: loop exit
PB: predicated region body
PF: predicated region fallthrough
CT: control target
= control target key end

     0   :  { %14 = vsyncpa [#allocation3], 0  ;;  %s1582_s0 = inlined_call_operand.vmem [shape: f32[160,128], index: 0, kind: input, shape index: {}]   ;;  %s1583_s1 = inlined_call_operand.vmem [shape: f32[160,128], index: 1, kind: input, shape index: {}]   ;;  %s1584_s2 = inlined_call_operand.vmem [shape: f32[160,128], index: 2, kind: input, shape index: {}]   ;;  %s1585_s3 = inlined_call_operand.vmem [shape: f32[128,128], index: 3, kind: input, shape index: {}]   ;;  %s1586_s4 = inlined_call_operand.vmem [shape: f32[1,128], index: 4, kind: input, shape index: {}]   ;;  %s1587_s5 = inlined_call_operand.vmem [shape: f32[128,128], index: 5, kind: input, shape index: {}]   ;;  %s1588_s6 = inlined_call_operand.vmem [shape: f32[1,128], index: 6, kind: input, shape index: {}]   ;;  %s1589_s7 = inlined_call_operand.vmem [shape: f32[160,128], index: 7, kind: output, shape index: {0}]   ;;  %s1590_s8 = inlined_call_operand.hbm [shape: f32[160,128], index: 8, kind: output, shape index: {1}]  }
   0x1   :  { %16 = vsyncpa [#allocation3 + $0x1], 0  ;;  %s1283_s27 = smov 0   ;;  %s1285_s28 = smov 0  }
   0x2   :  { %s1287_s29 = smov 0   ;;  %s1289_s30 = smov 0  }
   0x3 LB: > { %s1304_s9 = sadd.s32 4294967295, %s1233_s30   ;;  %s905_s10 = sadd.s32 4294967294, %s1233_s30   ;;  %s1233_s30 = sphi %s1289_s30, %s1596_s30   ;;  %s1229_s29 = sphi %s1287_s29, %s1595_s29   ;;  %s1225_s28 = sphi %s1285_s28, %s1594_s28   ;;  %s1221_s27 = sphi %s1283_s27, %s1593_s27  }
   0x4   : > { %s1308_s11 = sadd.s32 1, %s1233_s30   ;;  %s217_s12 = sadd.s32 1, %s1229_s29 }
   0x5   : > { %s214_s13 = ssub.s32 %s1233_s30, %s1308_s11  ;;  %p227_p0 = scmp.ne.s32.totalorder %s1229_s29, %s1225_s28 }
   0x6   : > { %p215_p1 = scmp.eq.s32.totalorder %s214_s13, 0  ;;  %p228_p2 = scmp.eq.s32.totalorder %s1304_s9, 1 }
   0x7   : > { %p233_p3 = scmp.ne.s32.totalorder %s1225_s28, %s1221_s27  ;;  %p234_p4 = scmp.eq.s32.totalorder %s905_s10, 1 }
   0x8   : > { %s1319_s14 = scalar_select %p215_p1, %s1229_s29, %s217_s12  }
   0x9   : > { %p1321_p5 = por %p228_p2, %p227_p0  ;;  %p1325_p6 = por %p234_p4, %p233_p3 }
   0xa   : > { %p908_p7 = scmp.ge.s32.totalorder %s1233_s30, 1  ;;  %p291_p8 = scmp.lt.s32.totalorder %s1233_s30, 3 }
   0xc   : > { %p292_p9 = pnand %p908_p7, %p291_p8 }
   0xd   : > { %v375_v0 = vld [vmem:[%s1585_s3] sm:$0xff] (!%p292_p9)  ;;  %v376_v1 = vld [vmem:[%s1585_s3 + $0x8] sm:$0xff] (!%p292_p9)  ;;  %v377_v2 = vld [vmem:[%s1585_s3 + $0x10] sm:$0xff] (!%p292_p9)  ;;  %s340_s23 = smul.u32 (!%p292_p9), 10, %s1304_s9  ;;  %s337_s19 = sand.u32 (!%p292_p9), 1, %s1225_s28  }
   0xe   : > { %295 = sbr.rel (%p292_p9) target bundleno = 520 (0x208), region = 48  ;;  %v1065_v3 = vpack.c.bf16 (!%p292_p9), %v376_v1, %v375_v0  ;;  %v378_v4 = vld [vmem:[%s1585_s3 + $0x18] sm:$0xff] (!%p292_p9)  ;;  %v379_v6 = vld [vmem:[%s1585_s3 + $0x20] sm:$0xff] (!%p292_p9)  ;;  %v380_v7 = vld [vmem:[%s1585_s3 + $0x28] sm:$0xff] (!%p292_p9)  ;;  %s1541_s24 = scalar_lea.sflag (!%p292_p9), [#allocation3], %s337_s19 }
   0xf   : > { %v1069_v5 = vpack.c.bf16 (!%p292_p9), %v378_v4, %v377_v2  ;;  %p341_p10 = scmp.lt.s32.totalorder (!%p292_p9), %s340_s23, 19  ;;  %v1073_v8 = vpack.c.bf16 (!%p292_p9), %v380_v7, %v379_v6  ;;  %v381_v9 = vld [vmem:[%s1585_s3 + $0x30] sm:$0xff] (!%p292_p9)  ;;  %v543_v10 = vld [vmem:[%s1587_s5] sm:$0xff] (!%p292_p9)  ;;  %v544_v11 = vld [vmem:[%s1587_s5 + $0x8] sm:$0xff] (!%p292_p9)  ;;  %s1471_s12 = smul.u32 (!%p292_p9), 80, %s337_s19 }
  0x10   : > { %1066 = vmatprep.subr.bf16.mxu0 (!%p292_p9), %v1065_v3  ;;  %v382_v12 = vld [vmem:[%s1585_s3 + $0x38] sm:$0xff] (!%p292_p9)  ;;  %v1097_v13 = vpack.c.bf16 (!%p292_p9), %v544_v11, %v543_v10  ;;  %v545_v14 = vld [vmem:[%s1587_s5 + $0x10] sm:$0xff] (!%p292_p9)  ;;  %v547_v18 = vld [vmem:[%s1587_s5 + $0x20] sm:$0xff] (!%p292_p9)  ;;  %s918_s18 = smul.u32 (!%p292_p9), 1280, %s1304_s9 }
  0x11   : > { %1068 = vmatpush3.bf16.msra.mxu0 (!%p292_p9), %v1065_v3  ;;  %v546_v15 = vld [vmem:[%s1587_s5 + $0x18] sm:$0xff] (!%p292_p9)  ;;  %v548_v19 = vld [vmem:[%s1587_s5 + $0x28] sm:$0xff] (!%p292_p9)  ;;  %v1077_v20 = vpack.c.bf16 (!%p292_p9), %v382_v12, %v381_v9  ;;  %v383_v21 = vld [vmem:[%s1585_s3 + $0x40] sm:$0xff] (!%p292_p9) }
  0x12   : > { %1070 = vmatprep.subr.bf16.mxu0 (!%p292_p9), %v1069_v5  ;;  %v1101_v16 = vpack.c.bf16 (!%p292_p9), %v546_v15, %v545_v14  ;;  %1098 = vmatprep.subr.bf16.mxu1 (!%p292_p9), %v1097_v13  ;;  %v384_v22 = vld [vmem:[%s1585_s3 + $0x48] sm:$0xff] (!%p292_p9)  ;;  %v1105_v23 = vpack.c.bf16 (!%p292_p9), %v548_v19, %v547_v18  ;;  %v549_v24 = vld [vmem:[%s1587_s5 + $0x30] sm:$0xff] (!%p292_p9)  ;;  %v550_v25 = vld [vmem:[%s1587_s5 + $0x38] sm:$0xff] (!%p292_p9) }
  0x13   : > { %1100 = vmatpush3.bf16.msra.mxu1 (!%p292_p9), %v1097_v13  ;;  %v1081_v26 = vpack.c.bf16 (!%p292_p9), %v384_v22, %v383_v21  ;;  %v385_v27 = vld [vmem:[%s1585_s3 + $0x50] sm:$0xff] (!%p292_p9)  ;;  %v386_v28 = vld [vmem:[%s1585_s3 + $0x58] sm:$0xff] (!%p292_p9)  ;;  %v1109_v29 = vpack.c.bf16 (!%p292_p9), %v550_v25, %v549_v24  ;;  %v551_v30 = vld [vmem:[%s1587_s5 + $0x40] sm:$0xff] (!%p292_p9) }
  0x14   : > { %1102 = vmatprep.subr.bf16.mxu1 (!%p292_p9), %v1101_v16  ;;  %v552_v31 = vld [vmem:[%s1587_s5 + $0x48] sm:$0xff] (!%p292_p9)  ;;  %v1085_v32 = vpack.c.bf16 (!%p292_p9), %v386_v28, %v385_v27  ;;  %v387_v33 = vld [vmem:[%s1585_s3 + $0x60] sm:$0xff] (!%p292_p9)  ;;  %v553_v36 = vld [vmem:[%s1587_s5 + $0x50] sm:$0xff] (!%p292_p9) }
  0x15   : > { %s1598_s23 = smov (!%p341_p10, %s340_s23), 19  ;;  %1072 = vmatpush3.bf16.msra.mxu0 %v1069_v5  ;;  %v388_v34 = vld [vmem:[%s1585_s3 + $0x68] sm:$0xff]  ;;  %v1113_v35 = vpack.c.bf16 %v552_v31, %v551_v30  ;;  %v554_v37 = vld [vmem:[%s1587_s5 + $0x58] sm:$0xff]  ;;  %v389_v39 = vld [vmem:[%s1585_s3 + $0x70] sm:$0xff] }
  0x16   : > { %s1362_s26 = sshll.u32 %s1598_s23, 3  ;;  %1074 = vmatprep.subr.bf16.mxu0 %v1073_v8  ;;  %v1089_v38 = vpack.c.bf16 %v388_v34, %v387_v33  ;;  %v390_v40 = vld [vmem:[%s1585_s3 + $0x78] sm:$0xff]  ;;  %v1117_v41 = vpack.c.bf16 %v554_v37, %v553_v36  ;;  %v555_v52 = vld [vmem:[%s1587_s5 + $0x60] sm:$0xff]  ;;  %v556_v53 = vld [vmem:[%s1587_s5 + $0x68] sm:$0xff] }
  0x17   : > { %s1374_s20 = scalar_lea.vmem %s1582_s0, %s1362_s26  ;;  %1104 = vmatpush3.bf16.msra.mxu1 %v1101_v16  ;;  %v1093_v42 = vpack.c.bf16 %v390_v40, %v389_v39  ;;  %v1121_v54 = vpack.c.bf16 %v556_v53, %v555_v52  ;;  %v557_v55 = vld [vmem:[%s1587_s5 + $0x70] sm:$0xff]  ;;  %v558_v56 = vld [vmem:[%s1587_s5 + $0x78] sm:$0xff]  ;;  %v913_v58 = vld [vmem:[%s1586_s4] ss:$0 sm:$0xff]  ;;  %s1459_s22 = scalar_lea.vmem %s1583_s1, %s1362_s26 }
  0x18   : > { %v365_v17 = vld [vmem:[%s1374_s20] sm:$0xff]  ;;  %1106 = vmatprep.subr.bf16.mxu1 %v1105_v23  ;;  %v366_v43 = vld [vmem:[%s1374_s20 + $0x8] sm:$0xff]  ;;  %v367_v44 = vld [vmem:[%s1374_s20 + $0x10] sm:$0xff]  ;;  %v1125_v57 = vpack.c.bf16 %v558_v56, %v557_v55  ;;  %s1466_s10 = scalar_lea.vmem %s1584_s2, %s1362_s26  ;;  %s1479_s17 = scalar_lea.vmem %s1589_s7, %s1362_s26 }
  0x19   : > { %1003 = vmatprep.mubr.f32.mxu0 %v365_v17  ;;  %1076 = vmatpush3.bf16.msra.mxu0 %v1073_v8  ;;  %v368_v45 = vld [vmem:[%s1374_s20 + $0x18] sm:$0xff]  ;;  %v369_v46 = vld [vmem:[%s1374_s20 + $0x20] sm:$0xff]  ;;  %v370_v47 = vld [vmem:[%s1374_s20 + $0x28] sm:$0xff]  ;;  %s1492_s26 = scalar_lea.vmem [#allocation2], %s1471_s12 }
  0x1a   : > { %1078 = vmatprep.subr.bf16.mxu0 %v1077_v20  ;;  %v371_v48 = vld [vmem:[%s1374_s20 + $0x30] sm:$0xff]  ;;  %v372_v49 = vld [vmem:[%s1374_s20 + $0x38] sm:$0xff]  ;;  %v373_v50 = vld [vmem:[%s1374_s20 + $0x40] sm:$0xff]  ;;  %s794_s23 = sshll.u32 %s1492_s26, 4  ;;  %s1534_s23 = int_to_ptr.vmem [resolvable:$true] %s794_s23 }
  0x1b   : > { %1108 = vmatpush3.bf16.msra.mxu1 %v1105_v23  ;;  %v374_v51 = vld [vmem:[%s1374_s20 + $0x48] sm:$0xff]  ;;  %v714_v55 = vld [vmem:[%s1459_s22 + $0x18] sm:$0xff]  ;;  %s1171_s25 = scalar_lea.vmem %s1534_s23, 1280 }
  0x1c   : > { %1110 = vmatprep.subr.bf16.mxu1 %v1109_v29  ;;  %p1172_p11 = scmp.ne.s32.totalorder %s1534_s23, %s1171_s25 }
  0x1d   : > { %1080 = vmatpush3.bf16.msra.mxu0 %v1077_v20 }
  0x1e   : > { %1082 = vmatprep.subr.bf16.mxu0 %v1081_v26  ;;  %p1173_p12 = pnand %p1172_p11, %p1321_p5 }
  0x1f   : > { %1112 = vmatpush3.bf16.msra.mxu1 %v1109_v29 }
  0x20   : > { %1114 = vmatprep.subr.bf16.mxu1 %v1113_v35  ;;  %p1174_p13 = pneg %p1173_p12 }
  0x21   : > { %1084 = vmatpush3.bf16.msra.mxu0 %v1081_v26 }
  0x22   : > { %1086 = vmatprep.subr.bf16.mxu0 %v1085_v32 }
  0x23   : > { %1116 = vmatpush3.bf16.msra.mxu1 %v1113_v35  ;;  %v1452_v35 = vld [vmem:[%s1588_s6] ss:$0 sm:$0xff] }
  0x24   : > { %1118 = vmatprep.subr.bf16.mxu1 %v1117_v41 }
  0x25   : > { %1088 = vmatpush3.bf16.msra.mxu0 %v1085_v32 }
  0x26   : > { %1090 = vmatprep.subr.bf16.mxu0 %v1089_v38 }
  0x27   : > { %1120 = vmatpush3.bf16.msra.mxu1 %v1117_v41  ;;  %v712_v41 = vld [vmem:[%s1459_s22 + $0x8] sm:$0xff] }
  0x28   : > { %1122 = vmatprep.subr.bf16.mxu1 %v1121_v54 }
  0x29   : > { %1092 = vmatpush3.bf16.msra.mxu0 %v1089_v38 }
  0x2a   : > { %1094 = vmatprep.subr.bf16.mxu0 %v1093_v42 }
  0x2b   : > { %1124 = vmatpush3.bf16.msra.mxu1 %v1121_v54 }
  0x2c   : > { %1126 = vmatprep.subr.bf16.mxu1 %v1125_v57 }
  0x2d   : > { %1096 = vmatpush3.bf16.msra.mxu0 %v1093_v42 }
  0x2f   : > { %1128 = vmatpush3.bf16.msra.mxu1 %v1125_v57 }
  0x30   : > { %1004 = vmatmul.mubr.f32.vlgmr.msra.gmra.mrb[0].mxu0 %v366_v43  ;;  %v711_v43 = vld [vmem:[%s1459_s22] sm:$0xff] }
  0x31   : > { %1006 = vmatprep.mubr.f32.mxu0 %v367_v44 }
  0x34   : > { %1007 = vmatmul.mubr.f32.gmra.mrb[2].mxu0 %v368_v45 }
  0x35   : > { %1009 = vmatprep.mubr.f32.mxu0 %v369_v46  ;;  %v742_v46 = vld [vmem:[%s1466_s10 + $0x8] sm:$0xff] }
  0x38   : > { %1010 = vmatmul.mubr.f32.gmra.mrb[4].mxu0 %v370_v47 }
  0x39   : > { %1012 = vmatprep.mubr.f32.mxu0 %v371_v48 }
  0x3c   : > { %1013 = vmatmul.mubr.f32.gmra.mrb[6].mxu0 %v372_v49 }
  0x3d   : > { %1015 = vmatprep.mubr.f32.mxu0 %v373_v50 }
  0x40   : > { %1016 = vmatmul.mubr.f32.gmra.mrb[8].mxu0 %v374_v51  ;;  %v741_v51 = vld [vmem:[%s1466_s10] sm:$0xff] }
 0x103   : > { %v1005_v59 = vpop.f32.mrb[0].mxu0 }
 0x104   : > { %v470_v60 = vadd.f32 %v1005_v59, %v913_v58  ;;  %v464_v61 = vpop.f32.mrb[1].mxu0 }
 0x105   : > { %v465_v62 = vadd.f32 %v913_v58, %v464_v61 }
 0x106   : > { %v524_v63 = vmul.f32 0.01, %v470_v60  ;;  %vm514_vm1 = vcmp.gt.f32.partialorder %v470_v60, 0.0 }
 0x107   : > { %v1008_v0 = vpop.f32.mrb[2].mxu0  ;;  %vm513_vm0 = vcmp.gt.f32.partialorder %v465_v62, 0.0  ;;  %v523_v1 = vmul.f32 0.01, %v465_v62 }
 0x108   : > { %v480_v2 = vadd.f32 %v1008_v0, %v913_v58  ;;  %v474_v3 = vpop.f32.mrb[3].mxu0  ;;  %v534_v7 = vsel %vm514_vm1, %v470_v60, %v524_v63 }
 0x109   : > { %v475_v4 = vadd.f32 %v913_v58, %v474_v3  ;;  %v533_v5 = vsel %vm513_vm0, %v465_v62, %v523_v1  ;;  %v744_v62 = vld [vmem:[%s1466_s10 + $0x18] sm:$0xff]  ;;  %v743_v3 = vld [vmem:[%s1466_s10 + $0x10] sm:$0xff] }
 0x10a   : > { %v526_v6 = vmul.f32 0.01, %v480_v2  ;;  %1050 = vmatprep.mubr.f32.mxu1 %v533_v5  ;;  %vm516_vm3 = vcmp.gt.f32.partialorder %v480_v2, 0.0 }
 0x10b   : > { %v525_v8 = vmul.f32 0.01, %v475_v4  ;;  %v1011_v9 = vpop.f32.mrb[4].mxu0  ;;  %1051 = vmatmul.mubr.f32.vlgmr.msra.gmra.mrb[0].mxu1 %v534_v7  ;;  %vm515_vm2 = vcmp.gt.f32.partialorder %v475_v4, 0.0  ;;  %v716_v7 = vld [vmem:[%s1459_s22 + $0x28] sm:$0xff] }
 0x10c   : > { %v490_v10 = vadd.f32 %v1011_v9, %v913_v58  ;;  %v484_v11 = vpop.f32.mrb[5].mxu0  ;;  %v536_v15 = vsel %vm516_vm3, %v480_v2, %v526_v6 }
 0x10d   : > { %v485_v12 = vadd.f32 %v913_v58, %v484_v11  ;;  %v535_v13 = vsel %vm515_vm2, %v475_v4, %v525_v8 }
 0x10e   : > { %v528_v14 = vmul.f32 0.01, %v490_v10  ;;  %1053 = vmatprep.mubr.f32.mxu1 %v535_v13  ;;  %vm518_vm5 = vcmp.gt.f32.partialorder %v490_v10, 0.0 }
 0x10f   : > { %v527_v16 = vmul.f32 0.01, %v485_v12  ;;  %v1014_v17 = vpop.f32.mrb[6].mxu0  ;;  %1054 = vmatmul.mubr.f32.gmra.mrb[2].mxu1 %v536_v15  ;;  %vm517_vm4 = vcmp.gt.f32.partialorder %v485_v12, 0.0 }
 0x110   : > { %v500_v18 = vadd.f32 %v1014_v17, %v913_v58  ;;  %v494_v19 = vpop.f32.mrb[7].mxu0  ;;  %v538_v23 = vsel %vm518_vm5, %v490_v10, %v528_v14  ;;  %v715_v10 = vld [vmem:[%s1459_s22 + $0x20] sm:$0xff]  ;;  %v746_v14 = vld [vmem:[%s1466_s10 + $0x28] sm:$0xff] }
 0x111   : > { %v495_v20 = vadd.f32 %v913_v58, %v494_v19  ;;  %v537_v21 = vsel %vm517_vm4, %v485_v12, %v527_v16  ;;  %v745_v19 = vld [vmem:[%s1466_s10 + $0x20] sm:$0xff] }
 0x112   : > { %v530_v22 = vmul.f32 0.01, %v500_v18  ;;  %1056 = vmatprep.mubr.f32.mxu1 %v537_v21  ;;  %vm520_vm7 = vcmp.gt.f32.partialorder %v500_v18, 0.0 }
 0x113   : > { %v529_v24 = vmul.f32 0.01, %v495_v20  ;;  %v1017_v25 = vpop.f32.mrb[8].mxu0  ;;  %1057 = vmatmul.mubr.f32.gmra.mrb[4].mxu1 %v538_v23  ;;  %vm519_vm6 = vcmp.gt.f32.partialorder %v495_v20, 0.0  ;;  %v718_v23 = vld [vmem:[%s1459_s22 + $0x38] sm:$0xff] }
 0x114   : > { %v510_v26 = vadd.f32 %v1017_v25, %v913_v58  ;;  %v504_v27 = vpop.f32.mrb[9].mxu0  ;;  %v540_v31 = vsel %vm520_vm7, %v500_v18, %v530_v22 }
 0x115   : > { %v505_v28 = vadd.f32 %v913_v58, %v504_v27  ;;  %v539_v29 = vsel %vm519_vm6, %v495_v20, %v529_v24  ;;  %v713_v58 = vld [vmem:[%s1459_s22 + $0x10] sm:$0xff] }
 0x116   : > { %v532_v30 = vmul.f32 0.01, %v510_v26  ;;  %1059 = vmatprep.mubr.f32.mxu1 %v539_v29  ;;  %vm522_vm9 = vcmp.gt.f32.partialorder %v510_v26, 0.0 }
 0x117   : > { %v531_v32 = vmul.f32 0.01, %v505_v28  ;;  %1060 = vmatmul.mubr.f32.gmra.mrb[6].mxu1 %v540_v31  ;;  %vm521_vm8 = vcmp.gt.f32.partialorder %v505_v28, 0.0 }
 0x118   : > { %v542_v34 = vsel %vm522_vm9, %v510_v26, %v532_v30  ;;  %v717_v26 = vld [vmem:[%s1459_s22 + $0x30] sm:$0xff]  ;;  %v748_v30 = vld [vmem:[%s1466_s10 + $0x38] sm:$0xff] }
 0x119   : > { %v541_v33 = vsel %vm521_vm8, %v505_v28, %v531_v32 }
 0x11a   : > { %1062 = vmatprep.mubr.f32.mxu1 %v541_v33 }
 0x11b   : > { %1063 = vmatmul.mubr.f32.gmra.mrb[8].mxu1 %v542_v34 }
 0x1de   : > { %v1052_v36 = vpop.f32.mrb[0].mxu1 }
 0x1df   : > { %v638_v37 = vadd.f32 %v1052_v36, %v1452_v35  ;;  %v632_v38 = vpop.f32.mrb[1].mxu1  ;;  %v747_v36 = vld [vmem:[%s1466_s10 + $0x30] sm:$0xff] }
 0x1e0   : > { %v633_v39 = vadd.f32 %v1452_v35, %v632_v38 }
 0x1e1   : > { %vm682_vm10 = vcmp.gt.f32.partialorder %v638_v37, 0.0  ;;  %v692_v40 = vmul.f32 0.01, %v638_v37 }
 0x1e2   : > { %vm681_vm11 = vcmp.gt.f32.partialorder %v633_v39, 0.0  ;;  %v691_v42 = vmul.f32 0.01, %v633_v39  ;;  %v1055_v44 = vpop.f32.mrb[2].mxu1 }
 0x1e3   : > { %v702_v45 = vsel %vm682_vm10, %v638_v37, %v692_v40  ;;  %v648_v47 = vadd.f32 %v1055_v44, %v1452_v35  ;;  %v642_v48 = vpop.f32.mrb[3].mxu1  ;;  %v720_v40 = vld [vmem:[%s1459_s22 + $0x48] sm:$0xff] }
 0x1e4   : > { %v722_v49 = vadd.f32 %v712_v41, %v702_v45  ;;  %v701_v50 = vsel %vm681_vm11, %v633_v39, %v691_v42  ;;  %v643_v52 = vadd.f32 %v1452_v35, %v642_v48  ;;  %v750_v45 = vld [vmem:[%s1466_s10 + $0x48] sm:$0xff]  ;;  %v749_v48 = vld [vmem:[%s1466_s10 + $0x40] sm:$0xff]  ;;  %s1235_s10 = smov [#allocation2]  }
 0x1e5   : > { %v721_v53 = vadd.f32 %v711_v43, %v701_v50  ;;  %vm684_vm12 = vcmp.gt.f32.partialorder %v648_v47, 0.0  ;;  %v694_v54 = vmul.f32 0.01, %v648_v47  ;;  %v719_v43 = vld [vmem:[%s1459_s22 + $0x40] sm:$0xff]  ;;  %s1532_s22 = scalar_lea.hbm %s1590_s8, %s918_s18  ;;  %s1175_s12 = sshll.u32 %s1235_s10, 4  ;;  %s1176_s12 = int_to_ptr.vmem [resolvable:$false] %s1175_s12 }
 0x1e6   : > { %732 = vst [vmem:[%s1479_s17 + $0x8] sm:$0xff] %v722_v49  ;;  %v752_v56 = vmul.f32 %v742_v46, %v722_v49  ;;  %vm683_vm13 = vcmp.gt.f32.partialorder %v643_v52, 0.0  ;;  %v693_v57 = vmul.f32 0.01, %v643_v52  ;;  %v1058_v59 = vpop.f32.mrb[4].mxu1  ;;  %s1177_s20 = scalar_lea.vmem %s1176_s12, 2560  ;;  %p1178_p0 = scmp.lt.s32.totalorder %s1534_s23, %s1176_s12 }
 0x1e7   : > { %731 = vst [vmem:[%s1479_s17] sm:$0xff] %v721_v53  ;;  %v751_v60 = vmul.f32 %v741_v51, %v721_v53  ;;  %v704_v61 = vsel %vm684_vm12, %v648_v47, %v694_v54  ;;  %v658_v63 = vadd.f32 %v1058_v59, %v1452_v35  ;;  %v652_v0 = vpop.f32.mrb[5].mxu1  ;;  %p1179_p1 = scmp.lt.s32.totalorder %s1177_s20, %s1171_s25 }
 0x1e8   : > { %762 = vst [vmem:[%s1492_s26 + $0x8] sm:$0xff] %v752_v56  ;;  %v724_v1 = vadd.f32 %v714_v55, %v704_v61  ;;  %v703_v2 = vsel %vm683_vm13, %v643_v52, %v693_v57  ;;  %v653_v4 = vadd.f32 %v1452_v35, %v652_v0 }
 0x1e9   : > { %761 = vst [vmem:[%s1492_s26] sm:$0xff] %v751_v60  ;;  %v723_v5 = vadd.f32 %v713_v58, %v703_v2  ;;  %vm686_vm14 = vcmp.gt.f32.partialorder %v658_v63, 0.0  ;;  %v696_v6 = vmul.f32 0.01, %v658_v63  ;;  %p1180_p2 = por %p1179_p1, %p1178_p0 }
 0x1ea   : > { %734 = vst [vmem:[%s1479_s17 + $0x18] sm:$0xff] %v724_v1  ;;  %v754_v8 = vmul.f32 %v744_v62, %v724_v1  ;;  %vm685_vm15 = vcmp.gt.f32.partialorder %v653_v4, 0.0  ;;  %v695_v9 = vmul.f32 0.01, %v653_v4  ;;  %v1061_v11 = vpop.f32.mrb[6].mxu1 }
 0x1eb   : > { %733 = vst [vmem:[%s1479_s17 + $0x10] sm:$0xff] %v723_v5  ;;  %v753_v12 = vmul.f32 %v743_v3, %v723_v5  ;;  %v706_v13 = vsel %vm686_vm14, %v658_v63, %v696_v6  ;;  %v668_v15 = vadd.f32 %v1061_v11, %v1452_v35  ;;  %v662_v16 = vpop.f32.mrb[7].mxu1  ;;  %p1181_p3 = pnand %p1180_p2, %p1174_p13 }
 0x1ec   : > { %764 = vst [vmem:[%s1492_s26 + $0x18] sm:$0xff] %v754_v8  ;;  %v726_v17 = vadd.f32 %v716_v7, %v706_v13  ;;  %v705_v18 = vsel %vm685_vm15, %v653_v4, %v695_v9  ;;  %v663_v20 = vadd.f32 %v1452_v35, %v662_v16 }
 0x1ed   : > { %763 = vst [vmem:[%s1492_s26 + $0x10] sm:$0xff] %v753_v12  ;;  %v725_v21 = vadd.f32 %v715_v10, %v705_v18  ;;  %vm688_vm0 = vcmp.gt.f32.partialorder %v668_v15, 0.0  ;;  %v698_v22 = vmul.f32 0.01, %v668_v15 }
 0x1ee   : > { %736 = vst [vmem:[%s1479_s17 + $0x28] sm:$0xff] %v726_v17  ;;  %v756_v24 = vmul.f32 %v746_v14, %v726_v17  ;;  %vm687_vm1 = vcmp.gt.f32.partialorder %v663_v20, 0.0  ;;  %v697_v25 = vmul.f32 0.01, %v663_v20  ;;  %v1064_v27 = vpop.f32.mrb[8].mxu1 }
 0x1ef   : > { %735 = vst [vmem:[%s1479_s17 + $0x20] sm:$0xff] %v725_v21  ;;  %v755_v28 = vmul.f32 %v745_v19, %v725_v21  ;;  %v708_v29 = vsel %vm688_vm0, %v668_v15, %v698_v22  ;;  %v678_v31 = vadd.f32 %v1064_v27, %v1452_v35  ;;  %v672_v32 = vpop.f32.mrb[9].mxu1 }
 0x1f0   : > { %766 = vst [vmem:[%s1492_s26 + $0x28] sm:$0xff] %v756_v24  ;;  %v728_v33 = vadd.f32 %v718_v23, %v708_v29  ;;  %v707_v34 = vsel %vm687_vm1, %v663_v20, %v697_v25  ;;  %v673_v37 = vadd.f32 %v1452_v35, %v672_v32 }
 0x1f1   : > { %765 = vst [vmem:[%s1492_s26 + $0x20] sm:$0xff] %v755_v28  ;;  %v727_v38 = vadd.f32 %v717_v26, %v707_v34  ;;  %vm690_vm2 = vcmp.gt.f32.partialorder %v678_v31, 0.0  ;;  %v700_v39 = vmul.f32 0.01, %v678_v31 }
 0x1f2   : > { %738 = vst [vmem:[%s1479_s17 + $0x38] sm:$0xff] %v728_v33  ;;  %v758_v41 = vmul.f32 %v748_v30, %v728_v33  ;;  %vm689_vm3 = vcmp.gt.f32.partialorder %v673_v37, 0.0  ;;  %v699_v42 = vmul.f32 0.01, %v673_v37 }
 0x1f3   : > { %737 = vst [vmem:[%s1479_s17 + $0x30] sm:$0xff] %v727_v38  ;;  %v757_v44 = vmul.f32 %v747_v36, %v727_v38  ;;  %v710_v35 = vsel %vm690_vm2, %v678_v31, %v700_v39 }
 0x1f4   : > { %768 = vst [vmem:[%s1492_s26 + $0x38] sm:$0xff] %v758_v41  ;;  %v730_v46 = vadd.f32 %v720_v40, %v710_v35  ;;  %v709_v47 = vsel %vm689_vm3, %v673_v37, %v699_v42 }
 0x1f5   : > { %767 = vst [vmem:[%s1492_s26 + $0x30] sm:$0xff] %v757_v44  ;;  %v729_v49 = vadd.f32 %v719_v43, %v709_v47 }
 0x1f6   : > { %740 = vst [vmem:[%s1479_s17 + $0x48] sm:$0xff] %v730_v46  ;;  %v760_v50 = vmul.f32 %v750_v45, %v730_v46 }
 0x1f7   : > { %739 = vst [vmem:[%s1479_s17 + $0x40] sm:$0xff] %v729_v49  ;;  %v759_v51 = vmul.f32 %v749_v48, %v729_v49 }
 0x1f8   : > { %770 = vst [vmem:[%s1492_s26 + $0x48] sm:$0xff] %v760_v50 }
 0x1f9   : > { %769 = vst [vmem:[%s1492_s26 + $0x40] sm:$0xff] %v759_v51 }
 0x1fa   : > { %1184 = shalt.err (!%p1181_p3)
}
 0x1fb   : > { %s1185_s19 = scalar_lea.hbm %s1532_s22, 1280  ;;  %s1189_s26 = scalar_lea.hbm %s1590_s8, 2560 }
 0x1fc   : > { %p1186_p4 = scmp.ne.s32.totalorder %s1532_s22, %s1185_s19  ;;  %p1190_p9 = scmp.lt.u32.totalorder %s1532_s22, %s1590_s8 }
 0x1fd   : > { %p1191_p10 = scmp.lt.u32.totalorder %s1189_s26, %s1185_s19  ;;  %p1193_p12 = scmp.lt.u32.totalorder %s1185_s19, %s1532_s22 }
 0x1fe   : > { %p1187_p7 = pnand %p1186_p4, %p1321_p5 }
 0x1ff   : > { %p1192_p11 = por %p1191_p10, %p1190_p9 }
 0x200   : > { %p1188_p8 = pneg %p1187_p7 }
 0x201   : > { %p1194_p13 = por %p1193_p12, %p1192_p11 }
 0x203   : > { %p1195_p0 = pnand %p1194_p13, %p1188_p8 }
 0x205   : > { %1198 = shalt.err (!%p1195_p0)
}
 0x206   : > { %s1236_s9 = smov 128   ;;  %s1237_s25 = smov 8  }
 0x207   : > { %1130 = dma.vmem_to_hbm [thread:$0]  (%p1321_p5), %s1534_s23, 1280, %s1532_s22, %s1541_s24, %s1236_s9, %s1236_s9, %s1237_s25  }
 0x208 PF: > { %p1136_p1 = scmp.ge.s32.totalorder %s1233_s30, 2  ;;  %s817_s10 = sand.u32 1, %s1221_s27  }
 0x209   : > { %s818_s12 = scalar_lea.sflag [#allocation3], %s817_s10 }
 0x20a   : > { %p1133_p2 = pnand %p1136_p1, %p1325_p6 }
 0x20c   : > { %1216 = dma.done.wait (!%p1133_p2), %s818_s12, 1280  }
 0x20d   : > { %1218 = vsyncadd (!%p1133_p2), %s818_s12, 4294966016  ;;  %p19_p3 = scmp.ge.s32.totalorder %s1308_s11, 4   ;;  %s1593_s27 = smov %s1225_s28 }
 0x20e   : > { %s1594_s28 = smov %s1229_s29  ;;  %s1595_s29 = smov %s1319_s14 }
 0x20f   : > { %s1596_s30 = smov %s1308_s11  ;;  %21 = sbr.rel (!%p19_p3) target bundleno = 3 (0x3), region = 101 }
 0x216   :  { %823 = vsyncpa [#allocation3], 1 }
 0x217   :  { %825 = vsyncpa [#allocation3 + $0x1], 1 }

// kernel: fno2d_forward.19
= control target key start
LH: loop header
LB: loop body
LE: loop exit
PB: predicated region body
PF: predicated region fallthrough
CT: control target
= control target key end

     0   :  { %s1352_s18 = smov 0   ;;  %s1756_s0 = inlined_call_operand.vmem [shape: f32[512,16], index: 0, kind: input, shape index: {}]   ;;  %s1757_s1 = inlined_call_operand.vmem [shape: f32[16,256], index: 1, kind: input, shape index: {}]   ;;  %s1758_s2 = inlined_call_operand.vmem [shape: f32[1,256], index: 2, kind: input, shape index: {}]   ;;  %s1759_s3 = inlined_call_operand.vmem [shape: f32[256,128], index: 3, kind: input, shape index: {}]   ;;  %s1760_s4 = inlined_call_operand.vmem [shape: f32[1,128], index: 4, kind: input, shape index: {}]   ;;  %s1761_s5 = inlined_call_operand.vmem [shape: f32[512,128], index: 5, kind: output, shape index: {}]  }
   0x1 LB: > { %s1174_s19 = sadd.s32 4294967295, %s1318_s18   ;;  %p1178_p0 = scmp.ge.s32.totalorder %s1318_s18, 1  ;;  %s1318_s18 = sphi %s1352_s18, %s15_s18  }
   0x2   : > { %p188_p1 = scmp.lt.s32.totalorder %s1318_s18, 3 }
   0x4   : > { %p189_p2 = pnand %p1178_p0, %p188_p1 }
   0x5   : > { %v261_v0 = vld [vmem:[%s1757_s1 + $0x8] sm:$0xff] (!%p189_p2)  ;;  %v263_v1 = vld [vmem:[%s1757_s1 + $0x18] sm:$0xff] (!%p189_p2)  ;;  %v260_v2 = vld [vmem:[%s1757_s1] sm:$0xff] (!%p189_p2)  ;;  %s1179_s26 = sshll.u32 (!%p189_p2), %s1174_s19, 5  ;;  %v1320_v5 = vmov (!%p189_p2), 0.0   ;;  %vm276_vm0 = vcmask (!%p189_p2), 130048  }
   0x6   : > { %192 = sbr.rel (%p189_p2) target bundleno = 575 (0x23f), region = 40  ;;  %v1218_v3 = vpack.c.bf16 (!%p189_p2), %v263_v1, %v261_v0  ;;  %v262_v4 = vld [vmem:[%s1757_s1 + $0x10] sm:$0xff] (!%p189_p2)  ;;  %437 = vmatprep.mubr.f32.mxu0 (!%p189_p2), %v1320_v5  ;;  %p217_p3 = scmp.lt.s32.totalorder (!%p189_p2), %s1179_s26, 63  ;;  %v822_v7 = vld [vmem:[%s1759_s3] sm:$0xff] (!%p189_p2)  ;;  %v823_v8 = vld [vmem:[%s1759_s3 + $0x8] sm:$0xff] (!%p189_p2)  ;;  %v1321_v9 = vmov (!%p189_p2), 0.0|0.0  }
   0x7   : > { %v1220_v6 = vpack.c.bf16 (!%p189_p2), %v262_v4, %v260_v2  ;;  %v1223_v10 = vpack.c.bf16 (!%p189_p2), %v823_v8, %v822_v7  ;;  %1270 = vmatprep.subr.bf16.mxu1 (!%p189_p2), %v1321_v9  ;;  %v824_v11 = vld [vmem:[%s1759_s3 + $0x10] sm:$0xff] (!%p189_p2)  ;;  %v825_v12 = vld [vmem:[%s1759_s3 + $0x18] sm:$0xff] (!%p189_p2)  ;;  %v826_v16 = vld [vmem:[%s1759_s3 + $0x20] sm:$0xff] (!%p189_p2) }
   0x8   : > { %1219 = vmatprep.subr.bf16.mxu0 (!%p189_p2), %v1218_v3  ;;  %v1226_v15 = vpack.c.bf16 (!%p189_p2), %v825_v12, %v824_v11  ;;  %v827_v17 = vld [vmem:[%s1759_s3 + $0x28] sm:$0xff] (!%p189_p2)  ;;  %v828_v20 = vld [vmem:[%s1759_s3 + $0x30] sm:$0xff] (!%p189_p2)  ;;  %v829_v21 = vld [vmem:[%s1759_s3 + $0x38] sm:$0xff] (!%p189_p2) }
   0x9   : > { %1221 = vmatpush1.bf16.msra.mxu0 (!%p189_p2), %v1220_v6  ;;  %1286 = vmatpush1.bf16.msra.mxu1 (!%p189_p2), %v1223_v10  ;;  %v1229_v19 = vpack.c.bf16 (!%p189_p2), %v827_v17, %v826_v16  ;;  %v1232_v23 = vpack.c.bf16 (!%p189_p2), %v829_v21, %v828_v20  ;;  %v830_v24 = vld [vmem:[%s1759_s3 + $0x40] sm:$0xff] (!%p189_p2)  ;;  %v831_v25 = vld [vmem:[%s1759_s3 + $0x48] sm:$0xff] (!%p189_p2)  ;;  %v832_v28 = vld [vmem:[%s1759_s3 + $0x50] sm:$0xff] (!%p189_p2) }
   0xa   : > { %1222 = vmatprep.subr.bf16.mxu0 (!%p189_p2), %v1321_v9  ;;  %1271 = vmatprep.subr.bf16.mxu1 (!%p189_p2), %v1321_v9  ;;  %v1235_v27 = vpack.c.bf16 (!%p189_p2), %v831_v25, %v830_v24  ;;  %v833_v29 = vld [vmem:[%s1759_s3 + $0x58] sm:$0xff] (!%p189_p2)  ;;  %v834_v32 = vld [vmem:[%s1759_s3 + $0x60] sm:$0xff] (!%p189_p2)  ;;  %v835_v33 = vld [vmem:[%s1759_s3 + $0x68] sm:$0xff] (!%p189_p2)  ;;  %v266_v25 = vlaneseq (!%p189_p2) }
   0xb   : > { %v1238_v31 = vpack.c.bf16 (!%p189_p2), %v833_v29, %v832_v28  ;;  %v1241_v35 = vpack.c.bf16 (!%p189_p2), %v835_v33, %v834_v32  ;;  %v836_v36 = vld [vmem:[%s1759_s3 + $0x70] sm:$0xff] (!%p189_p2)  ;;  %v837_v37 = vld [vmem:[%s1759_s3 + $0x78] sm:$0xff] (!%p189_p2)  ;;  %v838_v40 = vld [vmem:[%s1759_s3 + $0x80] sm:$0xff] (!%p189_p2) }
   0xc   : > { %v1244_v39 = vpack.c.bf16 (!%p189_p2), %v837_v37, %v836_v36  ;;  %v839_v41 = vld [vmem:[%s1759_s3 + $0x88] sm:$0xff] (!%p189_p2)  ;;  %v840_v44 = vld [vmem:[%s1759_s3 + $0x90] sm:$0xff] (!%p189_p2)  ;;  %v841_v45 = vld [vmem:[%s1759_s3 + $0x98] sm:$0xff] (!%p189_p2) }
   0xd   : > { %s1763_s26 = smov (!%p217_p3, %s1179_s26), 63  ;;  %1287 = vmatpush1.bf16.msra.mxu1 %v1226_v15  ;;  %v1247_v43 = vpack.c.bf16 %v839_v41, %v838_v40  ;;  %v1250_v47 = vpack.c.bf16 %v841_v45, %v840_v44  ;;  %v842_v48 = vld [vmem:[%s1759_s3 + $0xa0] sm:$0xff]  ;;  %v843_v49 = vld [vmem:[%s1759_s3 + $0xa8] sm:$0xff]  ;;  %v844_v52 = vld [vmem:[%s1759_s3 + $0xb0] sm:$0xff] }
   0xe   : > { %s1180_s8 = sshll.u32 %s1763_s26, 3  ;;  %1272 = vmatprep.subr.bf16.mxu1 %v1321_v9  ;;  %v1253_v51 = vpack.c.bf16 %v843_v49, %v842_v48  ;;  %v845_v53 = vld [vmem:[%s1759_s3 + $0xb8] sm:$0xff]  ;;  %v846_v56 = vld [vmem:[%s1759_s3 + $0xc0] sm:$0xff]  ;;  %v847_v57 = vld [vmem:[%s1759_s3 + $0xc8] sm:$0xff] }
   0xf   : > { %s1389_s11 = scalar_lea.vmem %s1756_s0, %s1180_s8  ;;  %v1256_v55 = vpack.c.bf16 %v845_v53, %v844_v52  ;;  %v1259_v59 = vpack.c.bf16 %v847_v57, %v846_v56  ;;  %v848_v60 = vld [vmem:[%s1759_s3 + $0xd0] sm:$0xff]  ;;  %v849_v61 = vld [vmem:[%s1759_s3 + $0xd8] sm:$0xff]  ;;  %v851_v11 = vld [vmem:[%s1759_s3 + $0xe8] sm:$0xff]  ;;  %s1687_s14 = scalar_lea.vmem %s1761_s5, %s1180_s8 }
  0x10   : > { %v228_v13 = vld [vmem:[%s1389_s11] sm:$0xff]  ;;  %v229_v14 = vld [vmem:[%s1389_s11 + $0x8] sm:$0xff]  ;;  %v230_v18 = vld [vmem:[%s1389_s11 + $0x10] sm:$0xff]  ;;  %v1262_v63 = vpack.c.bf16 %v849_v61, %v848_v60 }
  0x11   : > { %1183 = vmatmul.mubr.msk.f32.vlgmr.msra.gmra.mrb[0].mxu0 %vm276_vm0, %v228_v13  ;;  %1288 = vmatpush1.bf16.msra.mxu1 %v1229_v19  ;;  %v231_v22 = vld [vmem:[%s1389_s11 + $0x18] sm:$0xff]  ;;  %v232_v26 = vld [vmem:[%s1389_s11 + $0x20] sm:$0xff]  ;;  %v233_v30 = vld [vmem:[%s1389_s11 + $0x28] sm:$0xff] }
  0x12   : > { %443 = vmatprep.mubr.f32.mxu0 %v1320_v5  ;;  %1224 = vmatpush1.bf16.msra.mxu0 %v1223_v10  ;;  %v234_v34 = vld [vmem:[%s1389_s11 + $0x30] sm:$0xff]  ;;  %v235_v38 = vld [vmem:[%s1389_s11 + $0x38] sm:$0xff]  ;;  %v236_v42 = vld [vmem:[%s1389_s11 + $0x40] sm:$0xff] }
  0x13   : > { %1225 = vmatprep.subr.bf16.mxu0 %v1321_v9  ;;  %1273 = vmatprep.subr.bf16.mxu1 %v1321_v9  ;;  %v237_v46 = vld [vmem:[%s1389_s11 + $0x48] sm:$0xff]  ;;  %v238_v50 = vld [vmem:[%s1389_s11 + $0x50] sm:$0xff]  ;;  %v239_v54 = vld [vmem:[%s1389_s11 + $0x58] sm:$0xff] }
  0x14   : > { %v240_v58 = vld [vmem:[%s1389_s11 + $0x60] sm:$0xff]  ;;  %v241_v62 = vld [vmem:[%s1389_s11 + $0x68] sm:$0xff]  ;;  %v242_v0 = vld [vmem:[%s1389_s11 + $0x70] sm:$0xff] }
  0x15   : > { %1184 = vmatmul.mubr.msk.f32.gmra.mrb[2].mxu0 %vm276_vm0, %v229_v14  ;;  %1289 = vmatpush1.bf16.msra.mxu1 %v1232_v23  ;;  %v243_v1 = vld [vmem:[%s1389_s11 + $0x78] sm:$0xff]  ;;  %v244_v2 = vld [vmem:[%s1389_s11 + $0x80] sm:$0xff]  ;;  %v245_v3 = vld [vmem:[%s1389_s11 + $0x88] sm:$0xff] }
  0x16   : > { %449 = vmatprep.mubr.f32.mxu0 %v1320_v5  ;;  %1227 = vmatpush1.bf16.msra.mxu0 %v1226_v15  ;;  %v246_v4 = vld [vmem:[%s1389_s11 + $0x90] sm:$0xff]  ;;  %v247_v6 = vld [vmem:[%s1389_s11 + $0x98] sm:$0xff]  ;;  %v248_v7 = vld [vmem:[%s1389_s11 + $0xa0] sm:$0xff] }
  0x17   : > { %1228 = vmatprep.subr.bf16.mxu0 %v1321_v9  ;;  %1274 = vmatprep.subr.bf16.mxu1 %v1321_v9  ;;  %v249_v8 = vld [vmem:[%s1389_s11 + $0xa8] sm:$0xff]  ;;  %v850_v10 = vld [vmem:[%s1759_s3 + $0xe0] sm:$0xff]  ;;  %v250_v13 = vld [vmem:[%s1389_s11 + $0xb0] sm:$0xff] }
  0x18   : > { %v1265_v12 = vpack.c.bf16 %v851_v11, %v850_v10  ;;  %v852_v14 = vld [vmem:[%s1759_s3 + $0xf0] sm:$0xff]  ;;  %v853_v15 = vld [vmem:[%s1759_s3 + $0xf8] sm:$0xff]  ;;  %v256_v21 = vld [vmem:[%s1389_s11 + $0xe0] sm:$0xff] }
  0x19   : > { %1185 = vmatmul.mubr.msk.f32.gmra.mrb[4].mxu0 %vm276_vm0, %v230_v18  ;;  %1290 = vmatpush1.bf16.msra.mxu1 %v1235_v27  ;;  %v1268_v16 = vpack.c.bf16 %v853_v15, %v852_v14  ;;  %v251_v17 = vld [vmem:[%s1389_s11 + $0xb8] sm:$0xff]  ;;  %v252_v18 = vld [vmem:[%s1389_s11 + $0xc0] sm:$0xff] }
  0x1a   : > { %455 = vmatprep.mubr.f32.mxu0 %v1320_v5  ;;  %1230 = vmatpush1.bf16.msra.mxu0 %v1229_v19  ;;  %v254_v19 = vld [vmem:[%s1389_s11 + $0xd0] sm:$0xff]  ;;  %v255_v20 = vld [vmem:[%s1389_s11 + $0xd8] sm:$0xff]  ;;  %v264_v28 = vld [vmem:[%s1758_s2] sm:$0x3] }
  0x1b   : > { %1231 = vmatprep.subr.bf16.mxu0 %v1321_v9  ;;  %1275 = vmatprep.subr.bf16.mxu1 %v1321_v9  ;;  %v259_v24 = vld [vmem:[%s1389_s11 + $0xf8] sm:$0xff] }
  0x1d   : > { %1186 = vmatmul.mubr.msk.f32.gmra.mrb[6].mxu0 %vm276_vm0, %v231_v22  ;;  %1291 = vmatpush1.bf16.msra.mxu1 %v1238_v31  ;;  %v257_v22 = vld [vmem:[%s1389_s11 + $0xe8] sm:$0xff] }
  0x1e   : > { %461 = vmatprep.mubr.f32.mxu0 %v1320_v5  ;;  %1233 = vmatpush1.bf16.msra.mxu0 %v1232_v23  ;;  %v258_v23 = vld [vmem:[%s1389_s11 + $0xf0] sm:$0xff] }
  0x1f   : > { %1234 = vmatprep.subr.bf16.mxu0 %v1321_v9  ;;  %1276 = vmatprep.subr.bf16.mxu1 %v1321_v9 }
  0x21   : > { %1187 = vmatmul.mubr.msk.f32.gmra.mrb[8].mxu0 %vm276_vm0, %v232_v26  ;;  %1292 = vmatpush1.bf16.msra.mxu1 %v1241_v35  ;;  %v267_v26 = vshrl.u32 %v266_v25, 7 }
  0x22   : > { %467 = vmatprep.mubr.f32.mxu0 %v1320_v5  ;;  %1236 = vmatpush1.bf16.msra.mxu0 %v1235_v27 }
  0x23   : > { %1237 = vmatprep.subr.bf16.mxu0 %v1321_v9  ;;  %1277 = vmatprep.subr.bf16.mxu1 %v1321_v9  ;;  %v268_v27 = vsub.s32 0, %v267_v26  ;;  %v272_v29 = vsub.s32 1, %v267_v26 }
  0x25   : > { %1188 = vmatmul.mubr.msk.f32.gmra.mrb[10].mxu0 %vm276_vm0, %v233_v30  ;;  %1293 = vmatpush1.bf16.msra.mxu1 %v1244_v39  ;;  %v1609_v30 = vrot.slane %v264_v28, %v268_v27 }
  0x26   : > { %473 = vmatprep.mubr.f32.mxu0 %v1320_v5  ;;  %1239 = vmatpush1.bf16.msra.mxu0 %v1238_v31  ;;  %v1611_v31 = vrot.slane %v264_v28, %v272_v29 }
  0x27   : > { %1240 = vmatprep.subr.bf16.mxu0 %v1321_v9  ;;  %1278 = vmatprep.subr.bf16.mxu1 %v1321_v9 }
  0x29   : > { %1189 = vmatmul.mubr.msk.f32.gmra.mrb[12].mxu0 %vm276_vm0, %v234_v34  ;;  %1294 = vmatpush1.bf16.msra.mxu1 %v1247_v43 }
  0x2a   : > { %479 = vmatprep.mubr.f32.mxu0 %v1320_v5  ;;  %1242 = vmatpush1.bf16.msra.mxu0 %v1241_v35 }
  0x2b   : > { %1243 = vmatprep.subr.bf16.mxu0 %v1321_v9  ;;  %1279 = vmatprep.subr.bf16.mxu1 %v1321_v9 }
  0x2d   : > { %1190 = vmatmul.mubr.msk.f32.gmra.mrb[14].mxu0 %vm276_vm0, %v235_v38  ;;  %1295 = vmatpush1.bf16.msra.mxu1 %v1250_v47 }
  0x2e   : > { %485 = vmatprep.mubr.f32.mxu0 %v1320_v5  ;;  %1245 = vmatpush1.bf16.msra.mxu0 %v1244_v39 }
  0x2f   : > { %1246 = vmatprep.subr.bf16.mxu0 %v1321_v9  ;;  %1280 = vmatprep.subr.bf16.mxu1 %v1321_v9 }
  0x31   : > { %1191 = vmatmul.mubr.msk.f32.gmra.mrb[16].mxu0 %vm276_vm0, %v236_v42  ;;  %1296 = vmatpush1.bf16.msra.mxu1 %v1253_v51 }
  0x32   : > { %491 = vmatprep.mubr.f32.mxu0 %v1320_v5  ;;  %1248 = vmatpush1.bf16.msra.mxu0 %v1247_v43 }
  0x33   : > { %1249 = vmatprep.subr.bf16.mxu0 %v1321_v9  ;;  %1281 = vmatprep.subr.bf16.mxu1 %v1321_v9 }
  0x35   : > { %1192 = vmatmul.mubr.msk.f32.gmra.mrb[18].mxu0 %vm276_vm0, %v237_v46  ;;  %1297 = vmatpush1.bf16.msra.mxu1 %v1256_v55 }
  0x36   : > { %497 = vmatprep.mubr.f32.mxu0 %v1320_v5  ;;  %1251 = vmatpush1.bf16.msra.mxu0 %v1250_v47 }
  0x37   : > { %1252 = vmatprep.subr.bf16.mxu0 %v1321_v9  ;;  %1282 = vmatprep.subr.bf16.mxu1 %v1321_v9 }
  0x39   : > { %1193 = vmatmul.mubr.msk.f32.gmra.mrb[20].mxu0 %vm276_vm0, %v238_v50  ;;  %1298 = vmatpush1.bf16.msra.mxu1 %v1259_v59 }
  0x3a   : > { %503 = vmatprep.mubr.f32.mxu0 %v1320_v5  ;;  %1254 = vmatpush1.bf16.msra.mxu0 %v1253_v51 }
  0x3b   : > { %1255 = vmatprep.subr.bf16.mxu0 %v1321_v9  ;;  %1283 = vmatprep.subr.bf16.mxu1 %v1321_v9 }
  0x3d   : > { %1194 = vmatmul.mubr.msk.f32.gmra.mrb[22].mxu0 %vm276_vm0, %v239_v54  ;;  %1299 = vmatpush1.bf16.msra.mxu1 %v1262_v63 }
  0x3e   : > { %509 = vmatprep.mubr.f32.mxu0 %v1320_v5  ;;  %1257 = vmatpush1.bf16.msra.mxu0 %v1256_v55 }
  0x3f   : > { %1258 = vmatprep.subr.bf16.mxu0 %v1321_v9  ;;  %1284 = vmatprep.subr.bf16.mxu1 %v1321_v9 }
  0x41   : > { %1195 = vmatmul.mubr.msk.f32.gmra.mrb[24].mxu0 %vm276_vm0, %v240_v58  ;;  %1300 = vmatpush1.bf16.msra.mxu1 %v1265_v12 }
  0x42   : > { %515 = vmatprep.mubr.f32.mxu0 %v1320_v5  ;;  %1260 = vmatpush1.bf16.msra.mxu0 %v1259_v59 }
  0x43   : > { %1261 = vmatprep.subr.bf16.mxu0 %v1321_v9  ;;  %1285 = vmatprep.subr.bf16.mxu1 %v1321_v9 }
  0x45   : > { %1196 = vmatmul.mubr.msk.f32.gmra.mrb[26].mxu0 %vm276_vm0, %v241_v62  ;;  %1301 = vmatpush1.bf16.msra.mxu1 %v1268_v16 }
  0x46   : > { %521 = vmatprep.mubr.f32.mxu0 %v1320_v5  ;;  %1263 = vmatpush1.bf16.msra.mxu0 %v1262_v63 }
  0x47   : > { %1264 = vmatprep.subr.bf16.mxu0 %v1321_v9 }
  0x49   : > { %1197 = vmatmul.mubr.msk.f32.gmra.mrb[28].mxu0 %vm276_vm0, %v242_v0 }
  0x4a   : > { %527 = vmatprep.mubr.f32.mxu0 %v1320_v5  ;;  %1266 = vmatpush1.bf16.msra.mxu0 %v1265_v12 }
  0x4b   : > { %1267 = vmatprep.subr.bf16.mxu0 %v1321_v9  ;;  %v253_v9 = vld [vmem:[%s1389_s11 + $0xc8] sm:$0xff] }
  0x4d   : > { %1198 = vmatmul.mubr.msk.f32.gmra.mrb[30].mxu0 %vm276_vm0, %v243_v1 }
  0x4e   : > { %533 = vmatprep.mubr.f32.mxu0 %v1320_v5  ;;  %1269 = vmatpush1.bf16.msra.mxu0 %v1268_v16 }
  0x51   : > { %1199 = vmatmul.mubr.msk.f32.gmra.mrb[32].mxu0 %vm276_vm0, %v244_v2 }
  0x52   : > { %539 = vmatprep.mubr.f32.mxu0 %v1320_v5 }
  0x55   : > { %1200 = vmatmul.mubr.msk.f32.gmra.mrb[34].mxu0 %vm276_vm0, %v245_v3 }
  0x56   : > { %545 = vmatprep.mubr.f32.mxu0 %v1320_v5 }
  0x59   : > { %1201 = vmatmul.mubr.msk.f32.gmra.mrb[36].mxu0 %vm276_vm0, %v246_v4 }
  0x5a   : > { %551 = vmatprep.mubr.f32.mxu0 %v1320_v5 }
  0x5d   : > { %1202 = vmatmul.mubr.msk.f32.gmra.mrb[38].mxu0 %vm276_vm0, %v247_v6 }
  0x5e   : > { %557 = vmatprep.mubr.f32.mxu0 %v1320_v5 }
  0x61   : > { %1203 = vmatmul.mubr.msk.f32.gmra.mrb[40].mxu0 %vm276_vm0, %v248_v7 }
  0x62   : > { %563 = vmatprep.mubr.f32.mxu0 %v1320_v5 }
  0x65   : > { %1204 = vmatmul.mubr.msk.f32.gmra.mrb[42].mxu0 %vm276_vm0, %v249_v8 }
  0x66   : > { %569 = vmatprep.mubr.f32.mxu0 %v1320_v5 }
  0x69   : > { %1205 = vmatmul.mubr.msk.f32.gmra.mrb[44].mxu0 %vm276_vm0, %v250_v13 }
  0x6a   : > { %575 = vmatprep.mubr.f32.mxu0 %v1320_v5 }
  0x6d   : > { %1206 = vmatmul.mubr.msk.f32.gmra.mrb[46].mxu0 %vm276_vm0, %v251_v17 }
  0x6e   : > { %581 = vmatprep.mubr.f32.mxu0 %v1320_v5 }
  0x71   : > { %1207 = vmatmul.mubr.msk.f32.gmra.mrb[48].mxu0 %vm276_vm0, %v252_v18 }
  0x72   : > { %587 = vmatprep.mubr.f32.mxu0 %v1320_v5 }
  0x75   : > { %1208 = vmatmul.mubr.msk.f32.gmra.mrb[50].mxu0 %vm276_vm0, %v253_v9 }
  0x76   : > { %593 = vmatprep.mubr.f32.mxu0 %v1320_v5 }
  0x79   : > { %1209 = vmatmul.mubr.msk.f32.gmra.mrb[52].mxu0 %vm276_vm0, %v254_v19 }
  0x7a   : > { %599 = vmatprep.mubr.f32.mxu0 %v1320_v5 }
  0x7d   : > { %1210 = vmatmul.mubr.msk.f32.gmra.mrb[54].mxu0 %vm276_vm0, %v255_v20 }
  0x7e   : > { %605 = vmatprep.mubr.f32.mxu0 %v1320_v5 }
  0x81   : > { %1211 = vmatmul.mubr.msk.f32.gmra.mrb[56].mxu0 %vm276_vm0, %v256_v21 }
  0x82   : > { %611 = vmatprep.mubr.f32.mxu0 %v1320_v5 }
  0x85   : > { %1212 = vmatmul.mubr.msk.f32.gmra.mrb[58].mxu0 %vm276_vm0, %v257_v22 }
  0x86   : > { %617 = vmatprep.mubr.f32.mxu0 %v1320_v5 }
  0x89   : > { %1213 = vmatmul.mubr.msk.f32.gmra.mrb[60].mxu0 %vm276_vm0, %v258_v23 }
  0x8a   : > { %623 = vmatprep.mubr.f32.mxu0 %v1320_v5 }
  0x8d   : > { %1214 = vmatmul.mubr.msk.f32.gmra.mrb[62].mxu0 %vm276_vm0, %v259_v24 }
  0xe4   : > { %v439_v32 = vpop.f32.mrb[0].mxu0 }
  0xe5   : > { %v440_v33 = vadd.f32 %v439_v32, %v1609_v30  ;;  %v441_v34 = vpop.f32.mrb[1].mxu0 }
  0xe6   : > { %v442_v5 = vadd.f32 %v441_v34, %v1611_v31 }
  0xe7   : > { %v694_v35 = vmul.f32 0.01, %v440_v33  ;;  %vm630_vm1 = vcmp.gt.f32.partialorder %v440_v33, 0.0 }
  0xe8   : > { %v695_v36 = vmul.f32 0.01, %v442_v5  ;;  %v445_v37 = vpop.f32.mrb[2].mxu0  ;;  %vm631_vm2 = vcmp.gt.f32.partialorder %v442_v5, 0.0 }
  0xe9   : > { %v446_v38 = vadd.f32 %v445_v37, %v1609_v30  ;;  %v447_v39 = vpop.f32.mrb[3].mxu0  ;;  %v758_v42 = vsel %vm630_vm1, %v440_v33, %v694_v35 }
  0xea   : > { %v448_v40 = vadd.f32 %v447_v39, %v1611_v31  ;;  %v759_v41 = vsel %vm631_vm2, %v442_v5, %v695_v36 }
  0xeb   : > { %v696_v43 = vmul.f32 0.01, %v446_v38  ;;  %925 = vmatprep.mubr.f32.mxu0 %v759_v41  ;;  %vm632_vm4 = vcmp.gt.f32.partialorder %v446_v38, 0.0 }
  0xec   : > { %v697_v44 = vmul.f32 0.01, %v448_v40  ;;  %v451_v45 = vpop.f32.mrb[4].mxu0  ;;  %926 = vmatmul.mubr.f32.vlgmr.msra.gmra.mrb[64].mxu0 %v758_v42  ;;  %vm633_vm3 = vcmp.gt.f32.partialorder %v448_v40, 0.0 }
  0xed   : > { %v452_v46 = vadd.f32 %v451_v45, %v1609_v30  ;;  %v453_v47 = vpop.f32.mrb[5].mxu0  ;;  %v760_v51 = vsel %vm632_vm4, %v446_v38, %v696_v43 }
  0xee   : > { %v454_v48 = vadd.f32 %v453_v47, %v1611_v31  ;;  %v761_v49 = vsel %vm633_vm3, %v448_v40, %v697_v44 }
  0xef   : > { %v698_v50 = vmul.f32 0.01, %v452_v46  ;;  %930 = vmatprep.mubr.f32.mxu0 %v761_v49  ;;  %vm634_vm6 = vcmp.gt.f32.partialorder %v452_v46, 0.0 }
  0xf0   : > { %v699_v52 = vmul.f32 0.01, %v454_v48  ;;  %v457_v53 = vpop.f32.mrb[6].mxu0  ;;  %931 = vmatmul.mubr.f32.gmra.mrb[66].mxu0 %v760_v51  ;;  %vm635_vm5 = vcmp.gt.f32.partialorder %v454_v48, 0.0 }
  0xf1   : > { %v458_v54 = vadd.f32 %v457_v53, %v1609_v30  ;;  %v459_v55 = vpop.f32.mrb[7].mxu0  ;;  %v762_v59 = vsel %vm634_vm6, %v452_v46, %v698_v50 }
  0xf2   : > { %v460_v56 = vadd.f32 %v459_v55, %v1611_v31  ;;  %v763_v57 = vsel %vm635_vm5, %v454_v48, %v699_v52 }
  0xf3   : > { %v700_v58 = vmul.f32 0.01, %v458_v54  ;;  %935 = vmatprep.mubr.f32.mxu0 %v763_v57  ;;  %vm636_vm8 = vcmp.gt.f32.partialorder %v458_v54, 0.0 }
  0xf4   : > { %v701_v60 = vmul.f32 0.01, %v460_v56  ;;  %v463_v61 = vpop.f32.mrb[8].mxu0  ;;  %936 = vmatmul.mubr.f32.gmra.mrb[68].mxu0 %v762_v59  ;;  %vm637_vm7 = vcmp.gt.f32.partialorder %v460_v56, 0.0 }
  0xf5   : > { %v464_v62 = vadd.f32 %v463_v61, %v1609_v30  ;;  %v465_v63 = vpop.f32.mrb[9].mxu0  ;;  %v764_v3 = vsel %vm636_vm8, %v458_v54, %v700_v58 }
  0xf6   : > { %v466_v0 = vadd.f32 %v465_v63, %v1611_v31  ;;  %v765_v1 = vsel %vm637_vm7, %v460_v56, %v701_v60 }
  0xf7   : > { %v702_v2 = vmul.f32 0.01, %v464_v62  ;;  %940 = vmatprep.mubr.f32.mxu0 %v765_v1  ;;  %vm638_vm10 = vcmp.gt.f32.partialorder %v464_v62, 0.0 }
  0xf8   : > { %v703_v4 = vmul.f32 0.01, %v466_v0  ;;  %v469_v6 = vpop.f32.mrb[10].mxu0  ;;  %941 = vmatmul.mubr.f32.gmra.mrb[70].mxu0 %v764_v3  ;;  %vm639_vm9 = vcmp.gt.f32.partialorder %v466_v0, 0.0 }
  0xf9   : > { %v470_v7 = vadd.f32 %v469_v6, %v1609_v30  ;;  %v471_v8 = vpop.f32.mrb[11].mxu0  ;;  %v766_v13 = vsel %vm638_vm10, %v464_v62, %v702_v2 }
  0xfa   : > { %v472_v10 = vadd.f32 %v471_v8, %v1611_v31  ;;  %v767_v11 = vsel %vm639_vm9, %v466_v0, %v703_v4 }
  0xfb   : > { %v704_v12 = vmul.f32 0.01, %v470_v7  ;;  %945 = vmatprep.mubr.f32.mxu0 %v767_v11  ;;  %vm640_vm12 = vcmp.gt.f32.partialorder %v470_v7, 0.0 }
  0xfc   : > { %v705_v14 = vmul.f32 0.01, %v472_v10  ;;  %v475_v15 = vpop.f32.mrb[12].mxu0  ;;  %946 = vmatmul.mubr.f32.gmra.mrb[72].mxu0 %v766_v13  ;;  %vm641_vm11 = vcmp.gt.f32.partialorder %v472_v10, 0.0 }
  0xfd   : > { %v476_v16 = vadd.f32 %v475_v15, %v1609_v30  ;;  %v477_v17 = vpop.f32.mrb[13].mxu0  ;;  %v768_v20 = vsel %vm640_vm12, %v470_v7, %v704_v12 }
  0xfe   : > { %v478_v18 = vadd.f32 %v477_v17, %v1611_v31  ;;  %v769_v9 = vsel %vm641_vm11, %v472_v10, %v705_v14 }
  0xff   : > { %v706_v19 = vmul.f32 0.01, %v476_v16  ;;  %950 = vmatprep.mubr.f32.mxu0 %v769_v9  ;;  %vm642_vm14 = vcmp.gt.f32.partialorder %v476_v16, 0.0 }
 0x100   : > { %v707_v21 = vmul.f32 0.01, %v478_v18  ;;  %v481_v22 = vpop.f32.mrb[14].mxu0  ;;  %951 = vmatmul.mubr.f32.gmra.mrb[74].mxu0 %v768_v20  ;;  %vm643_vm13 = vcmp.gt.f32.partialorder %v478_v18, 0.0 }
 0x101   : > { %v482_v23 = vadd.f32 %v481_v22, %v1609_v30  ;;  %v483_v24 = vpop.f32.mrb[15].mxu0  ;;  %v770_v28 = vsel %vm642_vm14, %v476_v16, %v706_v19 }
 0x102   : > { %v484_v25 = vadd.f32 %v483_v24, %v1611_v31  ;;  %v771_v26 = vsel %vm643_vm13, %v478_v18, %v707_v21 }
 0x103   : > { %v708_v27 = vmul.f32 0.01, %v482_v23  ;;  %955 = vmatprep.mubr.f32.mxu0 %v771_v26  ;;  %vm644_vm0 = vcmp.gt.f32.partialorder %v482_v23, 0.0 }
 0x104   : > { %v487_v29 = vpop.f32.mrb[16].mxu0  ;;  %956 = vmatmul.mubr.f32.gmra.mrb[76].mxu0 %v770_v28  ;;  %vm645_vm15 = vcmp.gt.f32.partialorder %v484_v25, 0.0  ;;  %v709_v32 = vmul.f32 0.01, %v484_v25 }
 0x105   : > { %v488_v33 = vadd.f32 %v487_v29, %v1609_v30  ;;  %v489_v34 = vpop.f32.mrb[17].mxu0  ;;  %v772_v37 = vsel %vm644_vm0, %v482_v23, %v708_v27 }
 0x106   : > { %v490_v5 = vadd.f32 %v489_v34, %v1611_v31  ;;  %v773_v35 = vsel %vm645_vm15, %v484_v25, %v709_v32 }
 0x107   : > { %v710_v36 = vmul.f32 0.01, %v488_v33  ;;  %960 = vmatprep.mubr.f32.mxu1 %v773_v35  ;;  %vm646_vm2 = vcmp.gt.f32.partialorder %v488_v33, 0.0 }
 0x108   : > { %v711_v38 = vmul.f32 0.01, %v490_v5  ;;  %v493_v39 = vpop.f32.mrb[18].mxu0  ;;  %961 = vmatmul.mubr.f32.vlgmr.msra.gmra.mrb[0].mxu1 %v772_v37  ;;  %vm647_vm1 = vcmp.gt.f32.partialorder %v490_v5, 0.0 }
 0x109   : > { %v494_v40 = vadd.f32 %v493_v39, %v1609_v30  ;;  %v495_v41 = vpop.f32.mrb[19].mxu0  ;;  %v774_v45 = vsel %vm646_vm2, %v488_v33, %v710_v36 }
 0x10a   : > { %v496_v42 = vadd.f32 %v495_v41, %v1611_v31  ;;  %v775_v43 = vsel %vm647_vm1, %v490_v5, %v711_v38 }
 0x10b   : > { %v712_v44 = vmul.f32 0.01, %v494_v40  ;;  %965 = vmatprep.mubr.f32.mxu1 %v775_v43  ;;  %vm648_vm4 = vcmp.gt.f32.partialorder %v494_v40, 0.0 }
 0x10c   : > { %v713_v46 = vmul.f32 0.01, %v496_v42  ;;  %v499_v47 = vpop.f32.mrb[20].mxu0  ;;  %966 = vmatmul.mubr.f32.gmra.mrb[2].mxu1 %v774_v45  ;;  %vm649_vm3 = vcmp.gt.f32.partialorder %v496_v42, 0.0 }
 0x10d   : > { %v500_v48 = vadd.f32 %v499_v47, %v1609_v30  ;;  %v501_v49 = vpop.f32.mrb[21].mxu0  ;;  %v776_v53 = vsel %vm648_vm4, %v494_v40, %v712_v44 }
 0x10e   : > { %v502_v50 = vadd.f32 %v501_v49, %v1611_v31  ;;  %v777_v51 = vsel %vm649_vm3, %v496_v42, %v713_v46 }
 0x10f   : > { %v714_v52 = vmul.f32 0.01, %v500_v48  ;;  %970 = vmatprep.mubr.f32.mxu1 %v777_v51  ;;  %vm650_vm6 = vcmp.gt.f32.partialorder %v500_v48, 0.0 }
 0x110   : > { %v715_v54 = vmul.f32 0.01, %v502_v50  ;;  %v505_v55 = vpop.f32.mrb[22].mxu0  ;;  %971 = vmatmul.mubr.f32.gmra.mrb[4].mxu1 %v776_v53  ;;  %vm651_vm5 = vcmp.gt.f32.partialorder %v502_v50, 0.0 }
 0x111   : > { %v506_v56 = vadd.f32 %v505_v55, %v1609_v30  ;;  %v507_v57 = vpop.f32.mrb[23].mxu0  ;;  %v778_v61 = vsel %vm650_vm6, %v500_v48, %v714_v52 }
 0x112   : > { %v508_v58 = vadd.f32 %v507_v57, %v1611_v31  ;;  %v779_v59 = vsel %vm651_vm5, %v502_v50, %v715_v54 }
 0x113   : > { %v716_v60 = vmul.f32 0.01, %v506_v56  ;;  %975 = vmatprep.mubr.f32.mxu1 %v779_v59  ;;  %vm652_vm8 = vcmp.gt.f32.partialorder %v506_v56, 0.0 }
 0x114   : > { %v717_v62 = vmul.f32 0.01, %v508_v58  ;;  %v511_v63 = vpop.f32.mrb[24].mxu0  ;;  %976 = vmatmul.mubr.f32.gmra.mrb[6].mxu1 %v778_v61  ;;  %vm653_vm7 = vcmp.gt.f32.partialorder %v508_v58, 0.0 }
 0x115   : > { %v512_v0 = vadd.f32 %v511_v63, %v1609_v30  ;;  %v513_v1 = vpop.f32.mrb[25].mxu0  ;;  %v780_v6 = vsel %vm652_vm8, %v506_v56, %v716_v60 }
 0x116   : > { %v514_v2 = vadd.f32 %v513_v1, %v1611_v31  ;;  %v781_v3 = vsel %vm653_vm7, %v508_v58, %v717_v62 }
 0x117   : > { %v718_v4 = vmul.f32 0.01, %v512_v0  ;;  %980 = vmatprep.mubr.f32.mxu1 %v781_v3  ;;  %vm654_vm10 = vcmp.gt.f32.partialorder %v512_v0, 0.0 }
 0x118   : > { %v719_v7 = vmul.f32 0.01, %v514_v2  ;;  %v517_v8 = vpop.f32.mrb[26].mxu0  ;;  %981 = vmatmul.mubr.f32.gmra.mrb[8].mxu1 %v780_v6  ;;  %vm655_vm9 = vcmp.gt.f32.partialorder %v514_v2, 0.0 }
 0x119   : > { %v518_v10 = vadd.f32 %v517_v8, %v1609_v30  ;;  %v519_v11 = vpop.f32.mrb[27].mxu0  ;;  %v782_v15 = vsel %vm654_vm10, %v512_v0, %v718_v4 }
 0x11a   : > { %v520_v12 = vadd.f32 %v519_v11, %v1611_v31  ;;  %v783_v13 = vsel %vm655_vm9, %v514_v2, %v719_v7 }
 0x11b   : > { %v720_v14 = vmul.f32 0.01, %v518_v10  ;;  %985 = vmatprep.mubr.f32.mxu1 %v783_v13  ;;  %vm656_vm12 = vcmp.gt.f32.partialorder %v518_v10, 0.0 }
 0x11c   : > { %v721_v16 = vmul.f32 0.01, %v520_v12  ;;  %v523_v17 = vpop.f32.mrb[28].mxu0  ;;  %986 = vmatmul.mubr.f32.gmra.mrb[10].mxu1 %v782_v15  ;;  %vm657_vm11 = vcmp.gt.f32.partialorder %v520_v12, 0.0 }
 0x11d   : > { %v524_v18 = vadd.f32 %v523_v17, %v1609_v30  ;;  %v525_v9 = vpop.f32.mrb[29].mxu0  ;;  %v784_v22 = vsel %vm656_vm12, %v518_v10, %v720_v14 }
 0x11e   : > { %v526_v19 = vadd.f32 %v525_v9, %v1611_v31  ;;  %v785_v20 = vsel %vm657_vm11, %v520_v12, %v721_v16 }
 0x11f   : > { %v722_v21 = vmul.f32 0.01, %v524_v18  ;;  %990 = vmatprep.mubr.f32.mxu1 %v785_v20  ;;  %vm658_vm14 = vcmp.gt.f32.partialorder %v524_v18, 0.0 }
 0x120   : > { %v723_v23 = vmul.f32 0.01, %v526_v19  ;;  %v529_v24 = vpop.f32.mrb[30].mxu0  ;;  %991 = vmatmul.mubr.f32.gmra.mrb[12].mxu1 %v784_v22  ;;  %vm659_vm13 = vcmp.gt.f32.partialorder %v526_v19, 0.0 }
 0x121   : > { %v530_v25 = vadd.f32 %v529_v24, %v1609_v30  ;;  %v531_v26 = vpop.f32.mrb[31].mxu0  ;;  %v786_v32 = vsel %vm658_vm14, %v524_v18, %v722_v21 }
 0x122   : > { %v532_v27 = vadd.f32 %v531_v26, %v1611_v31  ;;  %v787_v28 = vsel %vm659_vm13, %v526_v19, %v723_v23 }
 0x123   : > { %v724_v29 = vmul.f32 0.01, %v530_v25  ;;  %995 = vmatprep.mubr.f32.mxu1 %v787_v28  ;;  %vm660_vm0 = vcmp.gt.f32.partialorder %v530_v25, 0.0 }
 0x124   : > { %v725_v33 = vmul.f32 0.01, %v532_v27  ;;  %v535_v34 = vpop.f32.mrb[32].mxu0  ;;  %996 = vmatmul.mubr.f32.gmra.mrb[14].mxu1 %v786_v32  ;;  %vm661_vm15 = vcmp.gt.f32.partialorder %v532_v27, 0.0 }
 0x125   : > { %v536_v5 = vadd.f32 %v535_v34, %v1609_v30  ;;  %v537_v35 = vpop.f32.mrb[33].mxu0  ;;  %v788_v39 = vsel %vm660_vm0, %v530_v25, %v724_v29 }
 0x126   : > { %v538_v36 = vadd.f32 %v537_v35, %v1611_v31  ;;  %v789_v37 = vsel %vm661_vm15, %v532_v27, %v725_v33 }
 0x127   : > { %v726_v38 = vmul.f32 0.01, %v536_v5  ;;  %1000 = vmatprep.mubr.f32.mxu1 %v789_v37  ;;  %vm662_vm2 = vcmp.gt.f32.partialorder %v536_v5, 0.0 }
 0x128   : > { %v727_v40 = vmul.f32 0.01, %v538_v36  ;;  %v541_v41 = vpop.f32.mrb[34].mxu0  ;;  %1001 = vmatmul.mubr.f32.gmra.mrb[16].mxu1 %v788_v39  ;;  %vm663_vm1 = vcmp.gt.f32.partialorder %v538_v36, 0.0 }
 0x129   : > { %v542_v42 = vadd.f32 %v541_v41, %v1609_v30  ;;  %v543_v43 = vpop.f32.mrb[35].mxu0  ;;  %v790_v47 = vsel %vm662_vm2, %v536_v5, %v726_v38 }
 0x12a   : > { %v544_v44 = vadd.f32 %v543_v43, %v1611_v31  ;;  %v791_v45 = vsel %vm663_vm1, %v538_v36, %v727_v40 }
 0x12b   : > { %v728_v46 = vmul.f32 0.01, %v542_v42  ;;  %1005 = vmatprep.mubr.f32.mxu1 %v791_v45  ;;  %vm664_vm4 = vcmp.gt.f32.partialorder %v542_v42, 0.0 }
 0x12c   : > { %v729_v48 = vmul.f32 0.01, %v544_v44  ;;  %v547_v49 = vpop.f32.mrb[36].mxu0  ;;  %1006 = vmatmul.mubr.f32.gmra.mrb[18].mxu1 %v790_v47  ;;  %vm665_vm3 = vcmp.gt.f32.partialorder %v544_v44, 0.0 }
 0x12d   : > { %v548_v50 = vadd.f32 %v547_v49, %v1609_v30  ;;  %v549_v51 = vpop.f32.mrb[37].mxu0  ;;  %v792_v55 = vsel %vm664_vm4, %v542_v42, %v728_v46 }
 0x12e   : > { %v550_v52 = vadd.f32 %v549_v51, %v1611_v31  ;;  %v793_v53 = vsel %vm665_vm3, %v544_v44, %v729_v48 }
 0x12f   : > { %v730_v54 = vmul.f32 0.01, %v548_v50  ;;  %1010 = vmatprep.mubr.f32.mxu1 %v793_v53  ;;  %vm666_vm6 = vcmp.gt.f32.partialorder %v548_v50, 0.0 }
 0x130   : > { %v731_v56 = vmul.f32 0.01, %v550_v52  ;;  %v553_v57 = vpop.f32.mrb[38].mxu0  ;;  %1011 = vmatmul.mubr.f32.gmra.mrb[20].mxu1 %v792_v55  ;;  %vm667_vm5 = vcmp.gt.f32.partialorder %v550_v52, 0.0 }
 0x131   : > { %v554_v58 = vadd.f32 %v553_v57, %v1609_v30  ;;  %v555_v59 = vpop.f32.mrb[39].mxu0  ;;  %v794_v63 = vsel %vm666_vm6, %v548_v50, %v730_v54 }
 0x132   : > { %v556_v60 = vadd.f32 %v555_v59, %v1611_v31  ;;  %v795_v61 = vsel %vm667_vm5, %v550_v52, %v731_v56 }
 0x133   : > { %v732_v62 = vmul.f32 0.01, %v554_v58  ;;  %1015 = vmatprep.mubr.f32.mxu1 %v795_v61  ;;  %vm668_vm8 = vcmp.gt.f32.partialorder %v554_v58, 0.0 }
 0x134   : > { %v733_v0 = vmul.f32 0.01, %v556_v60  ;;  %v559_v1 = vpop.f32.mrb[40].mxu0  ;;  %1016 = vmatmul.mubr.f32.gmra.mrb[22].mxu1 %v794_v63  ;;  %vm669_vm7 = vcmp.gt.f32.partialorder %v556_v60, 0.0 }
 0x135   : > { %v560_v2 = vadd.f32 %v559_v1, %v1609_v30  ;;  %v561_v3 = vpop.f32.mrb[41].mxu0  ;;  %v796_v8 = vsel %vm668_vm8, %v554_v58, %v732_v62 }
 0x136   : > { %v562_v4 = vadd.f32 %v561_v3, %v1611_v31  ;;  %v797_v6 = vsel %vm669_vm7, %v556_v60, %v733_v0 }
 0x137   : > { %v734_v7 = vmul.f32 0.01, %v560_v2  ;;  %1020 = vmatprep.mubr.f32.mxu1 %v797_v6  ;;  %vm670_vm10 = vcmp.gt.f32.partialorder %v560_v2, 0.0 }
 0x138   : > { %v735_v10 = vmul.f32 0.01, %v562_v4  ;;  %v565_v11 = vpop.f32.mrb[42].mxu0  ;;  %1021 = vmatmul.mubr.f32.gmra.mrb[24].mxu1 %v796_v8  ;;  %vm671_vm9 = vcmp.gt.f32.partialorder %v562_v4, 0.0 }
 0x139   : > { %v566_v12 = vadd.f32 %v565_v11, %v1609_v30  ;;  %v567_v13 = vpop.f32.mrb[43].mxu0  ;;  %v798_v17 = vsel %vm670_vm10, %v560_v2, %v734_v7 }
 0x13a   : > { %v568_v14 = vadd.f32 %v567_v13, %v1611_v31  ;;  %v799_v15 = vsel %vm671_vm9, %v562_v4, %v735_v10 }
 0x13b   : > { %v736_v16 = vmul.f32 0.01, %v566_v12  ;;  %1025 = vmatprep.mubr.f32.mxu1 %v799_v15  ;;  %vm672_vm12 = vcmp.gt.f32.partialorder %v566_v12, 0.0 }
 0x13c   : > { %v737_v18 = vmul.f32 0.01, %v568_v14  ;;  %v571_v9 = vpop.f32.mrb[44].mxu0  ;;  %1026 = vmatmul.mubr.f32.gmra.mrb[26].mxu1 %v798_v17  ;;  %vm673_vm11 = vcmp.gt.f32.partialorder %v568_v14, 0.0 }
 0x13d   : > { %v572_v19 = vadd.f32 %v571_v9, %v1609_v30  ;;  %v573_v20 = vpop.f32.mrb[45].mxu0  ;;  %v800_v24 = vsel %vm672_vm12, %v566_v12, %v736_v16 }
 0x13e   : > { %v574_v21 = vadd.f32 %v573_v20, %v1611_v31  ;;  %v801_v22 = vsel %vm673_vm11, %v568_v14, %v737_v18 }
 0x13f   : > { %v738_v23 = vmul.f32 0.01, %v572_v19  ;;  %1030 = vmatprep.mubr.f32.mxu1 %v801_v22  ;;  %vm674_vm14 = vcmp.gt.f32.partialorder %v572_v19, 0.0 }
 0x140   : > { %v739_v25 = vmul.f32 0.01, %v574_v21  ;;  %v577_v26 = vpop.f32.mrb[46].mxu0  ;;  %1031 = vmatmul.mubr.f32.gmra.mrb[28].mxu1 %v800_v24  ;;  %vm675_vm13 = vcmp.gt.f32.partialorder %v574_v21, 0.0 }
 0x141   : > { %v578_v27 = vadd.f32 %v577_v26, %v1609_v30  ;;  %v579_v28 = vpop.f32.mrb[47].mxu0  ;;  %v802_v34 = vsel %vm674_vm14, %v572_v19, %v738_v23 }
 0x142   : > { %v580_v29 = vadd.f32 %v579_v28, %v1611_v31  ;;  %v803_v32 = vsel %vm675_vm13, %v574_v21, %v739_v25 }
 0x143   : > { %v740_v33 = vmul.f32 0.01, %v578_v27  ;;  %1035 = vmatprep.mubr.f32.mxu1 %v803_v32  ;;  %vm676_vm0 = vcmp.gt.f32.partialorder %v578_v27, 0.0 }
 0x144   : > { %v741_v5 = vmul.f32 0.01, %v580_v29  ;;  %v583_v35 = vpop.f32.mrb[48].mxu0  ;;  %1036 = vmatmul.mubr.f32.gmra.mrb[30].mxu1 %v802_v34  ;;  %vm677_vm15 = vcmp.gt.f32.partialorder %v580_v29, 0.0 }
 0x145   : > { %v584_v36 = vadd.f32 %v583_v35, %v1609_v30  ;;  %v585_v37 = vpop.f32.mrb[49].mxu0  ;;  %v804_v41 = vsel %vm676_vm0, %v578_v27, %v740_v33 }
 0x146   : > { %v586_v38 = vadd.f32 %v585_v37, %v1611_v31  ;;  %v805_v39 = vsel %vm677_vm15, %v580_v29, %v741_v5 }
 0x147   : > { %v742_v40 = vmul.f32 0.01, %v584_v36  ;;  %1040 = vmatprep.mubr.f32.mxu1 %v805_v39  ;;  %vm678_vm2 = vcmp.gt.f32.partialorder %v584_v36, 0.0 }
 0x148   : > { %v743_v42 = vmul.f32 0.01, %v586_v38  ;;  %v589_v43 = vpop.f32.mrb[50].mxu0  ;;  %1041 = vmatmul.mubr.f32.gmra.mrb[32].mxu1 %v804_v41  ;;  %vm679_vm1 = vcmp.gt.f32.partialorder %v586_v38, 0.0 }
 0x149   : > { %v590_v44 = vadd.f32 %v589_v43, %v1609_v30  ;;  %v591_v45 = vpop.f32.mrb[51].mxu0  ;;  %v806_v49 = vsel %vm678_vm2, %v584_v36, %v742_v40 }
 0x14a   : > { %v592_v46 = vadd.f32 %v591_v45, %v1611_v31  ;;  %v807_v47 = vsel %vm679_vm1, %v586_v38, %v743_v42 }
 0x14b   : > { %v744_v48 = vmul.f32 0.01, %v590_v44  ;;  %1045 = vmatprep.mubr.f32.mxu1 %v807_v47  ;;  %vm680_vm4 = vcmp.gt.f32.partialorder %v590_v44, 0.0 }
 0x14c   : > { %v745_v50 = vmul.f32 0.01, %v592_v46  ;;  %v595_v51 = vpop.f32.mrb[52].mxu0  ;;  %1046 = vmatmul.mubr.f32.gmra.mrb[34].mxu1 %v806_v49  ;;  %vm681_vm3 = vcmp.gt.f32.partialorder %v592_v46, 0.0 }
 0x14d   : > { %v596_v52 = vadd.f32 %v595_v51, %v1609_v30  ;;  %v597_v53 = vpop.f32.mrb[53].mxu0  ;;  %v808_v57 = vsel %vm680_vm4, %v590_v44, %v744_v48 }
 0x14e   : > { %v598_v54 = vadd.f32 %v597_v53, %v1611_v31  ;;  %v809_v55 = vsel %vm681_vm3, %v592_v46, %v745_v50 }
 0x14f   : > { %v746_v56 = vmul.f32 0.01, %v596_v52  ;;  %1050 = vmatprep.mubr.f32.mxu1 %v809_v55  ;;  %vm682_vm6 = vcmp.gt.f32.partialorder %v596_v52, 0.0 }
 0x150   : > { %v747_v58 = vmul.f32 0.01, %v598_v54  ;;  %v601_v59 = vpop.f32.mrb[54].mxu0  ;;  %1051 = vmatmul.mubr.f32.gmra.mrb[36].mxu1 %v808_v57  ;;  %vm683_vm5 = vcmp.gt.f32.partialorder %v598_v54, 0.0 }
 0x151   : > { %v602_v60 = vadd.f32 %v601_v59, %v1609_v30  ;;  %v603_v61 = vpop.f32.mrb[55].mxu0  ;;  %v810_v1 = vsel %vm682_vm6, %v596_v52, %v746_v56 }
 0x152   : > { %v604_v62 = vadd.f32 %v603_v61, %v1611_v31  ;;  %v811_v63 = vsel %vm683_vm5, %v598_v54, %v747_v58 }
 0x153   : > { %v748_v0 = vmul.f32 0.01, %v602_v60  ;;  %1055 = vmatprep.mubr.f32.mxu1 %v811_v63  ;;  %vm684_vm8 = vcmp.gt.f32.partialorder %v602_v60, 0.0 }
 0x154   : > { %v749_v2 = vmul.f32 0.01, %v604_v62  ;;  %v607_v3 = vpop.f32.mrb[56].mxu0  ;;  %1056 = vmatmul.mubr.f32.gmra.mrb[38].mxu1 %v810_v1  ;;  %vm685_vm7 = vcmp.gt.f32.partialorder %v604_v62, 0.0 }
 0x155   : > { %v608_v4 = vadd.f32 %v607_v3, %v1609_v30  ;;  %v609_v6 = vpop.f32.mrb[57].mxu0  ;;  %v812_v11 = vsel %vm684_vm8, %v602_v60, %v748_v0 }
 0x156   : > { %v610_v7 = vadd.f32 %v609_v6, %v1611_v31  ;;  %v813_v8 = vsel %vm685_vm7, %v604_v62, %v749_v2 }
 0x157   : > { %v750_v10 = vmul.f32 0.01, %v608_v4  ;;  %1060 = vmatprep.mubr.f32.mxu1 %v813_v8  ;;  %vm686_vm10 = vcmp.gt.f32.partialorder %v608_v4, 0.0 }
 0x158   : > { %v751_v12 = vmul.f32 0.01, %v610_v7  ;;  %v613_v13 = vpop.f32.mrb[58].mxu0  ;;  %1061 = vmatmul.mubr.f32.gmra.mrb[40].mxu1 %v812_v11  ;;  %vm687_vm9 = vcmp.gt.f32.partialorder %v610_v7, 0.0 }
 0x159   : > { %v614_v14 = vadd.f32 %v613_v13, %v1609_v30  ;;  %v615_v15 = vpop.f32.mrb[59].mxu0  ;;  %v814_v9 = vsel %vm686_vm10, %v608_v4, %v750_v10 }
 0x15a   : > { %v616_v16 = vadd.f32 %v615_v15, %v1611_v31  ;;  %v815_v17 = vsel %vm687_vm9, %v610_v7, %v751_v12 }
 0x15b   : > { %v752_v18 = vmul.f32 0.01, %v614_v14  ;;  %1065 = vmatprep.mubr.f32.mxu1 %v815_v17  ;;  %vm688_vm12 = vcmp.gt.f32.partialorder %v614_v14, 0.0 }
 0x15c   : > { %v753_v19 = vmul.f32 0.01, %v616_v16  ;;  %v619_v20 = vpop.f32.mrb[60].mxu0  ;;  %1066 = vmatmul.mubr.f32.gmra.mrb[42].mxu1 %v814_v9  ;;  %vm689_vm11 = vcmp.gt.f32.partialorder %v616_v16, 0.0 }
 0x15d   : > { %v620_v21 = vadd.f32 %v619_v20, %v1609_v30  ;;  %v621_v22 = vpop.f32.mrb[61].mxu0  ;;  %v816_v26 = vsel %vm688_vm12, %v614_v14, %v752_v18 }
 0x15e   : > { %v622_v23 = vadd.f32 %v621_v22, %v1611_v31  ;;  %v817_v24 = vsel %vm689_vm11, %v616_v16, %v753_v19 }
 0x15f   : > { %v754_v25 = vmul.f32 0.01, %v620_v21  ;;  %1070 = vmatprep.mubr.f32.mxu1 %v817_v24  ;;  %vm690_vm14 = vcmp.gt.f32.partialorder %v620_v21, 0.0 }
 0x160   : > { %v755_v27 = vmul.f32 0.01, %v622_v23  ;;  %v625_v28 = vpop.f32.mrb[62].mxu0  ;;  %1071 = vmatmul.mubr.f32.gmra.mrb[44].mxu1 %v816_v26  ;;  %vm691_vm13 = vcmp.gt.f32.partialorder %v622_v23, 0.0 }
 0x161   : > { %v626_v29 = vadd.f32 %v625_v28, %v1609_v30  ;;  %v627_v32 = vpop.f32.mrb[63].mxu0  ;;  %v818_v35 = vsel %vm690_vm14, %v620_v21, %v754_v25  ;;  %v1680_v30 = vld [vmem:[%s1760_s4] ss:$0 sm:$0xff] }
 0x162   : > { %v628_v33 = vadd.f32 %v627_v32, %v1611_v31  ;;  %v819_v34 = vsel %vm691_vm13, %v622_v23, %v755_v27 }
 0x163   : > { %v756_v5 = vmul.f32 0.01, %v626_v29  ;;  %1075 = vmatprep.mubr.f32.mxu1 %v819_v34  ;;  %vm692_vm0 = vcmp.gt.f32.partialorder %v626_v29, 0.0 }
 0x164   : > { %v757_v36 = vmul.f32 0.01, %v628_v33  ;;  %1076 = vmatmul.mubr.f32.gmra.mrb[46].mxu1 %v818_v35  ;;  %vm693_vm15 = vcmp.gt.f32.partialorder %v628_v33, 0.0 }
 0x165   : > { %v820_v38 = vsel %vm692_vm0, %v626_v29, %v756_v5 }
 0x166   : > { %v821_v37 = vsel %vm693_vm15, %v628_v33, %v757_v36 }
 0x167   : > { %1080 = vmatprep.mubr.f32.mxu1 %v821_v37 }
 0x168   : > { %1081 = vmatmul.mubr.f32.gmra.mrb[48].mxu1 %v820_v38 }
 0x1bf   : > { %v927_v31 = vpop.f32.mrb[64].mxu0 }
 0x1c0   : > { %v928_v39 = vadd.f32 %v1680_v30, %v927_v31  ;;  %v929_v40 = vpop.f32.mrb[65].mxu0 }
 0x1c2   : > { %1086 = vst [vmem:[%s1687_s14] sm:$0xff] %v928_v39 }
 0x1c3   : > { %v932_v41 = vpop.f32.mrb[66].mxu0 }
 0x1c4   : > { %v933_v42 = vadd.f32 %v1680_v30, %v932_v41  ;;  %v934_v43 = vpop.f32.mrb[67].mxu0 }
 0x1c6   : > { %1087 = vst [vmem:[%s1687_s14 + $0x8] sm:$0xff] %v933_v42 }
 0x1c7   : > { %v937_v44 = vpop.f32.mrb[68].mxu0 }
 0x1c8   : > { %v938_v45 = vadd.f32 %v1680_v30, %v937_v44  ;;  %v939_v46 = vpop.f32.mrb[69].mxu0 }
 0x1ca   : > { %1088 = vst [vmem:[%s1687_s14 + $0x10] sm:$0xff] %v938_v45 }
 0x1cb   : > { %v942_v47 = vpop.f32.mrb[70].mxu0 }
 0x1cc   : > { %v943_v48 = vadd.f32 %v1680_v30, %v942_v47  ;;  %v944_v49 = vpop.f32.mrb[71].mxu0 }
 0x1ce   : > { %1089 = vst [vmem:[%s1687_s14 + $0x18] sm:$0xff] %v943_v48 }
 0x1cf   : > { %v947_v50 = vpop.f32.mrb[72].mxu0 }
 0x1d0   : > { %v948_v51 = vadd.f32 %v1680_v30, %v947_v50  ;;  %v949_v52 = vpop.f32.mrb[73].mxu0 }
 0x1d2   : > { %1090 = vst [vmem:[%s1687_s14 + $0x20] sm:$0xff] %v948_v51 }
 0x1d3   : > { %v952_v53 = vpop.f32.mrb[74].mxu0 }
 0x1d4   : > { %v953_v54 = vadd.f32 %v1680_v30, %v952_v53  ;;  %v954_v55 = vpop.f32.mrb[75].mxu0 }
 0x1d6   : > { %1091 = vst [vmem:[%s1687_s14 + $0x28] sm:$0xff] %v953_v54 }
 0x1d7   : > { %v957_v56 = vpop.f32.mrb[76].mxu0 }
 0x1d8   : > { %v958_v57 = vadd.f32 %v1680_v30, %v957_v56  ;;  %v959_v58 = vpop.f32.mrb[77].mxu0 }
 0x1da   : > { %1092 = vst [vmem:[%s1687_s14 + $0x30] sm:$0xff] %v958_v57 }
 0x1db   : > { %v962_v59 = vpop.f32.mrb[0].mxu1 }
 0x1dc   : > { %v963_v60 = vadd.f32 %v1680_v30, %v962_v59  ;;  %v964_v61 = vpop.f32.mrb[1].mxu1 }
 0x1de   : > { %1093 = vst [vmem:[%s1687_s14 + $0x38] sm:$0xff] %v963_v60 }
 0x1df   : > { %v967_v62 = vpop.f32.mrb[2].mxu1 }
 0x1e0   : > { %v968_v63 = vadd.f32 %v1680_v30, %v967_v62  ;;  %v969_v0 = vpop.f32.mrb[3].mxu1 }
 0x1e2   : > { %1094 = vst [vmem:[%s1687_s14 + $0x40] sm:$0xff] %v968_v63 }
 0x1e3   : > { %v972_v1 = vpop.f32.mrb[4].mxu1 }
 0x1e4   : > { %v973_v2 = vadd.f32 %v1680_v30, %v972_v1  ;;  %v974_v3 = vpop.f32.mrb[5].mxu1 }
 0x1e6   : > { %1095 = vst [vmem:[%s1687_s14 + $0x48] sm:$0xff] %v973_v2 }
 0x1e7   : > { %v977_v4 = vpop.f32.mrb[6].mxu1 }
 0x1e8   : > { %v978_v6 = vadd.f32 %v1680_v30, %v977_v4  ;;  %v979_v7 = vpop.f32.mrb[7].mxu1 }
 0x1ea   : > { %1096 = vst [vmem:[%s1687_s14 + $0x50] sm:$0xff] %v978_v6 }
 0x1eb   : > { %v982_v8 = vpop.f32.mrb[8].mxu1 }
 0x1ec   : > { %v983_v10 = vadd.f32 %v1680_v30, %v982_v8  ;;  %v984_v11 = vpop.f32.mrb[9].mxu1 }
 0x1ee   : > { %1097 = vst [vmem:[%s1687_s14 + $0x58] sm:$0xff] %v983_v10 }
 0x1ef   : > { %v987_v12 = vpop.f32.mrb[10].mxu1 }
 0x1f0   : > { %v988_v13 = vadd.f32 %v1680_v30, %v987_v12  ;;  %v989_v14 = vpop.f32.mrb[11].mxu1 }
 0x1f2   : > { %1098 = vst [vmem:[%s1687_s14 + $0x60] sm:$0xff] %v988_v13 }
 0x1f3   : > { %v992_v15 = vpop.f32.mrb[12].mxu1 }
 0x1f4   : > { %v993_v16 = vadd.f32 %v1680_v30, %v992_v15  ;;  %v994_v17 = vpop.f32.mrb[13].mxu1 }
 0x1f6   : > { %1099 = vst [vmem:[%s1687_s14 + $0x68] sm:$0xff] %v993_v16 }
 0x1f7   : > { %v997_v18 = vpop.f32.mrb[14].mxu1 }
 0x1f8   : > { %v998_v9 = vadd.f32 %v1680_v30, %v997_v18  ;;  %v999_v19 = vpop.f32.mrb[15].mxu1 }
 0x1fa   : > { %1100 = vst [vmem:[%s1687_s14 + $0x70] sm:$0xff] %v998_v9 }
 0x1fb   : > { %v1002_v20 = vpop.f32.mrb[16].mxu1 }
 0x1fc   : > { %v1003_v21 = vadd.f32 %v1680_v30, %v1002_v20  ;;  %v1004_v22 = vpop.f32.mrb[17].mxu1 }
 0x1fe   : > { %1101 = vst [vmem:[%s1687_s14 + $0x78] sm:$0xff] %v1003_v21 }
 0x1ff   : > { %v1007_v23 = vpop.f32.mrb[18].mxu1 }
 0x200   : > { %v1008_v24 = vadd.f32 %v1680_v30, %v1007_v23  ;;  %v1009_v25 = vpop.f32.mrb[19].mxu1 }
 0x202   : > { %1102 = vst [vmem:[%s1687_s14 + $0x80] sm:$0xff] %v1008_v24 }
 0x203   : > { %v1012_v26 = vpop.f32.mrb[20].mxu1 }
 0x204   : > { %v1013_v27 = vadd.f32 %v1680_v30, %v1012_v26  ;;  %v1014_v28 = vpop.f32.mrb[21].mxu1 }
 0x206   : > { %1103 = vst [vmem:[%s1687_s14 + $0x88] sm:$0xff] %v1013_v27 }
 0x207   : > { %v1017_v29 = vpop.f32.mrb[22].mxu1 }
 0x208   : > { %v1018_v32 = vadd.f32 %v1680_v30, %v1017_v29  ;;  %v1019_v33 = vpop.f32.mrb[23].mxu1 }
 0x20a   : > { %1104 = vst [vmem:[%s1687_s14 + $0x90] sm:$0xff] %v1018_v32 }
 0x20b   : > { %v1022_v34 = vpop.f32.mrb[24].mxu1 }
 0x20c   : > { %v1023_v5 = vadd.f32 %v1680_v30, %v1022_v34  ;;  %v1024_v35 = vpop.f32.mrb[25].mxu1 }
 0x20e   : > { %1105 = vst [vmem:[%s1687_s14 + $0x98] sm:$0xff] %v1023_v5 }
 0x20f   : > { %v1027_v36 = vpop.f32.mrb[26].mxu1 }
 0x210   : > { %v1028_v37 = vadd.f32 %v1680_v30, %v1027_v36  ;;  %v1029_v38 = vpop.f32.mrb[27].mxu1 }
 0x212   : > { %1106 = vst [vmem:[%s1687_s14 + $0xa0] sm:$0xff] %v1028_v37 }
 0x213   : > { %v1032_v31 = vpop.f32.mrb[28].mxu1 }
 0x214   : > { %v1033_v39 = vadd.f32 %v1680_v30, %v1032_v31  ;;  %v1034_v40 = vpop.f32.mrb[29].mxu1 }
 0x216   : > { %1107 = vst [vmem:[%s1687_s14 + $0xa8] sm:$0xff] %v1033_v39 }
 0x217   : > { %v1037_v41 = vpop.f32.mrb[30].mxu1 }
 0x218   : > { %v1038_v42 = vadd.f32 %v1680_v30, %v1037_v41  ;;  %v1039_v43 = vpop.f32.mrb[31].mxu1 }
 0x21a   : > { %1108 = vst [vmem:[%s1687_s14 + $0xb0] sm:$0xff] %v1038_v42 }
 0x21b   : > { %v1042_v44 = vpop.f32.mrb[32].mxu1 }
 0x21c   : > { %v1043_v45 = vadd.f32 %v1680_v30, %v1042_v44  ;;  %v1044_v46 = vpop.f32.mrb[33].mxu1 }
 0x21e   : > { %1109 = vst [vmem:[%s1687_s14 + $0xb8] sm:$0xff] %v1043_v45 }
 0x21f   : > { %v1047_v47 = vpop.f32.mrb[34].mxu1 }
 0x220   : > { %v1048_v48 = vadd.f32 %v1680_v30, %v1047_v47  ;;  %v1049_v49 = vpop.f32.mrb[35].mxu1 }
 0x222   : > { %1110 = vst [vmem:[%s1687_s14 + $0xc0] sm:$0xff] %v1048_v48 }
 0x223   : > { %v1052_v50 = vpop.f32.mrb[36].mxu1 }
 0x224   : > { %v1053_v51 = vadd.f32 %v1680_v30, %v1052_v50  ;;  %v1054_v52 = vpop.f32.mrb[37].mxu1 }
 0x226   : > { %1111 = vst [vmem:[%s1687_s14 + $0xc8] sm:$0xff] %v1053_v51 }
 0x227   : > { %v1057_v53 = vpop.f32.mrb[38].mxu1 }
 0x228   : > { %v1058_v54 = vadd.f32 %v1680_v30, %v1057_v53  ;;  %v1059_v55 = vpop.f32.mrb[39].mxu1 }
 0x22a   : > { %1112 = vst [vmem:[%s1687_s14 + $0xd0] sm:$0xff] %v1058_v54 }
 0x22b   : > { %v1062_v56 = vpop.f32.mrb[40].mxu1 }
 0x22c   : > { %v1063_v57 = vadd.f32 %v1680_v30, %v1062_v56  ;;  %v1064_v58 = vpop.f32.mrb[41].mxu1 }
 0x22e   : > { %1113 = vst [vmem:[%s1687_s14 + $0xd8] sm:$0xff] %v1063_v57 }
 0x22f   : > { %v1067_v59 = vpop.f32.mrb[42].mxu1 }
 0x230   : > { %v1068_v60 = vadd.f32 %v1680_v30, %v1067_v59  ;;  %v1069_v61 = vpop.f32.mrb[43].mxu1 }
 0x232   : > { %1114 = vst [vmem:[%s1687_s14 + $0xe0] sm:$0xff] %v1068_v60 }
 0x233   : > { %v1072_v62 = vpop.f32.mrb[44].mxu1 }
 0x234   : > { %v1073_v63 = vadd.f32 %v1680_v30, %v1072_v62  ;;  %v1074_v0 = vpop.f32.mrb[45].mxu1 }
 0x236   : > { %1115 = vst [vmem:[%s1687_s14 + $0xe8] sm:$0xff] %v1073_v63 }
 0x237   : > { %v1077_v1 = vpop.f32.mrb[46].mxu1 }
 0x238   : > { %v1078_v2 = vadd.f32 %v1680_v30, %v1077_v1  ;;  %v1079_v3 = vpop.f32.mrb[47].mxu1 }
 0x23a   : > { %1116 = vst [vmem:[%s1687_s14 + $0xf0] sm:$0xff] %v1078_v2 }
 0x23b   : > { %v1082_v4 = vpop.f32.mrb[48].mxu1 }
 0x23c   : > { %v1083_v6 = vadd.f32 %v1680_v30, %v1082_v4  ;;  %v1084_v7 = vpop.f32.mrb[49].mxu1 }
 0x23e   : > { %1117 = vst [vmem:[%s1687_s14 + $0xf8] sm:$0xff] %v1083_v6 }
 0x23f PF: > { %s15_s18 = sadd.s32 1, %s1318_s18  }
 0x240   : > { %p12_p4 = scmp.ge.s32.totalorder %s15_s18, 4  }
 0x242   :  { %14 = sbr.rel (!%p12_p4) target bundleno = 1 (0x1), region = 70 }

</bundles_post_ra>
